<compile_context>
chip_gen: v6e
topology: v6e:2x2x1
jax: 0.10.0
libtpu: 0.0.40
codegen_flags: <defaults>
</compile_context>

<pallas_src>
import functools

import jax
import jax.numpy as jnp
from jax import lax
from jax.experimental import pallas as pl
from jax.experimental.pallas import tpu as pltpu

LANE = 128
SUBLANE = 8


def _round_up(x, m):
    return (x + m - 1) // m * m


def _fold_bn(bn):
    scale = bn["gamma"] / jnp.sqrt(bn["var"] + bn["eps"])
    bias = bn["beta"] - bn["mean"] * scale
    return scale, bias


def _pad_axis(a, axis, target):
    pad = target - a.shape[axis]
    if pad == 0:
        return a
    widths = [(0, 0)] * a.ndim
    widths[axis] = (0, pad)
    return jnp.pad(a, widths)


# ----------------------------------------------------------------------------
# Fused bottleneck kernel: one image (all channels) per grid step.
# Spatial layout inside the kernel: rows are flattened (h, w') with
# w' in [0, Wp) where Wp = W + 1 and column W is a zero separator column.
# ----------------------------------------------------------------------------
def _bottleneck_kernel(x_ref, mask_ref, w1_ref, b1_ref, w2_ref, b2_ref,
                       w3_ref, b3_ref, o_ref, ypad_ref, *, Wp, HWp, TOP,
                       last_relu):
    cmid_p = w1_ref.shape[1]
    x = x_ref[0]                                               # (HWp, Cin_p) bf16

    # ---- conv1 (1x1) + bn1 + relu  (BN scale pre-folded into w1) ------------
    y1 = jnp.dot(x, w1_ref[...], preferred_element_type=jnp.float32)
    y1 = jnp.maximum(y1 + b1_ref[...], 0.0)                    # (HWp, cmid_p) f32
    # Re-zero the width-pad column (bias+relu made it nonzero) so the flat 3x3
    # taps below read zeros when a +-1 shift wraps across a row boundary.
    y1 = y1 * mask_ref[...]

    # ---- stage y1 into the flat halo-padded VMEM scratch ---------------------
    ypad_ref[0:TOP, :] = jnp.zeros((TOP, cmid_p), jnp.float32)             # top halo
    ypad_ref[TOP:TOP + HWp, :] = y1                                         # image
    ypad_ref[TOP + HWp:TOP + HWp + TOP, :] = jnp.zeros((TOP, cmid_p),
                                                       jnp.float32)        # bottom halo

    # ---- conv2 (3x3, pad=1) + bn2 + relu: 9 contiguous shifted matmuls -------
    acc = jnp.zeros((HWp, cmid_p), jnp.float32)
    for k in range(9):
        kh, kw = k // 3, k % 3
        start = TOP + (kh - 1) * Wp + (kw - 1)
        tap = ypad_ref[start:start + HWp, :]                   # contiguous 2-D slice
        acc = acc + jnp.dot(tap.astype(jnp.bfloat16), w2_ref[k],
                            preferred_element_type=jnp.float32)
    y2 = jnp.maximum(acc + b2_ref[...], 0.0).astype(x.dtype)   # bf16

    # ---- conv3 (1x1) + bn3 + identity residual (+ relu) ----------------------
    y3 = jnp.dot(y2, w3_ref[...], preferred_element_type=jnp.float32) + b3_ref[...]
    y3 = y3 + x.astype(jnp.float32)
    if last_relu:
        y3 = jnp.maximum(y3, 0.0)
    o_ref[0] = y3.astype(o_ref.dtype)


# ----------------------------------------------------------------------------
# NHWC entry point (preferred: keep the network channels-last, transpose once).
# ----------------------------------------------------------------------------
def bottleneck_forward_nhwc(x_nhwc, params, last_relu=True):
    N, H, W, Cin = x_nhwc.shape
    cmid = params["w1"].shape[0]
    cout = params["w3"].shape[0]
    assert Cin == cout, "identity residual requires inplanes == planes"

    cin_p = _round_up(Cin, LANE)
    cmid_p = _round_up(cmid, LANE)
    cout_p = _round_up(cout, LANE)

    Wp = W + 1                              # one zero column separates flattened rows
    HWp = H * Wp
    TOP = _round_up(Wp + 1, SUBLANE)        # halo rows above/below the flattened image
    TOTAL = HWp + 2 * TOP

    s1, b1 = _fold_bn(params["bn1"])
    s2, b2 = _fold_bn(params["bn2"])
    s3, b3 = _fold_bn(params["bn3"])

    # Fold BN scale into weights; pad channels to lane-dense widths; cast to bf16.
    w1 = params["w1"][:, :, 0, 0].T * s1[None, :]                    # (Cin, cmid)
    w2 = jnp.transpose(params["w2"], (2, 3, 1, 0)) * s2              # (3,3,cmid,cmid)
    w2 = w2.reshape(9, cmid, cmid)
    w3 = params["w3"][:, :, 0, 0].T * s3[None, :]                    # (cmid, cout)

    w1p = _pad_axis(_pad_axis(w1, 0, cin_p), 1, cmid_p).astype(jnp.bfloat16)
    w2p = _pad_axis(_pad_axis(w2, 1, cmid_p), 2, cmid_p).astype(jnp.bfloat16)
    w3p = _pad_axis(_pad_axis(w3, 0, cmid_p), 1, cout_p).astype(jnp.bfloat16)
    b1p = _pad_axis(b1.reshape(1, cmid), 1, cmid_p).astype(jnp.float32)
    b2p = _pad_axis(b2.reshape(1, cmid), 1, cmid_p).astype(jnp.float32)
    b3p = _pad_axis(b3.reshape(1, cout), 1, cout_p).astype(jnp.float32)

    # Width-pad with one zero column + channel-pad, then flatten spatial dims.
    x_p = jnp.pad(x_nhwc, ((0, 0), (0, 0), (0, Wp - W), (0, cin_p - Cin)))
    x_p = x_p.reshape(N, HWp, cin_p).astype(jnp.bfloat16)

    # Per-row mask: 1.0 for real columns, 0.0 for the zero separator column.
    colmask = (jnp.arange(Wp) < W).astype(jnp.float32)
    colmask = jnp.tile(colmask, H).reshape(HWp, 1)

    kernel = functools.partial(_bottleneck_kernel, Wp=Wp, HWp=HWp, TOP=TOP,
                               last_relu=last_relu)

    out = pl.pallas_call(
        kernel,
        out_shape=jax.ShapeDtypeStruct((N, HWp, cout_p), jnp.float32),
        grid_spec=pltpu.PrefetchScalarGridSpec(
            num_scalar_prefetch=0,
            grid=(N,),
            in_specs=[
                pl.BlockSpec((1, HWp, cin_p), lambda n: (n, 0, 0)),      # x
                pl.BlockSpec((HWp, 1), lambda n: (0, 0)),                # column mask
                pl.BlockSpec((cin_p, cmid_p), lambda n: (0, 0)),         # w1 (scaled)
                pl.BlockSpec((1, cmid_p), lambda n: (0, 0)),             # b1
                pl.BlockSpec((9, cmid_p, cmid_p), lambda n: (0, 0, 0)),  # w2 (scaled)
                pl.BlockSpec((1, cmid_p), lambda n: (0, 0)),             # b2
                pl.BlockSpec((cmid_p, cout_p), lambda n: (0, 0)),        # w3 (scaled)
                pl.BlockSpec((1, cout_p), lambda n: (0, 0)),             # b3
            ],
            out_specs=pl.BlockSpec((1, HWp, cout_p), lambda n: (n, 0, 0)),
            scratch_shapes=[pltpu.VMEM((TOTAL, cmid_p), jnp.float32)],
        ),
        compiler_params=pltpu.CompilerParams(
            dimension_semantics=("parallel",),
        ),
    )(x_p, colmask, w1p, b1p, w2p, b2p, w3p, b3p)

    # Strip the separator column and the channel padding.
    return out.reshape(N, H, Wp, cout_p)[:, :, :W, :cout]


# ----------------------------------------------------------------------------
# NCHW wrapper (matches the PyTorch module interface).  In a full network, keep
# activations NHWC and call bottleneck_forward_nhwc directly.
# ----------------------------------------------------------------------------
def bottleneck_forward(x_nchw, params, last_relu=True):
    x = jnp.transpose(x_nchw, (0, 2, 3, 1))
    out = bottleneck_forward_nhwc(x, params, last_relu=last_relu)
    return jnp.transpose(out, (0, 3, 1, 2))


# ----------------------------------------------------------------------------
# Parameter construction (deterministic, synthetic)
# ----------------------------------------------------------------------------
def make_bottleneck_params(key, inplanes, planes, expansion=4):
    cmid = planes // expansion
    k1, k2, k3 = jax.random.split(key, 3)
    params = {
        # PyTorch conv weight layouts: (Cout, Cin, kh, kw)
        "w1": jax.random.normal(k1, (cmid, inplanes, 1, 1), jnp.float32) * 0.1,
        "w2": jax.random.normal(k2, (cmid, cmid, 3, 3), jnp.float32) * 0.1,
        "w3": jax.random.normal(k3, (planes, cmid, 1, 1), jnp.float32) * 0.1,
    }
    for name, c in (("bn1", cmid), ("bn2", cmid), ("bn3", planes)):
        params[name] = {
            "gamma": jnp.full((c,), 1.0, jnp.float32),
            "beta": jnp.full((c,), 0.05, jnp.float32),
            "mean": jnp.linspace(-0.1, 0.1, c, dtype=jnp.float32),
            "var": jnp.linspace(0.9, 1.1, c, dtype=jnp.float32),
            "eps": 1e-5,
        }
    return params


# ----------------------------------------------------------------------------
# Pure-JAX reference (lax conv, f32) for correctness checking
# ----------------------------------------------------------------------------
def bottleneck_reference(x_nchw, params, last_relu=True):
    def conv(x, w, stride=1, pad=0):
        return lax.conv_general_dilated(
            x, w, window_strides=(stride, stride),
            padding=[(pad, pad), (pad, pad)],
            dimension_numbers=("NCHW", "OIHW", "NCHW"),
        )

    def bn(x, p):
        s, b = _fold_bn(p)
        return x * s[None, :, None, None] + b[None, :, None, None]

    out = jnp.maximum(bn(conv(x_nchw, params["w1"]), params["bn1"]), 0.0)
    out = jnp.maximum(bn(conv(out, params["w2"], pad=1), params["bn2"]), 0.0)
    out = bn(conv(out, params["w3"]), params["bn3"]) + x_nchw
    if last_relu:
        out = jnp.maximum(out, 0.0)
    return out


if __name__ == "__main__":
    key = jax.random.PRNGKey(0)
    kx, kp = jax.random.split(key)

    N, inplanes, H, W = 2, 32, 16, 16
    planes = 32  # identity residual => planes == inplanes; mid channels = planes // 4 = 8

    x = jax.random.normal(kx, (N, inplanes, H, W), jnp.float32)
    params = make_bottleneck_params(kp, inplanes, planes)

    out = bottleneck_forward(x, params, last_relu=True)
    out = jax.block_until_ready(out)

    ref = bottleneck_reference(x, params, last_relu=True)
    assert out.shape == ref.shape == (N, planes, H, W)
    max_err = float(jnp.max(jnp.abs(out - ref)))
    # bf16 MXU inputs => loosen tolerance vs. the f32 reference.
    assert jnp.allclose(out, ref, rtol=3e-2, atol=3e-2), max_err

    print("KERNEL_OK")
</pallas_src>

<mosaic_0001>
module attributes {stable_mosaic.version = 11 : i64} {
  func.func @_bottleneck_kernel(%arg0: i32, %arg1: memref<1x272x128xbf16, #tpu.memory_space<vmem>>, %arg2: memref<272x1xf32, #tpu.memory_space<vmem>>, %arg3: memref<128x128xbf16, #tpu.memory_space<vmem>>, %arg4: memref<1x128xf32, #tpu.memory_space<vmem>>, %arg5: memref<9x128x128xbf16, #tpu.memory_space<vmem>>, %arg6: memref<1x128xf32, #tpu.memory_space<vmem>>, %arg7: memref<128x128xbf16, #tpu.memory_space<vmem>>, %arg8: memref<1x128xf32, #tpu.memory_space<vmem>>, %arg9: memref<1x272x128xf32, #tpu.memory_space<vmem>>, %arg10: memref<320x128xf32, #tpu.memory_space<vmem>>) attributes {dimension_semantics = [#tpu.dimension_semantics<parallel>], iteration_bounds = array<i64: 2>, scalar_prefetch = 0 : i64, scratch_operands = 1 : i64, tpu.core_type = #tpu.core_type<tc>, window_params = [{transform_indices = @transform_0, window_bounds = array<i64: 1, 272, 128>}, {pipeline_mode = #tpu.pipeline_mode<synchronous>, transform_indices = @transform_1, window_bounds = array<i64: 272, 1>}, {pipeline_mode = #tpu.pipeline_mode<synchronous>, transform_indices = @transform_2, window_bounds = array<i64: 128, 128>}, {pipeline_mode = #tpu.pipeline_mode<synchronous>, transform_indices = @transform_3, window_bounds = array<i64: 1, 128>}, {pipeline_mode = #tpu.pipeline_mode<synchronous>, transform_indices = @transform_4, window_bounds = array<i64: 9, 128, 128>}, {pipeline_mode = #tpu.pipeline_mode<synchronous>, transform_indices = @transform_5, window_bounds = array<i64: 1, 128>}, {pipeline_mode = #tpu.pipeline_mode<synchronous>, transform_indices = @transform_6, window_bounds = array<i64: 128, 128>}, {pipeline_mode = #tpu.pipeline_mode<synchronous>, transform_indices = @transform_7, window_bounds = array<i64: 1, 128>}, {transform_indices = @transform_8, window_bounds = array<i64: 1, 272, 128>}]} {
    %c0 = arith.constant 0 : index
    %c0_0 = arith.constant 0 : index
    %c0_1 = arith.constant 0 : index
    %0 = vector.load %arg1[%c0, %c0_0, %c0_1] : memref<1x272x128xbf16, #tpu.memory_space<vmem>>, vector<1x272x128xbf16>
    %1 = vector.shape_cast %0 : vector<1x272x128xbf16> to vector<272x128xbf16>
    %c0_2 = arith.constant 0 : index
    %c0_3 = arith.constant 0 : index
    %2 = vector.load %arg3[%c0_2, %c0_3] : memref<128x128xbf16, #tpu.memory_space<vmem>>, vector<128x128xbf16>
    %cst = arith.constant dense<0.000000e+00> : vector<272x128xf32>
    %3 = tpu.matmul %1, %2, %cst {dimension_numbers = #tpu.dot_dimension_numbers<[1], [0], [0], [1], [0, 0, 1, 1], [], []>} : vector<272x128xbf16>, vector<128x128xbf16>, vector<272x128xf32> -> vector<272x128xf32>
    %c0_4 = arith.constant 0 : index
    %c0_5 = arith.constant 0 : index
    %4 = vector.load %arg4[%c0_4, %c0_5] : memref<1x128xf32, #tpu.memory_space<vmem>>, vector<1x128xf32>
    %5 = vector.broadcast %4 : vector<1x128xf32> to vector<272x128xf32>
    %6 = arith.addf %3, %5 : vector<272x128xf32>
    %cst_6 = arith.constant 0.000000e+00 : f32
    %7 = vector.broadcast %cst_6 : f32 to vector<272x128xf32>
    %8 = arith.maximumf %6, %7 : vector<272x128xf32>
    %c0_7 = arith.constant 0 : index
    %c0_8 = arith.constant 0 : index
    %9 = vector.load %arg2[%c0_7, %c0_8] : memref<272x1xf32, #tpu.memory_space<vmem>>, vector<272x1xf32>
    %10 = vector.broadcast %9 : vector<272x1xf32> to vector<272x128xf32>
    %11 = arith.mulf %8, %10 : vector<272x128xf32>
    %cst_9 = arith.constant 0.000000e+00 : f32
    %12 = vector.broadcast %cst_9 : f32 to vector<24x128xf32>
    %c0_10 = arith.constant 0 : index
    %c0_11 = arith.constant 0 : index
    %13 = vector.load %arg10[%c0_10, %c0_11] : memref<320x128xf32, #tpu.memory_space<vmem>>, vector<24x128xf32>
    tpu.vector_store %arg10[%c0_10, %c0_11], %12 {strides = array<i32>} : memref<320x128xf32, #tpu.memory_space<vmem>>, vector<24x128xf32>,
    %c24 = arith.constant 24 : index
    %c0_12 = arith.constant 0 : index
    %14 = vector.load %arg10[%c24, %c0_12] : memref<320x128xf32, #tpu.memory_space<vmem>>, vector<272x128xf32>
    tpu.vector_store %arg10[%c24, %c0_12], %11 {strides = array<i32>} : memref<320x128xf32, #tpu.memory_space<vmem>>, vector<272x128xf32>,
    %cst_13 = arith.constant 0.000000e+00 : f32
    %15 = vector.broadcast %cst_13 : f32 to vector<24x128xf32>
    %c296 = arith.constant 296 : index
    %c0_14 = arith.constant 0 : index
    %16 = vector.load %arg10[%c296, %c0_14] : memref<320x128xf32, #tpu.memory_space<vmem>>, vector<24x128xf32>
    tpu.vector_store %arg10[%c296, %c0_14], %15 {strides = array<i32>} : memref<320x128xf32, #tpu.memory_space<vmem>>, vector<24x128xf32>,
    %cst_15 = arith.constant 0.000000e+00 : f32
    %17 = vector.broadcast %cst_15 : f32 to vector<272x128xf32>
    %c6 = arith.constant 6 : index
    %c0_16 = arith.constant 0 : index
    %18 = vector.load %arg10[%c6, %c0_16] : memref<320x128xf32, #tpu.memory_space<vmem>>, vector<272x128xf32>
    %19 = arith.truncf %18 : vector<272x128xf32> to vector<272x128xbf16>
    %c0_17 = arith.constant 0 : index
    %c0_18 = arith.constant 0 : index
    %c0_19 = arith.constant 0 : index
    %20 = vector.load %arg5[%c0_17, %c0_18, %c0_19] : memref<9x128x128xbf16, #tpu.memory_space<vmem>>, vector<1x128x128xbf16>
    %21 = vector.shape_cast %20 : vector<1x128x128xbf16> to vector<128x128xbf16>
    %cst_20 = arith.constant dense<0.000000e+00> : vector<272x128xf32>
    %22 = tpu.matmul %19, %21, %cst_20 {dimension_numbers = #tpu.dot_dimension_numbers<[1], [0], [0], [1], [0, 0, 1, 1], [], []>} : vector<272x128xbf16>, vector<128x128xbf16>, vector<272x128xf32> -> vector<272x128xf32>
    %23 = arith.addf %17, %22 : vector<272x128xf32>
    %c7 = arith.constant 7 : index
    %c0_21 = arith.constant 0 : index
    %24 = vector.load %arg10[%c7, %c0_21] : memref<320x128xf32, #tpu.memory_space<vmem>>, vector<272x128xf32>
    %25 = arith.truncf %24 : vector<272x128xf32> to vector<272x128xbf16>
    %c1 = arith.constant 1 : index
    %c0_22 = arith.constant 0 : index
    %c0_23 = arith.constant 0 : index
    %26 = vector.load %arg5[%c1, %c0_22, %c0_23] : memref<9x128x128xbf16, #tpu.memory_space<vmem>>, vector<1x128x128xbf16>
    %27 = vector.shape_cast %26 : vector<1x128x128xbf16> to vector<128x128xbf16>
    %cst_24 = arith.constant dense<0.000000e+00> : vector<272x128xf32>
    %28 = tpu.matmul %25, %27, %cst_24 {dimension_numbers = #tpu.dot_dimension_numbers<[1], [0], [0], [1], [0, 0, 1, 1], [], []>} : vector<272x128xbf16>, vector<128x128xbf16>, vector<272x128xf32> -> vector<272x128xf32>
    %29 = arith.addf %23, %28 : vector<272x128xf32>
    %c8 = arith.constant 8 : index
    %c0_25 = arith.constant 0 : index
    %30 = vector.load %arg10[%c8, %c0_25] : memref<320x128xf32, #tpu.memory_space<vmem>>, vector<272x128xf32>
    %31 = arith.truncf %30 : vector<272x128xf32> to vector<272x128xbf16>
    %c2 = arith.constant 2 : index
    %c0_26 = arith.constant 0 : index
    %c0_27 = arith.constant 0 : index
    %32 = vector.load %arg5[%c2, %c0_26, %c0_27] : memref<9x128x128xbf16, #tpu.memory_space<vmem>>, vector<1x128x128xbf16>
    %33 = vector.shape_cast %32 : vector<1x128x128xbf16> to vector<128x128xbf16>
    %cst_28 = arith.constant dense<0.000000e+00> : vector<272x128xf32>
    %34 = tpu.matmul %31, %33, %cst_28 {dimension_numbers = #tpu.dot_dimension_numbers<[1], [0], [0], [1], [0, 0, 1, 1], [], []>} : vector<272x128xbf16>, vector<128x128xbf16>, vector<272x128xf32> -> vector<272x128xf32>
    %35 = arith.addf %29, %34 : vector<272x128xf32>
    %c23 = arith.constant 23 : index
    %c0_29 = arith.constant 0 : index
    %36 = vector.load %arg10[%c23, %c0_29] : memref<320x128xf32, #tpu.memory_space<vmem>>, vector<272x128xf32>
    %37 = arith.truncf %36 : vector<272x128xf32> to vector<272x128xbf16>
    %c3 = arith.constant 3 : index
    %c0_30 = arith.constant 0 : index
    %c0_31 = arith.constant 0 : index
    %38 = vector.load %arg5[%c3, %c0_30, %c0_31] : memref<9x128x128xbf16, #tpu.memory_space<vmem>>, vector<1x128x128xbf16>
    %39 = vector.shape_cast %38 : vector<1x128x128xbf16> to vector<128x128xbf16>
    %cst_32 = arith.constant dense<0.000000e+00> : vector<272x128xf32>
    %40 = tpu.matmul %37, %39, %cst_32 {dimension_numbers = #tpu.dot_dimension_numbers<[1], [0], [0], [1], [0, 0, 1, 1], [], []>} : vector<272x128xbf16>, vector<128x128xbf16>, vector<272x128xf32> -> vector<272x128xf32>
    %41 = arith.addf %35, %40 : vector<272x128xf32>
    %c24_33 = arith.constant 24 : index
    %c0_34 = arith.constant 0 : index
    %42 = vector.load %arg10[%c24_33, %c0_34] : memref<320x128xf32, #tpu.memory_space<vmem>>, vector<272x128xf32>
    %43 = arith.truncf %42 : vector<272x128xf32> to vector<272x128xbf16>
    %c4 = arith.constant 4 : index
    %c0_35 = arith.constant 0 : index
    %c0_36 = arith.constant 0 : index
    %44 = vector.load %arg5[%c4, %c0_35, %c0_36] : memref<9x128x128xbf16, #tpu.memory_space<vmem>>, vector<1x128x128xbf16>
    %45 = vector.shape_cast %44 : vector<1x128x128xbf16> to vector<128x128xbf16>
    %cst_37 = arith.constant dense<0.000000e+00> : vector<272x128xf32>
    %46 = tpu.matmul %43, %45, %cst_37 {dimension_numbers = #tpu.dot_dimension_numbers<[1], [0], [0], [1], [0, 0, 1, 1], [], []>} : vector<272x128xbf16>, vector<128x128xbf16>, vector<272x128xf32> -> vector<272x128xf32>
    %47 = arith.addf %41, %46 : vector<272x128xf32>
    %c25 = arith.constant 25 : index
    %c0_38 = arith.constant 0 : index
    %48 = vector.load %arg10[%c25, %c0_38] : memref<320x128xf32, #tpu.memory_space<vmem>>, vector<272x128xf32>
    %49 = arith.truncf %48 : vector<272x128xf32> to vector<272x128xbf16>
    %c5 = arith.constant 5 : index
    %c0_39 = arith.constant 0 : index
    %c0_40 = arith.constant 0 : index
    %50 = vector.load %arg5[%c5, %c0_39, %c0_40] : memref<9x128x128xbf16, #tpu.memory_space<vmem>>, vector<1x128x128xbf16>
    %51 = vector.shape_cast %50 : vector<1x128x128xbf16> to vector<128x128xbf16>
    %cst_41 = arith.constant dense<0.000000e+00> : vector<272x128xf32>
    %52 = tpu.matmul %49, %51, %cst_41 {dimension_numbers = #tpu.dot_dimension_numbers<[1], [0], [0], [1], [0, 0, 1, 1], [], []>} : vector<272x128xbf16>, vector<128x128xbf16>, vector<272x128xf32> -> vector<272x128xf32>
    %53 = arith.addf %47, %52 : vector<272x128xf32>
    %c40 = arith.constant 40 : index
    %c0_42 = arith.constant 0 : index
    %54 = vector.load %arg10[%c40, %c0_42] : memref<320x128xf32, #tpu.memory_space<vmem>>, vector<272x128xf32>
    %55 = arith.truncf %54 : vector<272x128xf32> to vector<272x128xbf16>
    %c6_43 = arith.constant 6 : index
    %c0_44 = arith.constant 0 : index
    %c0_45 = arith.constant 0 : index
    %56 = vector.load %arg5[%c6_43, %c0_44, %c0_45] : memref<9x128x128xbf16, #tpu.memory_space<vmem>>, vector<1x128x128xbf16>
    %57 = vector.shape_cast %56 : vector<1x128x128xbf16> to vector<128x128xbf16>
    %cst_46 = arith.constant dense<0.000000e+00> : vector<272x128xf32>
    %58 = tpu.matmul %55, %57, %cst_46 {dimension_numbers = #tpu.dot_dimension_numbers<[1], [0], [0], [1], [0, 0, 1, 1], [], []>} : vector<272x128xbf16>, vector<128x128xbf16>, vector<272x128xf32> -> vector<272x128xf32>
    %59 = arith.addf %53, %58 : vector<272x128xf32>
    %c41 = arith.constant 41 : index
    %c0_47 = arith.constant 0 : index
    %60 = vector.load %arg10[%c41, %c0_47] : memref<320x128xf32, #tpu.memory_space<vmem>>, vector<272x128xf32>
    %61 = arith.truncf %60 : vector<272x128xf32> to vector<272x128xbf16>
    %c7_48 = arith.constant 7 : index
    %c0_49 = arith.constant 0 : index
    %c0_50 = arith.constant 0 : index
    %62 = vector.load %arg5[%c7_48, %c0_49, %c0_50] : memref<9x128x128xbf16, #tpu.memory_space<vmem>>, vector<1x128x128xbf16>
    %63 = vector.shape_cast %62 : vector<1x128x128xbf16> to vector<128x128xbf16>
    %cst_51 = arith.constant dense<0.000000e+00> : vector<272x128xf32>
    %64 = tpu.matmul %61, %63, %cst_51 {dimension_numbers = #tpu.dot_dimension_numbers<[1], [0], [0], [1], [0, 0, 1, 1], [], []>} : vector<272x128xbf16>, vector<128x128xbf16>, vector<272x128xf32> -> vector<272x128xf32>
    %65 = arith.addf %59, %64 : vector<272x128xf32>
    %c42 = arith.constant 42 : index
    %c0_52 = arith.constant 0 : index
    %66 = vector.load %arg10[%c42, %c0_52] : memref<320x128xf32, #tpu.memory_space<vmem>>, vector<272x128xf32>
    %67 = arith.truncf %66 : vector<272x128xf32> to vector<272x128xbf16>
    %c8_53 = arith.constant 8 : index
    %c0_54 = arith.constant 0 : index
    %c0_55 = arith.constant 0 : index
    %68 = vector.load %arg5[%c8_53, %c0_54, %c0_55] : memref<9x128x128xbf16, #tpu.memory_space<vmem>>, vector<1x128x128xbf16>
    %69 = vector.shape_cast %68 : vector<1x128x128xbf16> to vector<128x128xbf16>
    %cst_56 = arith.constant dense<0.000000e+00> : vector<272x128xf32>
    %70 = tpu.matmul %67, %69, %cst_56 {dimension_numbers = #tpu.dot_dimension_numbers<[1], [0], [0], [1], [0, 0, 1, 1], [], []>} : vector<272x128xbf16>, vector<128x128xbf16>, vector<272x128xf32> -> vector<272x128xf32>
    %71 = arith.addf %65, %70 : vector<272x128xf32>
    %c0_57 = arith.constant 0 : index
    %c0_58 = arith.constant 0 : index
    %72 = vector.load %arg6[%c0_57, %c0_58] : memref<1x128xf32, #tpu.memory_space<vmem>>, vector<1x128xf32>
    %73 = vector.broadcast %72 : vector<1x128xf32> to vector<272x128xf32>
    %74 = arith.addf %71, %73 : vector<272x128xf32>
    %cst_59 = arith.constant 0.000000e+00 : f32
    %75 = vector.broadcast %cst_59 : f32 to vector<272x128xf32>
    %76 = arith.maximumf %74, %75 : vector<272x128xf32>
    %77 = arith.truncf %76 : vector<272x128xf32> to vector<272x128xbf16>
    %c0_60 = arith.constant 0 : index
    %c0_61 = arith.constant 0 : index
    %78 = vector.load %arg7[%c0_60, %c0_61] : memref<128x128xbf16, #tpu.memory_space<vmem>>, vector<128x128xbf16>
    %cst_62 = arith.constant dense<0.000000e+00> : vector<272x128xf32>
    %79 = tpu.matmul %77, %78, %cst_62 {dimension_numbers = #tpu.dot_dimension_numbers<[1], [0], [0], [1], [0, 0, 1, 1], [], []>} : vector<272x128xbf16>, vector<128x128xbf16>, vector<272x128xf32> -> vector<272x128xf32>
    %c0_63 = arith.constant 0 : index
    %c0_64 = arith.constant 0 : index
    %80 = vector.load %arg8[%c0_63, %c0_64] : memref<1x128xf32, #tpu.memory_space<vmem>>, vector<1x128xf32>
    %81 = vector.broadcast %80 : vector<1x128xf32> to vector<272x128xf32>
    %82 = arith.addf %79, %81 : vector<272x128xf32>
    %83 = arith.extf %1 : vector<272x128xbf16> to vector<272x128xf32>
    %84 = arith.addf %82, %83 : vector<272x128xf32>
    %cst_65 = arith.constant 0.000000e+00 : f32
    %85 = vector.broadcast %cst_65 : f32 to vector<272x128xf32>
    %86 = arith.maximumf %84, %85 : vector<272x128xf32>
    %c0_66 = arith.constant 0 : index
    %c0_67 = arith.constant 0 : index
    %c0_68 = arith.constant 0 : index
    %87 = vector.load %arg9[%c0_66, %c0_67, %c0_68] : memref<1x272x128xf32, #tpu.memory_space<vmem>>, vector<1x272x128xf32>
    %88 = vector.shape_cast %87 : vector<1x272x128xf32> to vector<272x128xf32>
    %89 = vector.shape_cast %86 : vector<272x128xf32> to vector<1x272x128xf32>
    tpu.vector_store %arg9[%c0_66, %c0_67, %c0_68], %89 {strides = array<i32>} : memref<1x272x128xf32, #tpu.memory_space<vmem>>, vector<1x272x128xf32>,
    return
  }
  func.func @transform_0(%arg0: i32) -> (i32, i32, i32) {
    %c0_i32 = arith.constant 0 : i32
    %c0_i32_0 = arith.constant 0 : i32
    %c0_i32_1 = arith.constant 0 : i32
    return %arg0, %c0_i32, %c0_i32_0 : i32, i32, i32
  }
  func.func @transform_1(%arg0: i32) -> (i32, i32) {
    %c0_i32 = arith.constant 0 : i32
    %c0_i32_0 = arith.constant 0 : i32
    %c0_i32_1 = arith.constant 0 : i32
    return %c0_i32, %c0_i32_0 : i32, i32
  }
  func.func @transform_2(%arg0: i32) -> (i32, i32) {
    %c0_i32 = arith.constant 0 : i32
    %c0_i32_0 = arith.constant 0 : i32
    %c0_i32_1 = arith.constant 0 : i32
    return %c0_i32, %c0_i32_0 : i32, i32
  }
  func.func @transform_3(%arg0: i32) -> (i32, i32) {
    %c0_i32 = arith.constant 0 : i32
    %c0_i32_0 = arith.constant 0 : i32
    %c0_i32_1 = arith.constant 0 : i32
    return %c0_i32, %c0_i32_0 : i32, i32
  }
  func.func @transform_4(%arg0: i32) -> (i32, i32, i32) {
    %c0_i32 = arith.constant 0 : i32
    %c0_i32_0 = arith.constant 0 : i32
    %c0_i32_1 = arith.constant 0 : i32
    %c0_i32_2 = arith.constant 0 : i32
    return %c0_i32, %c0_i32_0, %c0_i32_1 : i32, i32, i32
  }
  func.func @transform_5(%arg0: i32) -> (i32, i32) {
    %c0_i32 = arith.constant 0 : i32
    %c0_i32_0 = arith.constant 0 : i32
    %c0_i32_1 = arith.constant 0 : i32
    return %c0_i32, %c0_i32_0 : i32, i32
  }
  func.func @transform_6(%arg0: i32) -> (i32, i32) {
    %c0_i32 = arith.constant 0 : i32
    %c0_i32_0 = arith.constant 0 : i32
    %c0_i32_1 = arith.constant 0 : i32
    return %c0_i32, %c0_i32_0 : i32, i32
  }
  func.func @transform_7(%arg0: i32) -> (i32, i32) {
    %c0_i32 = arith.constant 0 : i32
    %c0_i32_0 = arith.constant 0 : i32
    %c0_i32_1 = arith.constant 0 : i32
    return %c0_i32, %c0_i32_0 : i32, i32
  }
  func.func @transform_8(%arg0: i32) -> (i32, i32, i32) {
    %c0_i32 = arith.constant 0 : i32
    %c0_i32_0 = arith.constant 0 : i32
    %c0_i32_1 = arith.constant 0 : i32
    return %arg0, %c0_i32, %c0_i32_0 : i32, i32, i32
  }
}

</mosaic_0001>

<bundles_post_ra>
// kernel: tpu_custom_call.1
= control target key start
LH: loop header
LB: loop body
LE: loop exit
PB: predicated region body
PF: predicated region fallthrough
CT: control target
= control target key end

     0   :  { %13 = vsyncpa [#allocation4], 0  ;;  %s7865_s0 = inlined_call_operand.vmem [shape: bf16[2,272,128], index: 0, kind: input, shape index: {}]   ;;  %s7866_s1 = inlined_call_operand.vmem [shape: f32[272,1], index: 1, kind: input, shape index: {}]   ;;  %s7867_s2 = inlined_call_operand.hbm [shape: bf16[128,128], index: 2, kind: input, shape index: {}]   ;;  %s7868_s3 = inlined_call_operand.vmem [shape: f32[1,128], index: 3, kind: input, shape index: {}]   ;;  %s7869_s4 = inlined_call_operand.hbm [shape: bf16[9,128,128], index: 4, kind: input, shape index: {}]   ;;  %s7870_s5 = inlined_call_operand.vmem [shape: f32[1,128], index: 5, kind: input, shape index: {}]   ;;  %s7871_s6 = inlined_call_operand.hbm [shape: bf16[128,128], index: 6, kind: input, shape index: {}]   ;;  %s7872_s7 = inlined_call_operand.vmem [shape: f32[1,128], index: 7, kind: input, shape index: {}]   ;;  %s7873_s8 = inlined_call_operand.hbm [shape: f32[2,272,128], index: 8, kind: output, shape index: {}]  }
   0x1   :  { %14 = vsyncpa [#allocation7], 0 }
   0x2   :  { %15 = vsyncpa [#allocation5], 0 }
   0x3   :  { %17 = vsyncpa [#allocation5 + $0x1], 0  ;;  %s6180_s27 = smov 0   ;;  %s6182_s28 = smov 0  }
   0x4   :  { %s6184_s29 = smov 0   ;;  %s6186_s30 = smov 0  }
   0x5 LB: > { %s6201_s9 = sadd.s32 4294967295, %s6122_s30   ;;  %s4414_s10 = sadd.s32 4294967294, %s6122_s30   ;;  %s6122_s30 = sphi %s6186_s30, %s7914_s30   ;;  %s6118_s29 = sphi %s6184_s29, %s7913_s29   ;;  %s6114_s28 = sphi %s6182_s28, %s7912_s28   ;;  %s6110_s27 = sphi %s6180_s27, %s7911_s27  }
   0x6   : > { %s6205_s11 = sadd.s32 1, %s6122_s30   ;;  %s203_s12 = sadd.s32 1, %s6118_s29 }
   0x7   : > { %s200_s13 = ssub.s32 %s6122_s30, %s6205_s11  ;;  %p213_p0 = scmp.ne.s32.totalorder %s6118_s29, %s6114_s28 }
   0x8   : > { %p201_p1 = scmp.eq.s32.totalorder %s200_s13, 0  ;;  %p214_p2 = scmp.eq.s32.totalorder %s6201_s9, 1 }
   0x9   : > { %p219_p3 = scmp.ne.s32.totalorder %s6114_s28, %s6110_s27  ;;  %p220_p4 = scmp.eq.s32.totalorder %s4414_s10, 1 }
   0xa   : > { %s6216_s14 = scalar_select %p201_p1, %s6118_s29, %s203_s12  }
   0xb   : > { %p6218_p5 = por %p214_p2, %p213_p0  ;;  %p6222_p6 = por %p220_p4, %p219_p3 }
   0xc   : > { %p4415_p7 = scmp.ge.s32.totalorder %s6122_s30, 1  ;;  %p227_p8 = scmp.lt.s32.totalorder %s6122_s30, 3 }
   0xd   : > { %s7881_s15 = scalar_select %p6218_p5, 1, 0 }
   0xe   : > { %s7882_s16 = scalar_select %p6222_p6, 1, 0 }
   0xf   : > { %p7874_p9 = scmp.eq.s32.totalorder %s6201_s9, 0  ;;  %p6229_p10 = pnand %p4415_p7, %p227_p8 }
  0x10   : > { %s6124_s18 = smov [#allocation6]   ;;  %s6125_s21 = smov [#allocation3]  }
  0x11   : > { %p5768_p11 = pneg %p6229_p10  ;;  %s258_s19 = sshll.u32 %s6124_s18, 4  ;;  %s259_s19 = int_to_ptr.vmem [resolvable:$true] %s258_s19 }
  0x12   : > { %s242_s22 = sshll.u32 %s6125_s21, 4  ;;  %s6126_s23 = smov [#allocation8]   ;;  %s243_s22 = int_to_ptr.vmem [resolvable:$true] %s242_s22 }
  0x13   : > { %p6237_p12 = pnand %p7874_p9, %p5768_p11  ;;  %s274_s24 = sshll.u32 %s6126_s23, 4  ;;  %s275_s24 = int_to_ptr.vmem [resolvable:$true] %s274_s24 }
  0x14   : > { %s5987_s25 = scalar_lea.vmem %s259_s19, 9216  ;;  %p5995_p3 = scmp.lt.s32.totalorder %s259_s19, %s259_s19 }
  0x15   : > { %p5978_p13 = pneg %p6237_p12  ;;  %p5988_p0 = scmp.ne.s32.totalorder %s259_s19, %s5987_s25 }
  0x16   : > { %p5996_p4 = scmp.lt.s32.totalorder %s5987_s25, %s5987_s25 }
  0x17   : > { %p5990_p1 = pnand %p5988_p0, %p5978_p13 }
  0x18   : > { %p5997_p7 = por %p5996_p4, %p5995_p3 }
  0x19   : > { %p5991_p2 = pneg %p5990_p1 }
  0x1b   : > { %p5998_p8 = pnand %p5997_p7, %p5991_p2 }
  0x1d   : > { %6001 = shalt.err (!%p5998_p8)
}
  0x1e   : > { %s6127_s26 = smov 64   ;;  %s6128_s10 = smov 4  }
  0x1f   : > { %5774 = dma.hbm_to_vmem [thread:$0]  (!%p6237_p12), %s7869_s4, 9216, %s259_s19, [#allocation7], %s6127_s26, %s6127_s26, %s6128_s10  }
  0x20   : > { %s6013_s18 = scalar_lea.vmem %s243_s22, 1024  ;;  %p6021_p9 = scmp.lt.s32.totalorder %s243_s22, %s243_s22 }
  0x21   : > { %p6014_p11 = scmp.ne.s32.totalorder %s243_s22, %s6013_s18  ;;  %p6022_p6 = scmp.lt.s32.totalorder %s6013_s18, %s6013_s18 }
  0x23   : > { %p6016_p0 = pnand %p6014_p11, %p5978_p13  ;;  %p6023_p3 = por %p6022_p6, %p6021_p9 }
  0x25   : > { %p6017_p1 = pneg %p6016_p0 }
  0x27   : > { %p6024_p2 = pnand %p6023_p3, %p6017_p1 }
  0x29   : > { %6027 = shalt.err (!%p6024_p2)
}
  0x2a   : > { %5771 = dma.hbm_to_vmem [thread:$0]  (!%p6237_p12), %s7867_s2, 1024, %s243_s22, [#allocation4], %s6127_s26, %s6127_s26, %s6128_s10  }
  0x2b   : > { %s6039_s19 = scalar_lea.vmem %s275_s24, 1024  ;;  %p6047_p11 = scmp.lt.s32.totalorder %s275_s24, %s275_s24 }
  0x2c   : > { %p6040_p4 = scmp.ne.s32.totalorder %s275_s24, %s6039_s19  ;;  %p6048_p0 = scmp.lt.s32.totalorder %s6039_s19, %s6039_s19 }
  0x2e   : > { %p6042_p7 = pnand %p6040_p4, %p5978_p13  ;;  %p6049_p5 = por %p6048_p0, %p6047_p11 }
  0x30   : > { %p6043_p8 = pneg %p6042_p7 }
  0x32   : > { %p6050_p6 = pnand %p6049_p5, %p6043_p8 }
  0x34   : > { %6053 = shalt.err (!%p6050_p6)
}
  0x35   : > { %5777 = dma.hbm_to_vmem [thread:$0]  (!%p6237_p12), %s7871_s6, 1024, %s275_s24, [#allocation7], %s6127_s26, %s6127_s26, %s6128_s10  }
  0x36   : > { %301 = sbr.rel (%p6229_p10) target bundleno = 1399 (0x577), region = 52 }
  0x3b   : > { %p7885_p9 = scmp.eq.s32.totalorder %s6201_s9, 0 }
  0x3d   : > { %6097 = dma.done.wait (%p7885_p9), [#allocation4], 1024   ;;  %p7886_p13 = pmov %p7885_p9 }
  0x3e   : > { %p7887_p1 = pmov %p7885_p9 }
  0x3f   : > { %6099 = vsyncadd (%p7886_p13), [#allocation4], 4294966272 }
  0x40   : > { %6101 = dma.done.wait (%p7887_p1), [#allocation7], 10240   ;;  %p7888_p5 = pmov %p7887_p1 }
  0x41   : > { %v6129_v0 = vmov 0.0   ;;  %vm6130_vm0 = vmmov 0   ;;  %v6131_v1 = vmov 0   ;;  %v5833_v2 = vld [vmem:[#allocation3 + $0x38] sm:$0xff]   ;;  %v5834_v3 = vld [vmem:[#allocation3 + $0x30] sm:$0xff]   ;;  %v5835_v4 = vld [vmem:[#allocation3 + $0x28] sm:$0xff]  }
  0x42   : > { %6103 = vsyncadd (%p7888_p5), [#allocation7], 4294957056  ;;  %4811 = vmatprep.subr.bf16.mxu0 %v6129_v0  ;;  %997 = vst [vmem:[#allocation2] sm:$0xff] %v6129_v0  ;;  %5735 = vmatprep.subr.bf16.mxu1 %v6129_v0  ;;  %p343_p10 = scmp.lt.s32.totalorder %s6201_s9, 1  ;;  %v759_v5 = vld [vmem:[%s7866_s1] sm:$0xff]  ;;  %v761_v7 = vld [vmem:[%s7866_s1 + $0x10] sm:$0xff] }
  0x43   : > { %998 = vst [vmem:[#allocation2 + $0x8] sm:$0xff] %v6129_v0  ;;  %999 = vst [vmem:[#allocation2 + $0x10] sm:$0xff] %v6129_v0  ;;  %4827 = vmatprep.mubr.msk.bf16.mxu0 %vm6130_vm0, %v6129_v0  ;;  %4863 = vmatprep.mubr.msk.bf16.mxu1 %vm6130_vm0, %v6129_v0  ;;  %v5836_v6 = vld [vmem:[#allocation3 + $0x20] sm:$0xff]   ;;  %v760_v8 = vld [vmem:[%s7866_s1 + $0x8] sm:$0xff]  ;;  %p7909_p3 = scmp.ne.s32.totalorder %s7881_s15, 0  ;;  %s6132_s20 = smov [#allocation9]  }
  0x44   : > { %1034 = vst [vmem:[#allocation2 + $0x128] sm:$0xff] %v6129_v0  ;;  %1035 = vst [vmem:[#allocation2 + $0x130] sm:$0xff] %v6129_v0  ;;  %5831 = vset.pattern.permute.xlu0 %v6131_v1  ;;  %5832 = vset.pattern.permute.xlu1 %v6131_v1  ;;  %s344_s26 = scalar_select %p343_p10, %s6201_s9, 1  ;;  %v762_v9 = vld [vmem:[%s7866_s1 + $0x18] sm:$0xff]  ;;  %v763_v11 = vld [vmem:[%s7866_s1 + $0x20] sm:$0xff] }
  0x45   : > { %1036 = vst [vmem:[#allocation2 + $0x138] sm:$0xff] %v6129_v0  ;;  %4812 = vmatpush3.bf16.msra.mxu0 %v5833_v2  ;;  %5743 = vmatpush3.bf16.msra.mxu1 %v5833_v2  ;;  %v5837_v10 = vld [vmem:[#allocation3 + $0x18] sm:$0xff]   ;;  %v764_v12 = vld [vmem:[%s7866_s1 + $0x28] sm:$0xff]  ;;  %v5838_v13 = vld [vmem:[#allocation3 + $0x10] sm:$0xff]   ;;  %s6058_s22 = sshll.u32 %s6132_s20, 4  ;;  %s6059_s22 = int_to_ptr.vmem [resolvable:$false] %s6058_s22 }
  0x46   : > { %4813 = vmatprep.subr.bf16.mxu0 %v6129_v0  ;;  %5736 = vmatprep.subr.bf16.mxu1 %v6129_v0  ;;  %s5752_s23 = smul.u32 136, %s344_s26  ;;  %v765_v14 = vld [vmem:[%s7866_s1 + $0x30] sm:$0xff]  ;;  %v766_v15 = vld [vmem:[%s7866_s1 + $0x38] sm:$0xff]  ;;  %v5839_v16 = vld [vmem:[#allocation3 + $0x8] sm:$0xff]   ;;  %s340_s26 = sand.u32 1, %s6114_s28  }
  0x47   : > { %795 = vperm.xlu0 %5831, %v759_v5   ;;  %805 = vperm.xlu1 %5832, %v761_v7   ;;  %v5840_v17 = vld [vmem:[#allocation3] sm:$0xff]   ;;  %v768_v20 = vld [vmem:[%s7866_s1 + $0x48] sm:$0xff]  ;;  %v769_v22 = vld [vmem:[%s7866_s1 + $0x50] sm:$0xff]  ;;  %s5751_s18 = smul.u32 272, %s340_s26  ;;  %s6060_s10 = scalar_lea.vmem %s6059_s22, 8704 }
  0x48   : > { %s6322_s24 = scalar_lea.vmem %s7865_s0, %s5752_s23  ;;  %v767_v19 = vld [vmem:[%s7866_s1 + $0x40] sm:$0xff]  ;;  %v770_v23 = vld [vmem:[%s7866_s1 + $0x58] sm:$0xff]  ;;  %v772_v25 = vld [vmem:[%s7866_s1 + $0x68] sm:$0xff]  ;;  %s5753_s23 = smul.u32 4352, %s6201_s9 }
  0x49   : > { %4814 = vmatpush3.bf16.msra.mxu0 %v5834_v3  ;;  %5744 = vmatpush3.bf16.msra.mxu1 %v5834_v3  ;;  %v349_v18 = vld [vmem:[%s6322_s24] sm:$0xff]   ;;  %v367_v21 = vld [vmem:[%s6322_s24 + $0x48] sm:$0xff]   ;;  %v5858_v26 = vld [vmem:[#allocation6 + $0x78] sm:$0xff]   ;;  %s7730_s21 = scalar_lea.vmem [#allocation9], %s5751_s18  ;;  %s7825_s9 = scalar_lea.sflag [#allocation5], %s340_s26 }
  0x4a   : > { %4815 = vmatprep.subr.bf16.mxu0 %v6129_v0  ;;  %5737 = vmatprep.subr.bf16.mxu1 %v6129_v0  ;;  %v771_v24 = vld [vmem:[%s7866_s1 + $0x60] sm:$0xff]  ;;  %v351_v27 = vld [vmem:[%s6322_s24 + $0x8] sm:$0xff]   ;;  %v369_v28 = vld [vmem:[%s6322_s24 + $0x50] sm:$0xff]   ;;  %s4321_s19 = sshll.u32 %s7730_s21, 4  ;;  %s7818_s12 = scalar_lea.hbm %s7873_s8, %s5753_s23  ;;  %s7820_s19 = int_to_ptr.vmem [resolvable:$true] %s4321_s19 }
  0x4b   : > { %800 = vperm.xlu0 %5831, %v760_v8   ;;  %810 = vperm.xlu1 %5832, %v762_v9   ;;  %v5859_v29 = vld [vmem:[#allocation6 + $0x70] sm:$0xff]   ;;  %v774_v31 = vld [vmem:[%s7866_s1 + $0x78] sm:$0xff]  ;;  %v775_v32 = vld [vmem:[%s7866_s1 + $0x80] sm:$0xff]  ;;  %s6054_s17 = scalar_lea.vmem %s7820_s19, 4352  ;;  %p6061_p7 = scmp.lt.s32.totalorder %s7820_s19, %s6059_s22 }
  0x4c   : > { %v773_v30 = vld [vmem:[%s7866_s1 + $0x70] sm:$0xff]  ;;  %v776_v33 = vld [vmem:[%s7866_s1 + $0x88] sm:$0xff]  ;;  %v371_v36 = vld [vmem:[%s6322_s24 + $0x58] sm:$0xff]   ;;  %p6055_p12 = scmp.ne.s32.totalorder %s7820_s19, %s6054_s17  ;;  %p6062_p8 = scmp.lt.s32.totalorder %s6060_s10, %s6054_s17 }
  0x4d   : > { %4816 = vmatpush3.bf16.msra.mxu0 %v5835_v4  ;;  %5745 = vmatpush3.bf16.msra.mxu1 %v5835_v4  ;;  %v5860_v34 = vld [vmem:[#allocation6 + $0x68] sm:$0xff]   ;;  %v353_v35 = vld [vmem:[%s6322_s24 + $0x10] sm:$0xff]   ;;  %v778_v38 = vld [vmem:[%s7866_s1 + $0x98] sm:$0xff] }
  0x4e   : > { %4817 = vmatprep.subr.bf16.mxu0 %v6129_v0  ;;  %5738 = vmatprep.subr.bf16.mxu1 %v6129_v0  ;;  %v777_v37 = vld [vmem:[%s7866_s1 + $0x90] sm:$0xff]  ;;  %v5862_v39 = vld [vmem:[#allocation6 + $0x38] sm:$0xff]   ;;  %v779_v40 = vld [vmem:[%s7866_s1 + $0xa0] sm:$0xff]  ;;  %p6056_p2 = pnand %p6055_p12, %p7909_p3  ;;  %p6063_p11 = por %p6062_p8, %p6061_p7 }
  0x4f   : > { %815 = vperm.xlu0 %5831, %v763_v11   ;;  %820 = vperm.xlu1 %5832, %v764_v12   ;;  %v780_v41 = vld [vmem:[%s7866_s1 + $0xa8] sm:$0xff]  ;;  %v5861_v42 = vld [vmem:[#allocation6 + $0x60] sm:$0xff]   ;;  %v5864_v43 = vld [vmem:[#allocation6 + $0x30] sm:$0xff]  }
  0x50   : > { %v355_v44 = vld [vmem:[%s6322_s24 + $0x18] sm:$0xff]   ;;  %v373_v45 = vld [vmem:[%s6322_s24 + $0x60] sm:$0xff]   ;;  %v781_v47 = vld [vmem:[%s7866_s1 + $0xb0] sm:$0xff]  ;;  %p6057_p4 = pneg %p6056_p2 }
  0x51   : > { %4818 = vmatpush3.bf16.msra.mxu0 %v5836_v6  ;;  %5746 = vmatpush3.bf16.msra.mxu1 %v5836_v6  ;;  %v5863_v46 = vld [vmem:[#allocation6 + $0x58] sm:$0xff]   ;;  %v5865_v49 = vld [vmem:[#allocation6 + $0x28] sm:$0xff]   ;;  %v783_v50 = vld [vmem:[%s7866_s1 + $0xc0] sm:$0xff] }
  0x52   : > { %4819 = vmatprep.subr.bf16.mxu0 %v6129_v0  ;;  %5739 = vmatprep.subr.bf16.mxu1 %v6129_v0  ;;  %v782_v48 = vld [vmem:[%s7866_s1 + $0xb8] sm:$0xff]  ;;  %v784_v51 = vld [vmem:[%s7866_s1 + $0xc8] sm:$0xff]  ;;  %v5866_v52 = vld [vmem:[#allocation6 + $0x50] sm:$0xff]   ;;  %p6064_p0 = pnand %p6063_p11, %p6057_p4 }
  0x53   : > { %825 = vperm.xlu0 %5831, %v765_v14   ;;  %830 = vperm.xlu1 %5832, %v766_v15   ;;  %v5867_v53 = vld [vmem:[#allocation6 + $0x20] sm:$0xff]   ;;  %v375_v55 = vld [vmem:[%s6322_s24 + $0x68] sm:$0xff]   ;;  %v785_v56 = vld [vmem:[%s7866_s1 + $0xd0] sm:$0xff] }
  0x54   : > { %v357_v54 = vld [vmem:[%s6322_s24 + $0x20] sm:$0xff]   ;;  %v786_v57 = vld [vmem:[%s7866_s1 + $0xd8] sm:$0xff]  ;;  %v788_v59 = vld [vmem:[%s7866_s1 + $0xe8] sm:$0xff] }
  0x55   : > { %4820 = vmatpush3.bf16.msra.mxu0 %v5837_v10  ;;  %5747 = vmatpush3.bf16.msra.mxu1 %v5837_v10  ;;  %v787_v58 = vld [vmem:[%s7866_s1 + $0xe0] sm:$0xff]  ;;  %v5868_v60 = vld [vmem:[#allocation6 + $0x18] sm:$0xff]   ;;  %v5869_v61 = vld [vmem:[#allocation6 + $0x48] sm:$0xff]  }
  0x56   : > { %4821 = vmatprep.subr.bf16.mxu0 %v6129_v0  ;;  %5740 = vmatprep.subr.bf16.mxu1 %v6129_v0  ;;  %v359_v62 = vld [vmem:[%s6322_s24 + $0x28] sm:$0xff]   ;;  %v377_v63 = vld [vmem:[%s6322_s24 + $0x70] sm:$0xff]   ;;  %v790_v2 = vld [vmem:[%s7866_s1 + $0xf8] sm:$0xff] }
  0x57   : > { %835 = vperm.xlu0 %5831, %v767_v19   ;;  %840 = vperm.xlu1 %5832, %v768_v20   ;;  %v789_v1 = vld [vmem:[%s7866_s1 + $0xf0] sm:$0xff]  ;;  %v791_v4 = vld [vmem:[%s7866_s1 + $0x100] sm:$0xff]  ;;  %v792_v5 = vld [vmem:[%s7866_s1 + $0x108] sm:$0xff] }
  0x58   : > { %v5870_v3 = vld [vmem:[#allocation6 + $0x10] sm:$0xff]   ;;  %v379_v7 = vld [vmem:[%s6322_s24 + $0x78] sm:$0xff]   ;;  %v381_v9 = vld [vmem:[%s6322_s24 + $0x80] sm:$0xff]  }
  0x59   : > { %4822 = vmatpush3.bf16.msra.mxu0 %v5838_v13  ;;  %5748 = vmatpush3.bf16.msra.mxu1 %v5838_v13  ;;  %v361_v6 = vld [vmem:[%s6322_s24 + $0x30] sm:$0xff]   ;;  %v363_v8 = vld [vmem:[%s6322_s24 + $0x38] sm:$0xff]   ;;  %v365_v10 = vld [vmem:[%s6322_s24 + $0x40] sm:$0xff]  }
  0x5a   : > { %4823 = vmatprep.subr.bf16.mxu0 %v6129_v0  ;;  %5741 = vmatprep.subr.bf16.mxu1 %v6129_v0  ;;  %v5871_v11 = vld [vmem:[#allocation6 + $0x8] sm:$0xff]   ;;  %v5872_v12 = vld [vmem:[#allocation6 + $0x40] sm:$0xff]   ;;  %v5874_v20 = vld [vmem:[#allocation6 + $0xb8] sm:$0xff]  }
  0x5b   : > { %845 = vperm.xlu0 %5831, %v769_v22   ;;  %850 = vperm.xlu1 %5832, %v770_v23   ;;  %v5873_v13 = vld [vmem:[#allocation6] sm:$0xff]   ;;  %v1105_v15 = vld [vmem:[#allocation2 + $0xf] sm:$0xff] }
  0x5c   : > { %v1104_v14 = vld [vmem:[#allocation2 + $0x7] sm:$0xff] }
  0x5d   : > { %4824 = vmatpush3.bf16.msra.mxu0 %v5839_v16  ;;  %5749 = vmatpush3.bf16.msra.mxu1 %v5839_v16  ;;  %v1138_v16 = vpack.c.bf16 %v1105_v15, %v1104_v14  ;;  %v5876_v22 = vld [vmem:[#allocation6 + $0xa8] sm:$0xff]   ;;  %v5877_v23 = vld [vmem:[#allocation6 + $0xa0] sm:$0xff]  }
  0x5e   : > { %4825 = vmatprep.subr.bf16.mxu0 %v6129_v0  ;;  %5742 = vmatprep.subr.bf16.mxu1 %v6129_v0 }
  0x5f   : > { %855 = vperm.xlu0 %5831, %v771_v24   ;;  %860 = vperm.xlu1 %5832, %v772_v25   ;;  %v5878_v25 = vld [vmem:[#allocation6 + $0x98] sm:$0xff]  }
  0x61   : > { %4826 = vmatpush3.bf16.msra.mxu0 %v5840_v17  ;;  %5750 = vmatpush3.bf16.msra.mxu1 %v5840_v17  ;;  %v1037_v17 = vld [vmem:[#allocation2 + $0x6] sm:$0xff] }
  0x62   : > { %4895 = vmatprep.subr.bf16.mxu1 %v6129_v0  ;;  %4979 = vmatprep.subr.bf16.mxu0 %v6129_v0 }
  0x63   : > { %865 = vperm.xlu0 %5831, %v773_v30   ;;  %870 = vperm.xlu1 %5832, %v774_v31   ;;  %v5879_v31 = vld [vmem:[#allocation6 + $0x90] sm:$0xff]  }
  0x64   : > { %4828 = vmatmul.mubr.bf16.vlgmr.msra.gmra.mxu0 %v349_v18  ;;  %4864 = vmatmul.mubr.bf16.vlgmr.msra.gmra.mxu1 %v367_v21  ;;  %v1038_v18 = vld [vmem:[#allocation2 + $0xe] sm:$0xff] }
  0x65   : > { %4831 = vmatprep.mubr.msk.bf16.mxu0 %vm6130_vm0, %v6129_v0  ;;  %4867 = vmatprep.mubr.msk.bf16.mxu1 %vm6130_vm0, %v6129_v0  ;;  %v1071_v19 = vpack.c.bf16 %v1038_v18, %v1037_v17  ;;  %v5875_v21 = vld [vmem:[#allocation6 + $0xb0] sm:$0xff]  }
  0x66   : > { %4896 = vmatpush3.bf16.msra.mxu1 %v5858_v26  ;;  %4980 = vmatpush3.bf16.msra.mxu0 %v5862_v39 }
  0x67   : > { %4897 = vmatprep.subr.bf16.mxu1 %v6129_v0  ;;  %875 = vperm.xlu0 %5831, %v775_v32  }
  0x68   : > { %880 = vperm.xlu1 %5832, %v776_v33   ;;  %4981 = vmatprep.subr.bf16.mxu0 %v6129_v0 }
  0x6a   : > { %4898 = vmatpush3.bf16.msra.mxu1 %v5859_v29  ;;  %4982 = vmatpush3.bf16.msra.mxu0 %v5864_v43  ;;  %v5882_v43 = vld [vmem:[#allocation6 + $0xf0] sm:$0xff]  }
  0x6b   : > { %4899 = vmatprep.subr.bf16.mxu1 %v6129_v0  ;;  %885 = vperm.xlu0 %5831, %v777_v37   ;;  %v5880_v37 = vld [vmem:[#allocation6 + $0x88] sm:$0xff]  }
  0x6c   : > { %4832 = vmatmul.mubr.bf16.gmra.mxu0 %v351_v27  ;;  %4868 = vmatmul.mubr.bf16.gmra.mxu1 %v369_v28 }
  0x6d   : > { %4835 = vmatprep.mubr.msk.bf16.mxu0 %vm6130_vm0, %v6129_v0  ;;  %4871 = vmatprep.mubr.msk.bf16.mxu1 %vm6130_vm0, %v6129_v0 }
  0x6e   : > { %4900 = vmatpush3.bf16.msra.mxu1 %v5860_v34  ;;  %890 = vperm.xlu1 %5832, %v778_v38  }
  0x6f   : > { %4901 = vmatprep.subr.bf16.mxu1 %v6129_v0  ;;  %895 = vperm.xlu0 %5831, %v779_v40  }
  0x70   : > { %4983 = vmatprep.subr.bf16.mxu0 %v6129_v0 }
  0x71   : > { %4984 = vmatpush3.bf16.msra.mxu0 %v5865_v49  ;;  %v5885_v49 = vld [vmem:[#allocation6 + $0x80] sm:$0xff]  }
  0x72   : > { %4902 = vmatpush3.bf16.msra.mxu1 %v5861_v42  ;;  %900 = vperm.xlu1 %5832, %v780_v41   ;;  %v5881_v41 = vld [vmem:[#allocation6 + $0xf8] sm:$0xff]  }
  0x73   : > { %4903 = vmatprep.subr.bf16.mxu1 %v6129_v0  ;;  %905 = vperm.xlu0 %5831, %v781_v47   ;;  %v6529_v47 = vld [vmem:[%s7868_s3] ss:$0 sm:$0xff] }
  0x74   : > { %4836 = vmatmul.mubr.bf16.gmra.mxu0 %v353_v35  ;;  %4872 = vmatmul.mubr.bf16.gmra.mxu1 %v371_v36 }
  0x75   : > { %4839 = vmatprep.mubr.msk.bf16.mxu0 %vm6130_vm0, %v6129_v0  ;;  %4875 = vmatprep.mubr.msk.bf16.mxu1 %vm6130_vm0, %v6129_v0 }
  0x76   : > { %4904 = vmatpush3.bf16.msra.mxu1 %v5863_v46  ;;  %910 = vperm.xlu1 %5832, %v782_v48   ;;  %v5883_v46 = vld [vmem:[#allocation6 + $0xe8] sm:$0xff]   ;;  %v5884_v48 = vld [vmem:[#allocation6 + $0xe0] sm:$0xff]  }
  0x77   : > { %4905 = vmatprep.subr.bf16.mxu1 %v6129_v0  ;;  %4985 = vmatprep.subr.bf16.mxu0 %v6129_v0 }
  0x78   : > { %915 = vperm.xlu0 %5831, %v783_v50   ;;  %4986 = vmatpush3.bf16.msra.mxu0 %v5867_v53 }
  0x79   : > { %4987 = vmatprep.subr.bf16.mxu0 %v6129_v0 }
  0x7a   : > { %920 = vperm.xlu1 %5832, %v784_v51   ;;  %4906 = vmatpush3.bf16.msra.mxu1 %v5866_v52 }
  0x7b   : > { %4907 = vmatprep.subr.bf16.mxu1 %v6129_v0 }
  0x7c   : > { %4840 = vmatmul.mubr.bf16.gmra.mxu0 %v355_v44  ;;  %4876 = vmatmul.mubr.bf16.gmra.mxu1 %v373_v45 }
  0x7d   : > { %4843 = vmatprep.mubr.msk.bf16.mxu0 %vm6130_vm0, %v6129_v0  ;;  %4879 = vmatprep.mubr.msk.bf16.mxu1 %vm6130_vm0, %v6129_v0 }
  0x7e   : > { %925 = vperm.xlu0 %5831, %v785_v56   ;;  %930 = vperm.xlu1 %5832, %v786_v57  }
  0x7f   : > { %4988 = vmatpush3.bf16.msra.mxu0 %v5868_v60  ;;  %4908 = vmatpush3.bf16.msra.mxu1 %v5869_v61 }
  0x80   : > { %4989 = vmatprep.subr.bf16.mxu0 %v6129_v0  ;;  %4909 = vmatprep.subr.bf16.mxu1 %v6129_v0 }
  0x82   : > { %935 = vperm.xlu0 %5831, %v787_v58   ;;  %940 = vperm.xlu1 %5832, %v788_v59  }
  0x83   : > { %4990 = vmatpush3.bf16.msra.mxu0 %v5870_v3  ;;  %4910 = vmatpush3.bf16.msra.mxu1 %v5872_v12  ;;  %v5886_v3 = vld [vmem:[#allocation6 + $0xd8] sm:$0xff]  }
  0x84   : > { %4844 = vmatmul.mubr.bf16.gmra.mxu0 %v357_v54  ;;  %4880 = vmatmul.mubr.bf16.gmra.mxu1 %v375_v55 }
  0x85   : > { %4847 = vmatprep.mubr.msk.bf16.mxu0 %vm6130_vm0, %v6129_v0  ;;  %4883 = vmatprep.mubr.msk.bf16.mxu1 %vm6130_vm0, %v6129_v0 }
  0x86   : > { %945 = vperm.xlu0 %5831, %v789_v1   ;;  %950 = vperm.xlu1 %5832, %v790_v2  }
  0x87   : > { %4991 = vmatprep.subr.bf16.mxu0 %v6129_v0  ;;  %5063 = vmatprep.subr.bf16.mxu1 %v6129_v0 }
  0x88   : > { %4992 = vmatpush3.bf16.msra.mxu0 %v5871_v11 }
  0x89   : > { %4993 = vmatprep.subr.bf16.mxu0 %v6129_v0 }
  0x8a   : > { %955 = vperm.xlu0 %5831, %v791_v4   ;;  %960 = vperm.xlu1 %5832, %v792_v5  }
  0x8c   : > { %4848 = vmatmul.mubr.bf16.gmra.mxu0 %v359_v62  ;;  %4884 = vmatmul.mubr.bf16.gmra.mxu1 %v377_v63 }
  0x8d   : > { %4851 = vmatprep.mubr.msk.bf16.mxu0 %vm6130_vm0, %v6129_v0  ;;  %4887 = vmatprep.mubr.msk.bf16.mxu1 %vm6130_vm0, %v6129_v0 }
  0x8e   : > { %4994 = vmatpush3.bf16.msra.mxu0 %v5873_v13 }
  0x8f   : > { %5147 = vmatprep.subr.bf16.mxu0 %v6129_v0 }
  0x94   : > { %4852 = vmatmul.mubr.bf16.gmra.mxu0 %v361_v6  ;;  %4888 = vmatmul.mubr.bf16.gmra.mxu1 %v379_v7 }
  0x95   : > { %4855 = vmatprep.mubr.msk.bf16.mxu0 %vm6130_vm0, %v6129_v0  ;;  %4891 = vmatprep.mubr.msk.bf16.mxu1 %vm6130_vm0, %v6129_v0 }
  0x9c   : > { %4856 = vmatmul.mubr.bf16.gmra.mxu0 %v363_v8  ;;  %4892 = vmatmul.mubr.bf16.gmra.mxu1 %v381_v9  ;;  %v5887_v9 = vld [vmem:[#allocation6 + $0xd0] sm:$0xff]  }
  0x9d   : > { %4859 = vmatprep.mubr.msk.bf16.mxu0 %vm6130_vm0, %v6129_v0  ;;  %4911 = vmatprep.mubr.msk.bf16.mxu1 %vm6130_vm0, %v6129_v0 }
  0xa4   : > { %4860 = vmatmul.mubr.bf16.gmra.mxu0 %v365_v10  ;;  %4912 = vmatmul.mubr.bf16.vlgmr.msra.gmra.mxu1 %v1138_v16 }
  0xa5   : > { %4995 = vmatprep.mubr.msk.bf16.mxu0 %vm6130_vm0, %v6129_v0  ;;  %4915 = vmatprep.mubr.msk.bf16.mxu1 %vm6130_vm0, %v6129_v0 }
  0xa6   : > { %5064 = vmatpush3.bf16.msra.mxu1 %v5874_v20 }
  0xa7   : > { %5065 = vmatprep.subr.bf16.mxu1 %v6129_v0 }
  0xaa   : > { %5066 = vmatpush3.bf16.msra.mxu1 %v5875_v21 }
  0xab   : > { %5067 = vmatprep.subr.bf16.mxu1 %v6129_v0 }
  0xac   : > { %4996 = vmatmul.mubr.bf16.vlgmr.msra.gmra.mxu0 %v1071_v19 }
  0xad   : > { %4999 = vmatprep.mubr.msk.bf16.mxu0 %vm6130_vm0, %v6129_v0  ;;  %5148 = vmatpush3.bf16.msra.mxu0 %v5881_v41 }
  0xae   : > { %5068 = vmatpush3.bf16.msra.mxu1 %v5876_v22  ;;  %5149 = vmatprep.subr.bf16.mxu0 %v6129_v0 }
  0xaf   : > { %5069 = vmatprep.subr.bf16.mxu1 %v6129_v0 }
  0xb1   : > { %5150 = vmatpush3.bf16.msra.mxu0 %v5882_v43 }
  0xb2   : > { %5070 = vmatpush3.bf16.msra.mxu1 %v5877_v23  ;;  %5151 = vmatprep.subr.bf16.mxu0 %v6129_v0  ;;  %v6552_v23 = vld [vmem:[#allocation2] sm:$0xff] }
  0xb3   : > { %5071 = vmatprep.subr.bf16.mxu1 %v6129_v0 }
  0xb5   : > { %5152 = vmatpush3.bf16.msra.mxu0 %v5883_v46 }
  0xb6   : > { %5072 = vmatpush3.bf16.msra.mxu1 %v5878_v25  ;;  %5153 = vmatprep.subr.bf16.mxu0 %v6129_v0 }
  0xb7   : > { %5073 = vmatprep.subr.bf16.mxu1 %v6129_v0 }
  0xb9   : > { %5154 = vmatpush3.bf16.msra.mxu0 %v5884_v48 }
  0xba   : > { %5074 = vmatpush3.bf16.msra.mxu1 %v5879_v31  ;;  %5155 = vmatprep.subr.bf16.mxu0 %v6129_v0 }
  0xbb   : > { %5075 = vmatprep.subr.bf16.mxu1 %v6129_v0 }
  0xbd   : > { %5156 = vmatpush3.bf16.msra.mxu0 %v5886_v3 }
  0xbe   : > { %5076 = vmatpush3.bf16.msra.mxu1 %v5880_v37  ;;  %5157 = vmatprep.subr.bf16.mxu0 %v6129_v0  ;;  %v5888_v37 = vld [vmem:[#allocation6 + $0xc8] sm:$0xff]  }
  0xbf   : > { %5077 = vmatprep.subr.bf16.mxu1 %v6129_v0 }
  0xc1   : > { %5158 = vmatpush3.bf16.msra.mxu0 %v5887_v9 }
  0xc2   : > { %v796_v24 = vpop.permute.xlu0 %795  ;;  %v6489_v26 = vpop.permute.xlu1 %805  ;;  %5078 = vmatpush3.bf16.msra.mxu1 %v5885_v49  ;;  %5159 = vmatprep.subr.bf16.mxu0 %v6552_v23 }
  0xc3   : > { %5231 = vmatprep.subr.bf16.mxu1 %v6129_v0 }
  0xc5   : > { %5160 = vmatpush3.bf16.msra.mxu0 %v5888_v37 }
  0xc6   : > { %v6492_v27 = vpop.permute.xlu0 %800  ;;  %v6494_v28 = vpop.permute.xlu1 %810  ;;  %5161 = vmatprep.subr.bf16.mxu0 %v6552_v23 }
  0xca   : > { %v6496_v29 = vpop.permute.xlu0 %815  ;;  %v6498_v30 = vpop.permute.xlu1 %820 }
  0xce   : > { %v6500_v32 = vpop.permute.xlu0 %825  ;;  %v6503_v33 = vpop.permute.xlu1 %830 }
  0xd2   : > { %v6505_v34 = vpop.permute.xlu0 %835  ;;  %v6507_v35 = vpop.permute.xlu1 %840 }
  0xd6   : > { %v6509_v36 = vpop.permute.xlu0 %845  ;;  %v6511_v38 = vpop.permute.xlu1 %850 }
  0xda   : > { %v6513_v39 = vpop.permute.xlu0 %855  ;;  %v6516_v40 = vpop.permute.xlu1 %860 }
  0xde   : > { %v6518_v42 = vpop.permute.xlu0 %865  ;;  %v6521_v44 = vpop.permute.xlu1 %870 }
  0xe2   : > { %v6524_v45 = vpop.permute.xlu0 %875 }
  0xe3   : > { %v6532_v52 = vpop.permute.xlu1 %880 }
  0xe6   : > { %v886_v57 = vpop.permute.xlu0 %885 }
  0xe9   : > { %v891_v6 = vpop.permute.xlu1 %890 }
  0xea   : > { %v896_v18 = vpop.permute.xlu0 %895 }
  0xed   : > { %v901_v46 = vpop.permute.xlu1 %900 }
 0x124   : > { %v590_v50 = vpop.f32.mrf.mxu0  ;;  %v662_v51 = vpop.f32.mrf.mxu1 }
 0x125   : > { %v591_v53 = vadd.f32 %v6529_v47, %v590_v50  ;;  %v663_v54 = vadd.f32 %v6529_v47, %v662_v51  ;;  %v5889_v50 = vld [vmem:[#allocation6 + $0xc0] sm:$0xff]  }
 0x126   : > { %v4829_v55 = vpop.f32.mrf.mxu0  ;;  %v4865_v56 = vpop.f32.mrf.mxu1  ;;  %5162 = vmatpush3.bf16.msra.mxu0 %v5889_v50 }
 0x127   : > { %v725_v58 = vmax.f32 %v591_v53, 0.0  ;;  %v743_v59 = vmax.f32 %v663_v54, 0.0  ;;  %5315 = vmatprep.subr.bf16.mxu0 %v6552_v23 }
 0x128   : > { %v593_v60 = vpop.f32.mrf.mxu0  ;;  %v665_v61 = vpop.f32.mrf.mxu1 }
 0x129   : > { %v6538_v62 = vmul.f32 %v796_v24, %v725_v58  ;;  %v981_v63 = vmul.f32 %v886_v57, %v743_v59  ;;  %v594_v1 = vadd.f32 %v6529_v47, %v593_v60  ;;  %v666_v2 = vadd.f32 %v6529_v47, %v665_v61 }
 0x12a   : > { %v4830_v4 = vpop.f32.mrf.mxu0  ;;  %v4866_v5 = vpop.f32.mrf.mxu1 }
 0x12b   : > { %1000 = vst [vmem:[#allocation2 + $0x18] sm:$0xff] %v6538_v62  ;;  %1018 = vst [vmem:[#allocation2 + $0xa8] sm:$0xff] %v981_v63  ;;  %v726_v7 = vmax.f32 %v594_v1, 0.0  ;;  %v744_v8 = vmax.f32 %v666_v2, 0.0  ;;  %v906_v1 = vpop.permute.xlu0 %905 }
 0x12c   : > { %v598_v10 = vpop.f32.mrf.mxu0  ;;  %v670_v11 = vpop.f32.mrf.mxu1 }
 0x12d   : > { %v6545_v12 = vmul.f32 %v6492_v27, %v726_v7  ;;  %v982_v13 = vmul.f32 %v891_v6, %v744_v8  ;;  %v599_v14 = vadd.f32 %v6529_v47, %v598_v10  ;;  %v671_v15 = vadd.f32 %v6529_v47, %v670_v11 }
 0x12e   : > { %v4833_v16 = vpop.f32.mrf.mxu0  ;;  %v4869_v17 = vpop.f32.mrf.mxu1 }
 0x12f   : > { %1001 = vst [vmem:[#allocation2 + $0x20] sm:$0xff] %v6545_v12  ;;  %1019 = vst [vmem:[#allocation2 + $0xb0] sm:$0xff] %v982_v13  ;;  %v727_v19 = vmax.f32 %v599_v14, 0.0  ;;  %v745_v20 = vmax.f32 %v671_v15, 0.0  ;;  %v1641_v0 = vpack.c.bf16 %v6545_v12, %v6538_v62  ;;  %v911_v15 = vpop.permute.xlu1 %910  ;;  %v5894_v62 = vld [vmem:[#allocation6 + $0x118] sm:$0xff]  }
 0x130   : > { %v601_v21 = vpop.f32.mrf.mxu0  ;;  %v673_v22 = vpop.f32.mrf.mxu1  ;;  %v5902_v12 = vld [vmem:[#allocation6 + $0x158] sm:$0xff]  }
 0x131   : > { %v6556_v24 = vmul.f32 %v6489_v26, %v727_v19  ;;  %v983_v25 = vmul.f32 %v896_v18, %v745_v20  ;;  %v602_v27 = vadd.f32 %v6529_v47, %v601_v21  ;;  %v674_v31 = vadd.f32 %v6529_v47, %v673_v22 }
 0x132   : > { %v4834_v41 = vpop.f32.mrf.mxu0  ;;  %v4870_v43 = vpop.f32.mrf.mxu1  ;;  %v1106_v57 = vld [vmem:[#allocation2 + $0x17] sm:$0xff] }
 0x133   : > { %1002 = vst [vmem:[#allocation2 + $0x28] sm:$0xff] %v6556_v24  ;;  %1020 = vst [vmem:[#allocation2 + $0xb8] sm:$0xff] %v983_v25  ;;  %v728_v48 = vmax.f32 %v602_v27, 0.0  ;;  %v746_v49 = vmax.f32 %v674_v31, 0.0  ;;  %v1039_v61 = vld [vmem:[#allocation2 + $0x16] sm:$0xff] }
 0x134   : > { %v606_v51 = vpop.f32.mrf.mxu0  ;;  %v678_v53 = vpop.f32.mrf.mxu1 }
 0x135   : > { %v6563_v26 = vmul.f32 %v6494_v28, %v728_v48  ;;  %v984_v54 = vmul.f32 %v901_v46, %v746_v49  ;;  %v607_v55 = vadd.f32 %v6529_v47, %v606_v51  ;;  %v679_v56 = vadd.f32 %v6529_v47, %v678_v53  ;;  %v916_v46 = vpop.permute.xlu0 %915 }
 0x136   : > { %v4837_v58 = vpop.f32.mrf.mxu0  ;;  %v4873_v59 = vpop.f32.mrf.mxu1  ;;  %v1107_v60 = vld [vmem:[#allocation2 + $0x1f] sm:$0xff] }
 0x137   : > { %v1040_v63 = vld [vmem:[#allocation2 + $0x1e] sm:$0xff]  ;;  %1003 = vst [vmem:[#allocation2 + $0x30] sm:$0xff] %v6563_v26  ;;  %1021 = vst [vmem:[#allocation2 + $0xc0] sm:$0xff] %v984_v54  ;;  %v729_v2 = vmax.f32 %v607_v55, 0.0  ;;  %v747_v3 = vmax.f32 %v679_v56, 0.0  ;;  %v6568_v4 = vpack.c.bf16 %v1107_v60, %v1106_v57  ;;  %v1642_v7 = vpack.c.bf16 %v6563_v26, %v6556_v24  ;;  %v5896_v24 = vld [vmem:[#allocation6 + $0x108] sm:$0xff]  }
 0x138   : > { %v1072_v28 = vpack.c.bf16 %v1040_v63, %v1039_v61  ;;  %v609_v5 = vpop.f32.mrf.mxu0  ;;  %v681_v6 = vpop.f32.mrf.mxu1  ;;  %v5904_v26 = vld [vmem:[#allocation6 + $0x148] sm:$0xff]  }
 0x139   : > { %v6574_v8 = vmul.f32 %v6496_v29, %v729_v2  ;;  %v985_v9 = vmul.f32 %v906_v1, %v747_v3  ;;  %v610_v10 = vadd.f32 %v6529_v47, %v609_v5  ;;  %v682_v11 = vadd.f32 %v6529_v47, %v681_v6  ;;  %4916 = vmatmul.mubr.bf16.gmra.mxu1 %v6568_v4  ;;  %v921_v61 = vpop.permute.xlu1 %920 }
 0x13a   : > { %5000 = vmatmul.mubr.bf16.gmra.mxu0 %v1072_v28  ;;  %v4838_v13 = vpop.f32.mrf.mxu0  ;;  %v4874_v14 = vpop.f32.mrf.mxu1  ;;  %4919 = vmatprep.mubr.msk.bf16.mxu1 %vm6130_vm0, %v6552_v23  ;;  %v1108_v25 = vld [vmem:[#allocation2 + $0x27] sm:$0xff] }
 0x13b   : > { %1004 = vst [vmem:[#allocation2 + $0x38] sm:$0xff] %v6574_v8  ;;  %1022 = vst [vmem:[#allocation2 + $0xc8] sm:$0xff] %v985_v9  ;;  %v730_v16 = vmax.f32 %v610_v10, 0.0  ;;  %v748_v29 = vmax.f32 %v682_v11, 0.0  ;;  %5003 = vmatprep.mubr.msk.bf16.mxu0 %vm6130_vm0, %v6552_v23  ;;  %v1041_v41 = vld [vmem:[#allocation2 + $0x26] sm:$0xff] }
 0x13c   : > { %v614_v17 = vpop.f32.mrf.mxu0  ;;  %v686_v18 = vpop.f32.mrf.mxu1 }
 0x13d   : > { %v6585_v19 = vmul.f32 %v6498_v30, %v730_v16  ;;  %v986_v20 = vmul.f32 %v911_v15, %v748_v29  ;;  %v615_v21 = vadd.f32 %v6529_v47, %v614_v17  ;;  %v687_v22 = vadd.f32 %v6529_v47, %v686_v18  ;;  %v926_v16 = vpop.permute.xlu0 %925 }
 0x13e   : > { %v4841_v27 = vpop.f32.mrf.mxu0  ;;  %v4877_v31 = vpop.f32.mrf.mxu1  ;;  %v1109_v37 = vld [vmem:[#allocation2 + $0x2f] sm:$0xff] }
 0x13f   : > { %v1042_v43 = vld [vmem:[#allocation2 + $0x2e] sm:$0xff]  ;;  %1005 = vst [vmem:[#allocation2 + $0x40] sm:$0xff] %v6585_v19  ;;  %1023 = vst [vmem:[#allocation2 + $0xd0] sm:$0xff] %v986_v20  ;;  %v731_v48 = vmax.f32 %v615_v21, 0.0  ;;  %v749_v49 = vmax.f32 %v687_v22, 0.0  ;;  %v6590_v50 = vpack.c.bf16 %v1109_v37, %v1108_v25  ;;  %v1643_v54 = vpack.c.bf16 %v6585_v19, %v6574_v8 }
 0x140   : > { %v1073_v30 = vpack.c.bf16 %v1042_v43, %v1041_v41  ;;  %v617_v51 = vpop.f32.mrf.mxu0  ;;  %v689_v53 = vpop.f32.mrf.mxu1 }
 0x141   : > { %v6595_v55 = vmul.f32 %v6500_v32, %v731_v48  ;;  %v987_v56 = vmul.f32 %v916_v46, %v749_v49  ;;  %v618_v57 = vadd.f32 %v6529_v47, %v617_v51  ;;  %v690_v58 = vadd.f32 %v6529_v47, %v689_v53  ;;  %4920 = vmatmul.mubr.bf16.gmra.mxu1 %v6590_v50  ;;  %v931_v46 = vpop.permute.xlu1 %930 }
 0x142   : > { %5004 = vmatmul.mubr.bf16.gmra.mxu0 %v1073_v30  ;;  %v4842_v59 = vpop.f32.mrf.mxu0  ;;  %v4878_v60 = vpop.f32.mrf.mxu1  ;;  %4923 = vmatprep.mubr.msk.bf16.mxu1 %vm6130_vm0, %v6552_v23  ;;  %v1110_v9 = vld [vmem:[#allocation2 + $0x37] sm:$0xff] }
 0x143   : > { %1006 = vst [vmem:[#allocation2 + $0x48] sm:$0xff] %v6595_v55  ;;  %1024 = vst [vmem:[#allocation2 + $0xd8] sm:$0xff] %v987_v56  ;;  %v732_v63 = vmax.f32 %v618_v57, 0.0  ;;  %v750_v32 = vmax.f32 %v690_v58, 0.0  ;;  %5007 = vmatprep.mubr.msk.bf16.mxu0 %vm6130_vm0, %v6552_v23  ;;  %v1043_v14 = vld [vmem:[#allocation2 + $0x36] sm:$0xff] }
 0x144   : > { %v622_v1 = vpop.f32.mrf.mxu0  ;;  %v694_v2 = vpop.f32.mrf.mxu1 }
 0x145   : > { %v6606_v3 = vmul.f32 %v6503_v33, %v732_v63  ;;  %v988_v28 = vmul.f32 %v921_v61, %v750_v32  ;;  %v623_v5 = vadd.f32 %v6529_v47, %v622_v1  ;;  %v695_v6 = vadd.f32 %v6529_v47, %v694_v2  ;;  %v936_v1 = vpop.permute.xlu0 %935 }
 0x146   : > { %v4845_v10 = vpop.f32.mrf.mxu0  ;;  %v4881_v11 = vpop.f32.mrf.mxu1  ;;  %v1111_v13 = vld [vmem:[#allocation2 + $0x3f] sm:$0xff] }
 0x147   : > { %v1044_v15 = vld [vmem:[#allocation2 + $0x3e] sm:$0xff]  ;;  %1007 = vst [vmem:[#allocation2 + $0x50] sm:$0xff] %v6606_v3  ;;  %1025 = vst [vmem:[#allocation2 + $0xe0] sm:$0xff] %v988_v28  ;;  %v733_v29 = vmax.f32 %v623_v5, 0.0  ;;  %v751_v17 = vmax.f32 %v695_v6, 0.0  ;;  %v6611_v18 = vpack.c.bf16 %v1111_v13, %v1110_v9  ;;  %v1644_v22 = vpack.c.bf16 %v6606_v3, %v6595_v55 }
 0x148   : > { %v1074_v33 = vpack.c.bf16 %v1044_v15, %v1043_v14  ;;  %v625_v20 = vpop.f32.mrf.mxu0  ;;  %v697_v21 = vpop.f32.mrf.mxu1 }
 0x149   : > { %v6616_v25 = vmul.f32 %v6505_v34, %v733_v29  ;;  %v989_v27 = vmul.f32 %v926_v16, %v751_v17  ;;  %v626_v31 = vadd.f32 %v6529_v47, %v625_v20  ;;  %v698_v37 = vadd.f32 %v6529_v47, %v697_v21  ;;  %4924 = vmatmul.mubr.bf16.gmra.mxu1 %v6611_v18  ;;  %v941_v17 = vpop.permute.xlu1 %940 }
 0x14a   : > { %5008 = vmatmul.mubr.bf16.gmra.mxu0 %v1074_v33  ;;  %v4846_v41 = vpop.f32.mrf.mxu0  ;;  %v4882_v43 = vpop.f32.mrf.mxu1  ;;  %4927 = vmatprep.mubr.msk.bf16.mxu1 %vm6130_vm0, %v6552_v23  ;;  %v1112_v58 = vld [vmem:[#allocation2 + $0x47] sm:$0xff] }
 0x14b   : > { %1008 = vst [vmem:[#allocation2 + $0x58] sm:$0xff] %v6616_v25  ;;  %1026 = vst [vmem:[#allocation2 + $0xe8] sm:$0xff] %v989_v27  ;;  %v734_v48 = vmax.f32 %v626_v31, 0.0  ;;  %v752_v34 = vmax.f32 %v698_v37, 0.0  ;;  %5011 = vmatprep.mubr.msk.bf16.mxu0 %vm6130_vm0, %v6552_v23  ;;  %v1045_v63 = vld [vmem:[#allocation2 + $0x46] sm:$0xff] }
 0x14c   : > { %v630_v49 = vpop.f32.mrf.mxu0  ;;  %v702_v30 = vpop.f32.mrf.mxu1 }
 0x14d   : > { %v6627_v51 = vmul.f32 %v6507_v35, %v734_v48  ;;  %v990_v53 = vmul.f32 %v931_v46, %v752_v34  ;;  %v631_v56 = vadd.f32 %v6529_v47, %v630_v49  ;;  %v703_v57 = vadd.f32 %v6529_v47, %v702_v30 }
 0x14e   : > { %v4849_v59 = vpop.f32.mrf.mxu0  ;;  %v4885_v60 = vpop.f32.mrf.mxu1  ;;  %v1113_v61 = vld [vmem:[#allocation2 + $0x4f] sm:$0xff] }
 0x14f   : > { %v1046_v32 = vld [vmem:[#allocation2 + $0x4e] sm:$0xff]  ;;  %1009 = vst [vmem:[#allocation2 + $0x60] sm:$0xff] %v6627_v51  ;;  %1027 = vst [vmem:[#allocation2 + $0xf0] sm:$0xff] %v990_v53  ;;  %v735_v2 = vmax.f32 %v631_v56, 0.0  ;;  %v753_v28 = vmax.f32 %v703_v57, 0.0  ;;  %v6632_v5 = vpack.c.bf16 %v1113_v61, %v1112_v58  ;;  %v1645_v10 = vpack.c.bf16 %v6627_v51, %v6616_v25  ;;  %v946_v53 = vpop.permute.xlu0 %945 }
 0x150   : > { %v1075_v35 = vpack.c.bf16 %v1046_v32, %v1045_v63  ;;  %v633_v6 = vpop.f32.mrf.mxu0  ;;  %v705_v9 = vpop.f32.mrf.mxu1 }
 0x151   : > { %v6637_v11 = vmul.f32 %v6509_v36, %v735_v2  ;;  %v991_v13 = vmul.f32 %v936_v1, %v753_v28  ;;  %v634_v14 = vadd.f32 %v6529_v47, %v633_v6  ;;  %v706_v15 = vadd.f32 %v6529_v47, %v705_v9  ;;  %4928 = vmatmul.mubr.bf16.gmra.mxu1 %v6632_v5  ;;  %v951_v6 = vpop.permute.xlu1 %950 }
 0x152   : > { %5012 = vmatmul.mubr.bf16.gmra.mxu0 %v1075_v35  ;;  %v4850_v16 = vpop.f32.mrf.mxu0  ;;  %v4886_v29 = vpop.f32.mrf.mxu1  ;;  %4931 = vmatprep.mubr.msk.bf16.mxu1 %vm6130_vm0, %v6552_v23  ;;  %v1114_v43 = vld [vmem:[#allocation2 + $0x57] sm:$0xff] }
 0x153   : > { %1010 = vst [vmem:[#allocation2 + $0x68] sm:$0xff] %v6637_v11  ;;  %1028 = vst [vmem:[#allocation2 + $0xf8] sm:$0xff] %v991_v13  ;;  %v736_v33 = vmax.f32 %v634_v14, 0.0  ;;  %v754_v36 = vmax.f32 %v706_v15, 0.0  ;;  %5015 = vmatprep.mubr.msk.bf16.mxu0 %vm6130_vm0, %v6552_v23  ;;  %v1047_v49 = vld [vmem:[#allocation2 + $0x56] sm:$0xff] }
 0x154   : > { %v638_v20 = vpop.f32.mrf.mxu0  ;;  %v710_v21 = vpop.f32.mrf.mxu1 }
 0x155   : > { %v6648_v27 = vmul.f32 %v6511_v38, %v736_v33  ;;  %v992_v31 = vmul.f32 %v941_v17, %v754_v36  ;;  %v639_v37 = vadd.f32 %v6529_v47, %v638_v20  ;;  %v711_v41 = vadd.f32 %v6529_v47, %v710_v21 }
 0x156   : > { %v4853_v46 = vpop.f32.mrf.mxu0  ;;  %v4889_v48 = vpop.f32.mrf.mxu1  ;;  %v1115_v34 = vld [vmem:[#allocation2 + $0x5f] sm:$0xff] }
 0x157   : > { %v1048_v30 = vld [vmem:[#allocation2 + $0x5e] sm:$0xff]  ;;  %1011 = vst [vmem:[#allocation2 + $0x70] sm:$0xff] %v6648_v27  ;;  %1029 = vst [vmem:[#allocation2 + $0x100] sm:$0xff] %v992_v31  ;;  %v737_v56 = vmax.f32 %v639_v37, 0.0  ;;  %v755_v57 = vmax.f32 %v711_v41, 0.0  ;;  %v6653_v58 = vpack.c.bf16 %v1115_v34, %v1114_v43  ;;  %v1646_v61 = vpack.c.bf16 %v6648_v27, %v6637_v11  ;;  %v956_v41 = vpop.permute.xlu0 %955 }
 0x158   : > { %v1076_v38 = vpack.c.bf16 %v1048_v30, %v1047_v49  ;;  %v641_v59 = vpop.f32.mrf.mxu0  ;;  %v713_v60 = vpop.f32.mrf.mxu1 }
 0x159   : > { %v6658_v63 = vmul.f32 %v6513_v39, %v737_v56  ;;  %v993_v32 = vmul.f32 %v946_v53, %v755_v57  ;;  %v642_v1 = vadd.f32 %v6529_v47, %v641_v59  ;;  %v714_v2 = vadd.f32 %v6529_v47, %v713_v60  ;;  %4932 = vmatmul.mubr.bf16.gmra.mxu1 %v6653_v58 }
 0x15a   : > { %5016 = vmatmul.mubr.bf16.gmra.mxu0 %v1076_v38  ;;  %v4854_v28 = vpop.f32.mrf.mxu0  ;;  %v4890_v35 = vpop.f32.mrf.mxu1  ;;  %4935 = vmatprep.mubr.msk.bf16.mxu1 %vm6130_vm0, %v6552_v23  ;;  %v1116_v33 = vld [vmem:[#allocation2 + $0x67] sm:$0xff] }
 0x15b   : > { %1012 = vst [vmem:[#allocation2 + $0x78] sm:$0xff] %v6658_v63  ;;  %1030 = vst [vmem:[#allocation2 + $0x108] sm:$0xff] %v993_v32  ;;  %v738_v9 = vmax.f32 %v642_v1, 0.0  ;;  %v756_v39 = vmax.f32 %v714_v2, 0.0  ;;  %5019 = vmatprep.mubr.msk.bf16.mxu0 %vm6130_vm0, %v6552_v23  ;;  %v1049_v31 = vld [vmem:[#allocation2 + $0x66] sm:$0xff] }
 0x15c   : > { %v646_v13 = vpop.f32.mrf.mxu0  ;;  %v718_v14 = vpop.f32.mrf.mxu1 }
 0x15d   : > { %v6669_v15 = vmul.f32 %v6516_v40, %v738_v9  ;;  %v994_v16 = vmul.f32 %v951_v6, %v756_v39  ;;  %v647_v29 = vadd.f32 %v6529_v47, %v646_v13  ;;  %v719_v17 = vadd.f32 %v6529_v47, %v718_v14 }
 0x15e   : > { %v4857_v36 = vpop.f32.mrf.mxu0  ;;  %v4893_v20 = vpop.f32.mrf.mxu1  ;;  %v1117_v21 = vld [vmem:[#allocation2 + $0x6f] sm:$0xff] }
 0x15f   : > { %v1050_v37 = vld [vmem:[#allocation2 + $0x6e] sm:$0xff]  ;;  %1013 = vst [vmem:[#allocation2 + $0x80] sm:$0xff] %v6669_v15  ;;  %1031 = vst [vmem:[#allocation2 + $0x110] sm:$0xff] %v994_v16  ;;  %v739_v43 = vmax.f32 %v647_v29, 0.0  ;;  %v757_v46 = vmax.f32 %v719_v17, 0.0  ;;  %v6674_v48 = vpack.c.bf16 %v1117_v21, %v1116_v33  ;;  %v1647_v30 = vpack.c.bf16 %v6669_v15, %v6658_v63 }
 0x160   : > { %v1077_v40 = vpack.c.bf16 %v1050_v37, %v1049_v31  ;;  %v649_v34 = vpop.f32.mrf.mxu0  ;;  %v721_v49 = vpop.f32.mrf.mxu1  ;;  %v1627_v15 = vld [vmem:[#allocation2 + $0xb0] sm:$0xff] }
 0x161   : > { %v6679_v53 = vmul.f32 %v6518_v42, %v739_v43  ;;  %v995_v56 = vmul.f32 %v956_v41, %v757_v46  ;;  %v650_v57 = vadd.f32 %v6529_v47, %v649_v34  ;;  %v722_v38 = vadd.f32 %v6529_v47, %v721_v49  ;;  %4936 = vmatmul.mubr.bf16.gmra.mxu1 %v6674_v48  ;;  %v961_v42 = vpop.permute.xlu1 %960 }
 0x162   : > { %5020 = vmatmul.mubr.bf16.gmra.mxu0 %v1077_v40  ;;  %v4858_v59 = vpop.f32.mrf.mxu0  ;;  %4939 = vmatprep.mubr.msk.bf16.mxu1 %vm6130_vm0, %v6552_v23  ;;  %v4894_v60 = vpop.f32.mrf.mxu1  ;;  %v1118_v9 = vld [vmem:[#allocation2 + $0x77] sm:$0xff] }
 0x163   : > { %1014 = vst [vmem:[#allocation2 + $0x88] sm:$0xff] %v6679_v53  ;;  %1032 = vst [vmem:[#allocation2 + $0x118] sm:$0xff] %v995_v56  ;;  %v740_v32 = vmax.f32 %v650_v57, 0.0  ;;  %v758_v1 = vmax.f32 %v722_v38, 0.0  ;;  %5023 = vmatprep.mubr.msk.bf16.mxu0 %vm6130_vm0, %v6552_v23  ;;  %v1051_v14 = vld [vmem:[#allocation2 + $0x76] sm:$0xff] }
 0x164   : > { %v654_v2 = vpop.f32.mrf.mxu0  ;;  %v1254_v41 = vpop.f32.mrf.mxu1 }
 0x165   : > { %v6690_v28 = vmul.f32 %v6521_v44, %v740_v32  ;;  %v996_v35 = vmul.f32 %v961_v42, %v758_v1  ;;  %v655_v6 = vadd.f32 %v6529_v47, %v654_v2 }
 0x166   : > { %v4861_v39 = vpop.f32.mrf.mxu0  ;;  %v1119_v13 = vld [vmem:[#allocation2 + $0x7f] sm:$0xff]  ;;  %v4913_v46 = vpop.f32.mrf.mxu1 }
 0x167   : > { %v1052_v16 = vld [vmem:[#allocation2 + $0x7e] sm:$0xff]  ;;  %1015 = vst [vmem:[#allocation2 + $0x90] sm:$0xff] %v6690_v28  ;;  %1033 = vst [vmem:[#allocation2 + $0x120] sm:$0xff] %v996_v35  ;;  %v741_v29 = vmax.f32 %v655_v6, 0.0  ;;  %v6694_v17 = vpack.c.bf16 %v1119_v13, %v1118_v9  ;;  %v1648_v44 = vpack.c.bf16 %v6690_v28, %v6679_v53  ;;  %v1626_v53 = vld [vmem:[#allocation2 + $0xa8] sm:$0xff] }
 0x168   : > { %v1078_v33 = vpack.c.bf16 %v1052_v16, %v1051_v14  ;;  %v657_v36 = vpop.f32.mrf.mxu0  ;;  %v1257_v59 = vpop.f32.mrf.mxu1 }
 0x169   : > { %v6699_v20 = vmul.f32 %v6524_v45, %v741_v29  ;;  %v658_v21 = vadd.f32 %v6529_v47, %v657_v36  ;;  %4940 = vmatmul.mubr.bf16.gmra.mxu1 %v6694_v17 }
 0x16a   : > { %5024 = vmatmul.mubr.bf16.gmra.mxu0 %v1078_v33  ;;  %v4862_v31 = vpop.f32.mrf.mxu0  ;;  %4943 = vmatprep.mubr.msk.bf16.mxu1 %vm6130_vm0, %v6552_v23  ;;  %v1120_v45 = vld [vmem:[#allocation2 + $0x87] sm:$0xff]  ;;  %v1125_v33 = vld [vmem:[#allocation2 + $0xaf] sm:$0xff] }
 0x16b   : > { %1016 = vst [vmem:[#allocation2 + $0x98] sm:$0xff] %v6699_v20  ;;  %v742_v37 = vmax.f32 %v658_v21, 0.0  ;;  %5027 = vmatprep.mubr.msk.bf16.mxu0 %vm6130_vm0, %v6552_v23  ;;  %v1053_v34 = vld [vmem:[#allocation2 + $0x86] sm:$0xff]  ;;  %v1058_v21 = vld [vmem:[#allocation2 + $0xae] sm:$0xff] }
 0x16c   : > { %v1471_v47 = vpop.f32.mrf.mxu0 }
 0x16d   : > { %v6709_v43 = vmul.f32 %v6532_v52, %v742_v37  ;;  %v6711_v56 = vadd.f32 %v1471_v47, %v1254_v41  ;;  %v4914_v52 = vpop.f32.mrf.mxu1  ;;  %v1127_v37 = vld [vmem:[#allocation2 + $0xbf] sm:$0xff]  ;;  %v1059_v47 = vld [vmem:[#allocation2 + $0xb6] sm:$0xff] }
 0x16e   : > { %v1121_v40 = vld [vmem:[#allocation2 + $0x8f] sm:$0xff]  ;;  %v4997_v60 = vpop.f32.mrf.mxu0  ;;  %v1060_v41 = vld [vmem:[#allocation2 + $0xbe] sm:$0xff] }
 0x16f   : > { %v1054_v49 = vld [vmem:[#allocation2 + $0x8e] sm:$0xff]  ;;  %1017 = vst [vmem:[#allocation2 + $0xa0] sm:$0xff] %v6709_v43  ;;  %v6714_v57 = vpack.c.bf16 %v1121_v40, %v1120_v45  ;;  %v1649_v32 = vpack.c.bf16 %v6709_v43, %v6699_v20  ;;  %v1126_v45 = vld [vmem:[#allocation2 + $0xb7] sm:$0xff]  ;;  %v1082_v40 = vpack.c.bf16 %v1060_v41, %v1059_v47  ;;  %v1061_v60 = vld [vmem:[#allocation2 + $0xc6] sm:$0xff] }
 0x170   : > { %v1079_v38 = vpack.c.bf16 %v1054_v49, %v1053_v34  ;;  %v1474_v1 = vpop.f32.mrf.mxu0  ;;  %v6739_v46 = vpack.c.bf16 %v1127_v37, %v1126_v45  ;;  %v1129_v34 = vld [vmem:[#allocation2 + $0xcf] sm:$0xff]  ;;  %v1135_v37 = vld [vmem:[#allocation2 + $0xff] sm:$0xff]  ;;  %v1134_v45 = vld [vmem:[#allocation2 + $0xf7] sm:$0xff] }
 0x171   : > { %4944 = vmatmul.mubr.bf16.gmra.mxu1 %v6714_v57  ;;  %v6721_v42 = vadd.f32 %v1474_v1, %v1257_v59  ;;  %v1062_v49 = vld [vmem:[#allocation2 + $0xce] sm:$0xff]  ;;  %v1131_v1 = vld [vmem:[#allocation2 + $0xdf] sm:$0xff]  ;;  %v6767_v47 = vpack.c.bf16 %v1135_v37, %v1134_v45 }
 0x172   : > { %5028 = vmatmul.mubr.bf16.gmra.mxu0 %v1079_v38  ;;  %4947 = vmatprep.mubr.msk.bf16.mxu1 %vm6130_vm0, %v6552_v23  ;;  %v4998_v2 = vpop.f32.mrf.mxu0  ;;  %v1122_v35 = vld [vmem:[#allocation2 + $0x97] sm:$0xff]  ;;  %v1128_v38 = vld [vmem:[#allocation2 + $0xc7] sm:$0xff]  ;;  %v1083_v52 = vpack.c.bf16 %v1062_v49, %v1061_v60  ;;  %v1137_v49 = vld [vmem:[#allocation2 + $0x10f] sm:$0xff] }
 0x173   : > { %5031 = vmatprep.mubr.msk.bf16.mxu0 %vm6130_vm0, %v6552_v23  ;;  %v1055_v9 = vld [vmem:[#allocation2 + $0x96] sm:$0xff]  ;;  %v6746_v59 = vpack.c.bf16 %v1129_v34, %v1128_v38  ;;  %v1064_v2 = vld [vmem:[#allocation2 + $0xde] sm:$0xff]  ;;  %v1070_v38 = vld [vmem:[#allocation2 + $0x10e] sm:$0xff] }
 0x174   : > { %v1068_v41 = vld [vmem:[#allocation2 + $0xfe] sm:$0xff]  ;;  %v1136_v60 = vld [vmem:[#allocation2 + $0x107] sm:$0xff] }
 0x175   : > { %v1629_v37 = vld [vmem:[#allocation2 + $0xc0] sm:$0xff] }
 0x176   : > { %v1123_v6 = vld [vmem:[#allocation2 + $0x9f] sm:$0xff]  ;;  %v1124_v16 = vld [vmem:[#allocation2 + $0xa7] sm:$0xff] }
 0x177   : > { %v1056_v39 = vld [vmem:[#allocation2 + $0x9e] sm:$0xff]  ;;  %v6725_v13 = vpack.c.bf16 %v1123_v6, %v1122_v35  ;;  %v1057_v29 = vld [vmem:[#allocation2 + $0xa6] sm:$0xff]  ;;  %v6732_v36 = vpack.c.bf16 %v1125_v33, %v1124_v16  ;;  %v1066_v16 = vld [vmem:[#allocation2 + $0xee] sm:$0xff] }
 0x178   : > { %v1080_v14 = vpack.c.bf16 %v1056_v39, %v1055_v9  ;;  %v1081_v31 = vpack.c.bf16 %v1058_v21, %v1057_v29  ;;  %v1130_v35 = vld [vmem:[#allocation2 + $0xd7] sm:$0xff]  ;;  %v1132_v29 = vld [vmem:[#allocation2 + $0xe7] sm:$0xff] }
 0x179   : > { %4948 = vmatmul.mubr.bf16.gmra.mxu1 %v6725_v13  ;;  %v6753_v6 = vpack.c.bf16 %v1131_v1, %v1130_v35  ;;  %v1063_v9 = vld [vmem:[#allocation2 + $0xd6] sm:$0xff]  ;;  %v1065_v21 = vld [vmem:[#allocation2 + $0xe6] sm:$0xff]  ;;  %v1640_v35 = vpack.c.bf16 %v6552_v23, %v6552_v23 }
 0x17a   : > { %5032 = vmatmul.mubr.bf16.gmra.mxu0 %v1080_v14  ;;  %4951 = vmatprep.mubr.msk.bf16.mxu1 %vm6130_vm0, %v6552_v23  ;;  %v1084_v39 = vpack.c.bf16 %v1064_v2, %v1063_v9  ;;  %v1133_v14 = vld [vmem:[#allocation2 + $0xef] sm:$0xff]  ;;  %v1069_v1 = vld [vmem:[#allocation2 + $0x106] sm:$0xff]  ;;  %v5890_v9 = vld [vmem:[#allocation6 + $0x138] sm:$0xff]  }
 0x17b   : > { %5035 = vmatprep.mubr.msk.bf16.mxu0 %vm6130_vm0, %v6552_v23  ;;  %v6760_v33 = vpack.c.bf16 %v1133_v14, %v1132_v29  ;;  %v1087_v2 = vpack.c.bf16 %v1070_v38, %v1069_v1  ;;  %v5891_v14 = vld [vmem:[#allocation6 + $0x130] sm:$0xff]   ;;  %v5892_v29 = vld [vmem:[#allocation6 + $0x128] sm:$0xff]  }
 0x181   : > { %4952 = vmatmul.mubr.bf16.gmra.mxu1 %v6732_v36 }
 0x182   : > { %5036 = vmatmul.mubr.bf16.gmra.mxu0 %v1081_v31  ;;  %4955 = vmatprep.mubr.msk.bf16.mxu1 %vm6130_vm0, %v6552_v23  ;;  %v1085_v31 = vpack.c.bf16 %v1066_v16, %v1065_v21  ;;  %v5898_v16 = vld [vmem:[#allocation6 + $0x170] sm:$0xff]   ;;  %v5893_v21 = vld [vmem:[#allocation6 + $0x120] sm:$0xff]  }
 0x183   : > { %5039 = vmatprep.mubr.msk.bf16.mxu0 %vm6130_vm0, %v6552_v23 }
 0x189   : > { %4956 = vmatmul.mubr.bf16.gmra.mxu1 %v6739_v46 }
 0x18a   : > { %5040 = vmatmul.mubr.bf16.gmra.mxu0 %v1082_v40  ;;  %4959 = vmatprep.mubr.msk.bf16.mxu1 %vm6130_vm0, %v6552_v23  ;;  %v1067_v40 = vld [vmem:[#allocation2 + $0xf6] sm:$0xff] }
 0x18b   : > { %5043 = vmatprep.mubr.msk.bf16.mxu0 %vm6130_vm0, %v6552_v23  ;;  %v1086_v34 = vpack.c.bf16 %v1068_v41, %v1067_v40  ;;  %v1628_v40 = vld [vmem:[#allocation2 + $0xb8] sm:$0xff] }
 0x18c   : > { %v6896_v38 = vpack.c.bf16 %v1629_v37, %v1628_v40 }
 0x191   : > { %4960 = vmatmul.mubr.bf16.gmra.mxu1 %v6746_v59 }
 0x192   : > { %5044 = vmatmul.mubr.bf16.gmra.mxu0 %v1083_v52  ;;  %4963 = vmatprep.mubr.msk.bf16.mxu1 %vm6130_vm0, %v6552_v23  ;;  %v6774_v52 = vpack.c.bf16 %v1137_v49, %v1136_v60 }
 0x193   : > { %5047 = vmatprep.mubr.msk.bf16.mxu0 %vm6130_vm0, %v6552_v23 }
 0x199   : > { %4964 = vmatmul.mubr.bf16.gmra.mxu1 %v6753_v6 }
 0x19a   : > { %5048 = vmatmul.mubr.bf16.gmra.mxu0 %v1084_v39  ;;  %4967 = vmatprep.mubr.msk.bf16.mxu1 %vm6130_vm0, %v6552_v23  ;;  %v5897_v39 = vld [vmem:[#allocation6 + $0x178] sm:$0xff]  }
 0x19b   : > { %5051 = vmatprep.mubr.msk.bf16.mxu0 %vm6130_vm0, %v6552_v23 }
 0x1a1   : > { %4968 = vmatmul.mubr.bf16.gmra.mxu1 %v6760_v33 }
 0x1a2   : > { %5052 = vmatmul.mubr.bf16.gmra.mxu0 %v1085_v31  ;;  %4971 = vmatprep.mubr.msk.bf16.mxu1 %vm6130_vm0, %v6552_v23  ;;  %v5900_v31 = vld [vmem:[#allocation6 + $0x160] sm:$0xff]  }
 0x1a3   : > { %5055 = vmatprep.mubr.msk.bf16.mxu0 %vm6130_vm0, %v6552_v23 }
 0x1a9   : > { %4972 = vmatmul.mubr.bf16.gmra.mxu1 %v6767_v47 }
 0x1aa   : > { %5056 = vmatmul.mubr.bf16.gmra.mxu0 %v1086_v34  ;;  %4975 = vmatprep.mubr.msk.bf16.mxu1 %vm6130_vm0, %v6552_v23 }
 0x1ab   : > { %5059 = vmatprep.mubr.msk.bf16.mxu0 %vm6130_vm0, %v6552_v23 }
 0x1b1   : > { %4976 = vmatmul.mubr.bf16.gmra.mxu1 %v6774_v52 }
 0x1b2   : > { %5060 = vmatmul.mubr.bf16.gmra.mxu0 %v1087_v2  ;;  %5079 = vmatprep.mubr.msk.bf16.mxu1 %vm6130_vm0, %v6552_v23 }
 0x1b3   : > { %5163 = vmatprep.mubr.msk.bf16.mxu0 %vm6130_vm0, %v6552_v23 }
 0x1b9   : > { %5080 = vmatmul.mubr.bf16.vlgmr.msra.gmra.mxu1 %v1640_v35 }
 0x1ba   : > { %5164 = vmatmul.mubr.bf16.vlgmr.msra.gmra.mxu0 %v6568_v4  ;;  %5232 = vmatpush3.bf16.msra.mxu1 %v5890_v9  ;;  %v5899_v4 = vld [vmem:[#allocation6 + $0x168] sm:$0xff]  }
 0x1bb   : > { %5083 = vmatprep.mubr.msk.bf16.mxu1 %vm6130_vm0, %v6552_v23  ;;  %5167 = vmatprep.mubr.msk.bf16.mxu0 %vm6130_vm0, %v6552_v23 }
 0x1bc   : > { %5233 = vmatprep.subr.bf16.mxu1 %v6552_v23  ;;  %5316 = vmatpush3.bf16.msra.mxu0 %v5897_v39  ;;  %v1631_v39 = vld [vmem:[#allocation2 + $0xd0] sm:$0xff] }
 0x1bd   : > { %5317 = vmatprep.subr.bf16.mxu0 %v6552_v23 }
 0x1be   : > { %5234 = vmatpush3.bf16.msra.mxu1 %v5891_v14 }
 0x1bf   : > { %5235 = vmatprep.subr.bf16.mxu1 %v6552_v23 }
 0x1c0   : > { %5318 = vmatpush3.bf16.msra.mxu0 %v5898_v16 }
 0x1c1   : > { %5084 = vmatmul.mubr.bf16.gmra.mxu1 %v1641_v0  ;;  %5319 = vmatprep.subr.bf16.mxu0 %v6552_v23  ;;  %v5895_v0 = vld [vmem:[#allocation6 + $0x110] sm:$0xff]  }
 0x1c2   : > { %5168 = vmatmul.mubr.bf16.gmra.mxu0 %v6590_v50  ;;  %5087 = vmatprep.mubr.msk.bf16.mxu1 %vm6130_vm0, %v6552_v23  ;;  %v5903_v50 = vld [vmem:[#allocation6 + $0x150] sm:$0xff]  }
 0x1c3   : > { %5171 = vmatprep.mubr.msk.bf16.mxu0 %vm6130_vm0, %v6552_v23  ;;  %5236 = vmatpush3.bf16.msra.mxu1 %v5892_v29  ;;  %v1630_v29 = vld [vmem:[#allocation2 + $0xc8] sm:$0xff] }
 0x1c4   : > { %5237 = vmatprep.subr.bf16.mxu1 %v6552_v23  ;;  %5320 = vmatpush3.bf16.msra.mxu0 %v5899_v4 }
 0x1c5   : > { %5321 = vmatprep.subr.bf16.mxu0 %v6552_v23 }
 0x1c7   : > { %5238 = vmatpush3.bf16.msra.mxu1 %v5893_v21 }
 0x1c8   : > { %5239 = vmatprep.subr.bf16.mxu1 %v6552_v23  ;;  %5322 = vmatpush3.bf16.msra.mxu0 %v5900_v31  ;;  %v6908_v31 = vpack.c.bf16 %v1631_v39, %v1630_v29  ;;  %v1958_v29 = vld [vmem:[#allocation2 + $0x11f] sm:$0xff] }
 0x1c9   : > { %5088 = vmatmul.mubr.bf16.gmra.mxu1 %v1642_v7  ;;  %5323 = vmatprep.subr.bf16.mxu0 %v6552_v23  ;;  %v5901_v7 = vld [vmem:[#allocation6 + $0x100] sm:$0xff]  }
 0x1ca   : > { %5172 = vmatmul.mubr.bf16.gmra.mxu0 %v6611_v18  ;;  %5091 = vmatprep.mubr.msk.bf16.mxu1 %vm6130_vm0, %v6552_v23  ;;  %v5905_v18 = vld [vmem:[#allocation6 + $0x140] sm:$0xff]  }
 0x1cb   : > { %5175 = vmatprep.mubr.msk.bf16.mxu0 %vm6130_vm0, %v6552_v23  ;;  %5240 = vmatpush3.bf16.msra.mxu1 %v5894_v62 }
 0x1cc   : > { %5241 = vmatprep.subr.bf16.mxu1 %v6552_v23  ;;  %5324 = vmatpush3.bf16.msra.mxu0 %v5902_v12 }
 0x1cd   : > { %5325 = vmatprep.subr.bf16.mxu0 %v6552_v23 }
 0x1cf   : > { %5242 = vmatpush3.bf16.msra.mxu1 %v5895_v0  ;;  %v6912_v0 = vld [vmem:[#allocation2] sm:$0xff] }
 0x1d0   : > { %5243 = vmatprep.subr.bf16.mxu1 %v6552_v23  ;;  %5326 = vmatpush3.bf16.msra.mxu0 %v5903_v50 }
 0x1d1   : > { %5092 = vmatmul.mubr.bf16.gmra.mxu1 %v1643_v54  ;;  %5327 = vmatprep.subr.bf16.mxu0 %v6552_v23 }
 0x1d2   : > { %5176 = vmatmul.mubr.bf16.gmra.mxu0 %v6632_v5  ;;  %5095 = vmatprep.mubr.msk.bf16.mxu1 %vm6130_vm0, %v6552_v23 }
 0x1d3   : > { %5179 = vmatprep.mubr.msk.bf16.mxu0 %vm6130_vm0, %v6552_v23  ;;  %5244 = vmatpush3.bf16.msra.mxu1 %v5896_v24 }
 0x1d4   : > { %5245 = vmatprep.subr.bf16.mxu1 %v6552_v23  ;;  %5328 = vmatpush3.bf16.msra.mxu0 %v5904_v26  ;;  %v1633_v26 = vld [vmem:[#allocation2 + $0xe0] sm:$0xff] }
 0x1d5   : > { %5329 = vmatprep.subr.bf16.mxu0 %v6552_v23 }
 0x1d7   : > { %5246 = vmatpush3.bf16.msra.mxu1 %v5901_v7 }
 0x1d8   : > { %5330 = vmatpush3.bf16.msra.mxu0 %v5905_v18  ;;  %5399 = vmatprep.subr.bf16.mxu1 %v6552_v23 }
 0x1d9   : > { %5096 = vmatmul.mubr.bf16.gmra.mxu1 %v1644_v22  ;;  %5483 = vmatprep.subr.bf16.mxu0 %v6552_v23 }
 0x1da   : > { %5180 = vmatmul.mubr.bf16.gmra.mxu0 %v6653_v58  ;;  %5099 = vmatprep.mubr.msk.bf16.mxu1 %vm6130_vm0, %v6552_v23 }
 0x1db   : > { %5183 = vmatprep.mubr.msk.bf16.mxu0 %vm6130_vm0, %v6552_v23 }
 0x1e1   : > { %5100 = vmatmul.mubr.bf16.gmra.mxu1 %v1645_v10 }
 0x1e2   : > { %5184 = vmatmul.mubr.bf16.gmra.mxu0 %v6674_v48  ;;  %5103 = vmatprep.mubr.msk.bf16.mxu1 %vm6130_vm0, %v6552_v23 }
 0x1e3   : > { %5187 = vmatprep.mubr.msk.bf16.mxu0 %vm6130_vm0, %v6552_v23 }
 0x1e9   : > { %5104 = vmatmul.mubr.bf16.gmra.mxu1 %v1646_v61 }
 0x1ea   : > { %5188 = vmatmul.mubr.bf16.gmra.mxu0 %v6694_v17  ;;  %5107 = vmatprep.mubr.msk.bf16.mxu1 %vm6130_vm0, %v6552_v23 }
 0x1eb   : > { %5191 = vmatprep.mubr.msk.bf16.mxu0 %vm6130_vm0, %v6552_v23 }
 0x1f1   : > { %5108 = vmatmul.mubr.bf16.gmra.mxu1 %v1647_v30 }
 0x1f2   : > { %5192 = vmatmul.mubr.bf16.gmra.mxu0 %v6714_v57  ;;  %5111 = vmatprep.mubr.msk.bf16.mxu1 %vm6130_vm0, %v6552_v23 }
 0x1f3   : > { %5195 = vmatprep.mubr.msk.bf16.mxu0 %vm6130_vm0, %v6552_v23 }
 0x1f9   : > { %v1262_v8 = vpop.f32.mrf.mxu1  ;;  %5112 = vmatmul.mubr.bf16.gmra.mxu1 %v1648_v44  ;;  %v6884_v44 = vpack.c.bf16 %v1627_v15, %v1626_v53  ;;  %v1634_v15 = vld [vmem:[#allocation2 + $0xe8] sm:$0xff] }
 0x1fa   : > { %v1479_v19 = vpop.f32.mrf.mxu0  ;;  %5196 = vmatmul.mubr.bf16.gmra.mxu0 %v6725_v13  ;;  %5115 = vmatprep.mubr.msk.bf16.mxu1 %vm6130_vm0, %v6552_v23 }
 0x1fb   : > { %v6866_v54 = vadd.f32 %v1479_v19, %v1262_v8  ;;  %v4917_v55 = vpop.f32.mrf.mxu1  ;;  %5199 = vmatprep.mubr.msk.bf16.mxu0 %vm6130_vm0, %v6552_v23  ;;  %v1632_v8 = vld [vmem:[#allocation2 + $0xd8] sm:$0xff] }
 0x1fc   : > { %v5001_v3 = vpop.f32.mrf.mxu0 }
 0x1fd   : > { %v1265_v22 = vpop.f32.mrf.mxu1 }
 0x1fe   : > { %v1482_v25 = vpop.f32.mrf.mxu0 }
 0x1ff   : > { %v6870_v51 = vadd.f32 %v1482_v25, %v1265_v22  ;;  %v4918_v5 = vpop.f32.mrf.mxu1 }
 0x200   : > { %v5002_v10 = vpop.f32.mrf.mxu0 }
 0x201   : > { %v1270_v11 = vpop.f32.mrf.mxu1  ;;  %5116 = vmatmul.mubr.bf16.gmra.mxu1 %v1649_v32 }
 0x202   : > { %v1487_v27 = vpop.f32.mrf.mxu0  ;;  %5200 = vmatmul.mubr.bf16.gmra.mxu0 %v6732_v36  ;;  %5119 = vmatprep.mubr.msk.bf16.mxu1 %vm6130_vm0, %v6552_v23 }
 0x203   : > { %v6878_v58 = vadd.f32 %v1487_v27, %v1270_v11  ;;  %v4921_v61 = vpop.f32.mrf.mxu1  ;;  %5203 = vmatprep.mubr.msk.bf16.mxu0 %vm6130_vm0, %v6552_v23  ;;  %v1635_v27 = vld [vmem:[#allocation2 + $0xf0] sm:$0xff] }
 0x204   : > { %v5005_v63 = vpop.f32.mrf.mxu0  ;;  %v6934_v53 = vpack.c.bf16 %v1635_v27, %v1634_v15  ;;  %v2244_v27 = vld [vmem:[#allocation2 + $0x18] sm:$0xff] }
 0x205   : > { %v1273_v48 = vpop.f32.mrf.mxu1 }
 0x206   : > { %v1490_v30 = vpop.f32.mrf.mxu0 }
 0x207   : > { %v6882_v28 = vadd.f32 %v1490_v30, %v1273_v48  ;;  %v4922_v17 = vpop.f32.mrf.mxu1 }
 0x208   : > { %v5006_v20 = vpop.f32.mrf.mxu0 }
 0x209   : > { %v1278_v43 = vpop.f32.mrf.mxu1  ;;  %5120 = vmatmul.mubr.bf16.gmra.mxu1 %v6884_v44 }
 0x20a   : > { %v1495_v57 = vpop.f32.mrf.mxu0  ;;  %5204 = vmatmul.mubr.bf16.gmra.mxu0 %v6739_v46  ;;  %5123 = vmatprep.mubr.msk.bf16.mxu1 %vm6130_vm0, %v6552_v23 }
 0x20b   : > { %v6890_v32 = vadd.f32 %v1495_v57, %v1278_v43  ;;  %v4925_v13 = vpop.f32.mrf.mxu1  ;;  %5207 = vmatprep.mubr.msk.bf16.mxu0 %vm6130_vm0, %v6552_v23 }
 0x20c   : > { %v5009_v36 = vpop.f32.mrf.mxu0 }
 0x20d   : > { %v1281_v41 = vpop.f32.mrf.mxu1  ;;  %v1637_v36 = vld [vmem:[#allocation2 + $0x100] sm:$0xff] }
 0x20e   : > { %v1498_v45 = vpop.f32.mrf.mxu0 }
 0x20f   : > { %v6894_v34 = vadd.f32 %v1498_v45, %v1281_v41  ;;  %v4926_v49 = vpop.f32.mrf.mxu1  ;;  %v1636_v45 = vld [vmem:[#allocation2 + $0xf8] sm:$0xff] }
 0x210   : > { %v5010_v46 = vpop.f32.mrf.mxu0 }
 0x211   : > { %v1286_v60 = vpop.f32.mrf.mxu1  ;;  %5124 = vmatmul.mubr.bf16.gmra.mxu1 %v6896_v38  ;;  %v6946_v46 = vpack.c.bf16 %v1637_v36, %v1636_v45 }
 0x212   : > { %v1503_v1 = vpop.f32.mrf.mxu0  ;;  %5208 = vmatmul.mubr.bf16.gmra.mxu0 %v6746_v59  ;;  %5127 = vmatprep.mubr.msk.bf16.mxu1 %vm6130_vm0, %v6552_v23 }
 0x213   : > { %v6902_v2 = vadd.f32 %v1503_v1, %v1286_v60  ;;  %v4929_v35 = vpop.f32.mrf.mxu1  ;;  %5211 = vmatprep.mubr.msk.bf16.mxu0 %vm6130_vm0, %v6552_v23 }
 0x214   : > { %v5013_v9 = vpop.f32.mrf.mxu0 }
 0x215   : > { %v1289_v14 = vpop.f32.mrf.mxu1 }
 0x216   : > { %v1506_v16 = vpop.f32.mrf.mxu0 }
 0x217   : > { %v6906_v4 = vadd.f32 %v1506_v16, %v1289_v14  ;;  %v4930_v21 = vpop.f32.mrf.mxu1  ;;  %v1639_v14 = vld [vmem:[#allocation2 + $0x110] sm:$0xff] }
 0x218   : > { %v5014_v59 = vpop.f32.mrf.mxu0 }
 0x219   : > { %v1294_v62 = vpop.f32.mrf.mxu1  ;;  %5128 = vmatmul.mubr.bf16.gmra.mxu1 %v6908_v31  ;;  %v1638_v59 = vld [vmem:[#allocation2 + $0x108] sm:$0xff] }
 0x21a   : > { %v1511_v12 = vpop.f32.mrf.mxu0  ;;  %5212 = vmatmul.mubr.bf16.gmra.mxu0 %v6753_v6  ;;  %5131 = vmatprep.mubr.msk.bf16.mxu1 %vm6130_vm0, %v6912_v0  ;;  %v6922_v6 = vpack.c.bf16 %v1633_v26, %v1632_v8 }
 0x21b   : > { %v6916_v23 = vadd.f32 %v1511_v12, %v1294_v62  ;;  %v4933_v50 = vpop.f32.mrf.mxu1  ;;  %5215 = vmatprep.mubr.msk.bf16.mxu0 %vm6130_vm0, %v6912_v0 }
 0x21c   : > { %v5017_v24 = vpop.f32.mrf.mxu0  ;;  %v6958_v50 = vpack.c.bf16 %v1639_v14, %v1638_v59  ;;  %v2246_v14 = vld [vmem:[#allocation2 + $0x28] sm:$0xff] }
 0x21d   : > { %v1297_v7 = vpop.f32.mrf.mxu1  ;;  %v2565_v59 = vld [vmem:[#allocation2 + $0x29] sm:$0xff] }
 0x21e   : > { %v1514_v18 = vpop.f32.mrf.mxu0 }
 0x21f   : > { %v6920_v19 = vadd.f32 %v1514_v18, %v1297_v7  ;;  %v4934_v55 = vpop.f32.mrf.mxu1 }
 0x220   : > { %v5018_v3 = vpop.f32.mrf.mxu0 }
 0x221   : > { %v1302_v22 = vpop.f32.mrf.mxu1  ;;  %5132 = vmatmul.mubr.bf16.gmra.mxu1 %v6922_v6 }
 0x222   : > { %v1519_v25 = vpop.f32.mrf.mxu0  ;;  %5216 = vmatmul.mubr.bf16.gmra.mxu0 %v6760_v33  ;;  %5135 = vmatprep.mubr.msk.bf16.mxu1 %vm6130_vm0, %v6912_v0 }
 0x223   : > { %v6928_v5 = vadd.f32 %v1519_v25, %v1302_v22  ;;  %v4937_v10 = vpop.f32.mrf.mxu1  ;;  %5219 = vmatprep.mubr.msk.bf16.mxu0 %vm6130_vm0, %v6912_v0  ;;  %v2245_v22 = vld [vmem:[#allocation2 + $0x20] sm:$0xff] }
 0x224   : > { %v5021_v11 = vpop.f32.mrf.mxu0  ;;  %v2564_v10 = vld [vmem:[#allocation2 + $0x21] sm:$0xff] }
 0x225   : > { %v1305_v61 = vpop.f32.mrf.mxu1 }
 0x226   : > { %v1522_v63 = vpop.f32.mrf.mxu0 }
 0x227   : > { %v6932_v48 = vadd.f32 %v1522_v63, %v1305_v61  ;;  %v4938_v30 = vpop.f32.mrf.mxu1  ;;  %v5906_v61 = vld [vmem:[#allocation6 + $0x1b8] sm:$0xff]  }
 0x228   : > { %v5022_v33 = vpop.f32.mrf.mxu0  ;;  %v2278_v30 = vpack.c.bf16 %v2245_v22, %v2244_v27  ;;  %v5909_v22 = vld [vmem:[#allocation6 + $0x1a0] sm:$0xff]  }
 0x229   : > { %v1310_v17 = vpop.f32.mrf.mxu1  ;;  %5136 = vmatmul.mubr.bf16.gmra.mxu1 %v6934_v53  ;;  %v2563_v33 = vld [vmem:[#allocation2 + $0x19] sm:$0xff] }
 0x22a   : > { %v1527_v20 = vpop.f32.mrf.mxu0  ;;  %5220 = vmatmul.mubr.bf16.gmra.mxu0 %v6767_v47  ;;  %5139 = vmatprep.mubr.msk.bf16.mxu1 %vm6130_vm0, %v6912_v0 }
 0x22b   : > { %v6940_v43 = vadd.f32 %v1527_v20, %v1310_v17  ;;  %v4941_v57 = vpop.f32.mrf.mxu1  ;;  %5223 = vmatprep.mubr.msk.bf16.mxu0 %vm6130_vm0, %v6912_v0  ;;  %v2597_v20 = vpack.c.bf16 %v2564_v10, %v2563_v33  ;;  %v2249_v10 = vld [vmem:[#allocation2 + $0x40] sm:$0xff] }
 0x22c   : > { %v5025_v13 = vpop.f32.mrf.mxu0  ;;  %v5913_v57 = vld [vmem:[#allocation6 + $0x1f8] sm:$0xff]  }
 0x22d   : > { %v1313_v37 = vpop.f32.mrf.mxu1 }
 0x22e   : > { %v1530_v41 = vpop.f32.mrf.mxu0 }
 0x22f   : > { %v6944_v40 = vadd.f32 %v1530_v41, %v1313_v37  ;;  %v4942_v49 = vpop.f32.mrf.mxu1  ;;  %v5907_v37 = vld [vmem:[#allocation6 + $0x1b0] sm:$0xff]  }
 0x230   : > { %v5026_v47 = vpop.f32.mrf.mxu0 }
 0x231   : > { %v1318_v60 = vpop.f32.mrf.mxu1  ;;  %5140 = vmatmul.mubr.bf16.gmra.mxu1 %v6946_v46  ;;  %v2247_v47 = vld [vmem:[#allocation2 + $0x30] sm:$0xff] }
 0x232   : > { %v1535_v1 = vpop.f32.mrf.mxu0  ;;  %5224 = vmatmul.mubr.bf16.gmra.mxu0 %v6774_v52  ;;  %5143 = vmatprep.mubr.msk.bf16.mxu1 %vm6130_vm0, %v6912_v0  ;;  %v1957_v52 = vld [vmem:[#allocation2 + $0x117] sm:$0xff] }
 0x233   : > { %v6952_v35 = vadd.f32 %v1535_v1, %v1318_v60  ;;  %v4945_v9 = vpop.f32.mrf.mxu1  ;;  %5227 = vmatprep.mubr.msk.bf16.mxu0 %vm6130_vm0, %v6912_v0  ;;  %v1975_v26 = vpack.c.bf16 %v1958_v29, %v1957_v52  ;;  %v5914_v60 = vld [vmem:[#allocation6 + $0x1f0] sm:$0xff]  }
 0x234   : > { %v5029_v39 = vpop.f32.mrf.mxu0  ;;  %v2566_v9 = vld [vmem:[#allocation2 + $0x31] sm:$0xff] }
 0x235   : > { %v1321_v16 = vpop.f32.mrf.mxu1 }
 0x236   : > { %v1538_v21 = vpop.f32.mrf.mxu0 }
 0x237   : > { %v6956_v62 = vadd.f32 %v1538_v21, %v1321_v16  ;;  %v4946_v12 = vpop.f32.mrf.mxu1  ;;  %v6979_v21 = vpack.c.bf16 %v2247_v47, %v2246_v14  ;;  %v2251_v14 = vld [vmem:[#allocation2 + $0x50] sm:$0xff] }
 0x238   : > { %v5030_v24 = vpop.f32.mrf.mxu0  ;;  %v5908_v12 = vld [vmem:[#allocation6 + $0x1a8] sm:$0xff]  }
 0x239   : > { %v1326_v7 = vpop.f32.mrf.mxu1  ;;  %5144 = vmatmul.mubr.bf16.gmra.mxu1 %v6958_v50  ;;  %v6982_v24 = vpack.c.bf16 %v2566_v9, %v2565_v59  ;;  %v5911_v9 = vld [vmem:[#allocation6 + $0x190] sm:$0xff]  }
 0x23a   : > { %v1543_v18 = vpop.f32.mrf.mxu0  ;;  %5228 = vmatmul.mubr.bf16.gmra.mxu0 %v1975_v26  ;;  %5247 = vmatprep.mubr.msk.bf16.mxu1 %vm6130_vm0, %v6912_v0  ;;  %v5915_v26 = vld [vmem:[#allocation6 + $0x1e8] sm:$0xff]  }
 0x23b   : > { %v6963_v8 = vadd.f32 %v1543_v18, %v1326_v7  ;;  %v4949_v55 = vpop.f32.mrf.mxu1  ;;  %5331 = vmatprep.mubr.msk.bf16.mxu0 %vm6130_vm0, %v6912_v0 }
 0x23c   : > { %v5033_v3 = vpop.f32.mrf.mxu0 }
 0x23d   : > { %v1329_v25 = vpop.f32.mrf.mxu1 }
 0x23e   : > { %v1546_v11 = vpop.f32.mrf.mxu0 }
 0x23f   : > { %v6967_v63 = vadd.f32 %v1546_v11, %v1329_v25  ;;  %v4950_v15 = vpop.f32.mrf.mxu1  ;;  %v5916_v11 = vld [vmem:[#allocation6 + $0x1e0] sm:$0xff]  }
 0x240   : > { %v5034_v17 = vpop.f32.mrf.mxu0 }
 0x241   : > { %v1334_v13 = vpop.f32.mrf.mxu1  ;;  %5248 = vmatmul.mubr.bf16.vlgmr.msra.gmra.mxu1 %v2278_v30  ;;  %v2248_v30 = vld [vmem:[#allocation2 + $0x38] sm:$0xff] }
 0x242   : > { %v1551_v36 = vpop.f32.mrf.mxu0  ;;  %5332 = vmatmul.mubr.bf16.vlgmr.msra.gmra.mxu0 %v2597_v20  ;;  %5400 = vmatpush3.bf16.msra.mxu1 %v5906_v61  ;;  %v2568_v61 = vld [vmem:[#allocation2 + $0x41] sm:$0xff]  ;;  %v6997_v20 = vpack.c.bf16 %v2249_v10, %v2248_v30 }
 0x243   : > { %v6969_v41 = vadd.f32 %v1551_v36, %v1334_v13  ;;  %v4953_v45 = vpop.f32.mrf.mxu1  ;;  %5251 = vmatprep.mubr.msk.bf16.mxu1 %vm6130_vm0, %v6912_v0  ;;  %5335 = vmatprep.mubr.msk.bf16.mxu0 %vm6130_vm0, %v6912_v0  ;;  %v5910_v13 = vld [vmem:[#allocation6 + $0x198] sm:$0xff]  }
 0x244   : > { %v5037_v49 = vpop.f32.mrf.mxu0  ;;  %5401 = vmatprep.subr.bf16.mxu1 %v6912_v0  ;;  %5484 = vmatpush3.bf16.msra.mxu0 %v5913_v57  ;;  %v2567_v57 = vld [vmem:[#allocation2 + $0x39] sm:$0xff] }
 0x245   : > { %v1337_v1 = vpop.f32.mrf.mxu1  ;;  %5485 = vmatprep.subr.bf16.mxu0 %v6912_v0  ;;  %v5918_v45 = vld [vmem:[#allocation6 + $0x1d8] sm:$0xff]  }
 0x246   : > { %v1554_v39 = vpop.f32.mrf.mxu0  ;;  %5402 = vmatpush3.bf16.msra.mxu1 %v5907_v37  ;;  %v6999_v37 = vpack.c.bf16 %v2568_v61, %v2567_v57  ;;  %v5917_v57 = vld [vmem:[#allocation6 + $0x180] sm:$0xff]  }
 0x247   : > { %v6977_v16 = vadd.f32 %v1554_v39, %v1337_v1  ;;  %v4954_v29 = vpop.f32.mrf.mxu1  ;;  %5403 = vmatprep.subr.bf16.mxu1 %v6912_v0 }
 0x248   : > { %v5038_v52 = vpop.f32.mrf.mxu0  ;;  %5486 = vmatpush3.bf16.msra.mxu0 %v5914_v60  ;;  %v5919_v29 = vld [vmem:[#allocation6 + $0x1d0] sm:$0xff]  }
 0x249   : > { %v1342_v7 = vpop.f32.mrf.mxu1  ;;  %5252 = vmatmul.mubr.bf16.gmra.mxu1 %v6979_v21  ;;  %5487 = vmatprep.subr.bf16.mxu0 %v6912_v0 }
 0x24a   : > { %v1559_v18 = vpop.f32.mrf.mxu0  ;;  %5336 = vmatmul.mubr.bf16.gmra.mxu0 %v6982_v24  ;;  %5255 = vmatprep.mubr.msk.bf16.mxu1 %vm6130_vm0, %v6912_v0 }
 0x24b   : > { %v6989_v55 = vadd.f32 %v1559_v18, %v1342_v7  ;;  %v4957_v3 = vpop.f32.mrf.mxu1  ;;  %5339 = vmatprep.mubr.msk.bf16.mxu0 %vm6130_vm0, %v6912_v0  ;;  %5404 = vmatpush3.bf16.msra.mxu1 %v5908_v12  ;;  %v2570_v12 = vld [vmem:[#allocation2 + $0x51] sm:$0xff] }
 0x24c   : > { %v5041_v25 = vpop.f32.mrf.mxu0  ;;  %5405 = vmatprep.subr.bf16.mxu1 %v6912_v0  ;;  %5488 = vmatpush3.bf16.msra.mxu0 %v5915_v26  ;;  %v2250_v26 = vld [vmem:[#allocation2 + $0x48] sm:$0xff] }
 0x24d   : > { %v1345_v27 = vpop.f32.mrf.mxu1  ;;  %5489 = vmatprep.subr.bf16.mxu0 %v6912_v0  ;;  %v7015_v3 = vpack.c.bf16 %v2251_v14, %v2250_v26  ;;  %v5912_v25 = vld [vmem:[#allocation6 + $0x188] sm:$0xff]  }
 0x24e   : > { %v1562_v15 = vpop.f32.mrf.mxu0 }
 0x24f   : > { %v6995_v33 = vadd.f32 %v1562_v15, %v1345_v27  ;;  %v4958_v17 = vpop.f32.mrf.mxu1  ;;  %5406 = vmatpush3.bf16.msra.mxu1 %v5909_v22  ;;  %v2569_v22 = vld [vmem:[#allocation2 + $0x49] sm:$0xff] }
 0x250   : > { %v5042_v36 = vpop.f32.mrf.mxu0  ;;  %5407 = vmatprep.subr.bf16.mxu1 %v6912_v0  ;;  %5490 = vmatpush3.bf16.msra.mxu0 %v5916_v11  ;;  %v7017_v11 = vpack.c.bf16 %v2570_v12, %v2569_v22  ;;  %v5920_v27 = vld [vmem:[#allocation6 + $0x1c8] sm:$0xff]  }
 0x251   : > { %v1350_v49 = vpop.f32.mrf.mxu1  ;;  %5256 = vmatmul.mubr.bf16.gmra.mxu1 %v6997_v20  ;;  %5491 = vmatprep.subr.bf16.mxu0 %v6912_v0  ;;  %v2253_v36 = vld [vmem:[#allocation2 + $0x60] sm:$0xff] }
 0x252   : > { %v1567_v47 = vpop.f32.mrf.mxu0  ;;  %5340 = vmatmul.mubr.bf16.gmra.mxu0 %v6999_v37  ;;  %5259 = vmatprep.mubr.msk.bf16.mxu1 %vm6130_vm0, %v6912_v0 }
 0x253   : > { %v7007_v60 = vadd.f32 %v1567_v47, %v1350_v49  ;;  %v4961_v1 = vpop.f32.mrf.mxu1  ;;  %5343 = vmatprep.mubr.msk.bf16.mxu0 %vm6130_vm0, %v6912_v0  ;;  %5408 = vmatpush3.bf16.msra.mxu1 %v5910_v13  ;;  %v2572_v47 = vld [vmem:[#allocation2 + $0x61] sm:$0xff] }
 0x254   : > { %v5045_v39 = vpop.f32.mrf.mxu0  ;;  %5409 = vmatprep.subr.bf16.mxu1 %v6912_v0  ;;  %5492 = vmatpush3.bf16.msra.mxu0 %v5918_v45  ;;  %v5921_v45 = vld [vmem:[#allocation6 + $0x1c0] sm:$0xff]  }
 0x255   : > { %v1353_v59 = vpop.f32.mrf.mxu1  ;;  %5493 = vmatprep.subr.bf16.mxu0 %v6912_v0 }
 0x256   : > { %v1570_v52 = vpop.f32.mrf.mxu0 }
 0x257   : > { %v7013_v7 = vadd.f32 %v1570_v52, %v1353_v59  ;;  %v4962_v18 = vpop.f32.mrf.mxu1  ;;  %5410 = vmatpush3.bf16.msra.mxu1 %v5911_v9  ;;  %v2252_v9 = vld [vmem:[#allocation2 + $0x58] sm:$0xff] }
 0x258   : > { %v5046_v10 = vpop.f32.mrf.mxu0  ;;  %5411 = vmatprep.subr.bf16.mxu1 %v6912_v0  ;;  %5494 = vmatpush3.bf16.msra.mxu0 %v5919_v29  ;;  %v7033_v29 = vpack.c.bf16 %v2253_v36, %v2252_v9  ;;  %v2571_v59 = vld [vmem:[#allocation2 + $0x59] sm:$0xff] }
 0x259   : > { %v1358_v61 = vpop.f32.mrf.mxu1  ;;  %5260 = vmatmul.mubr.bf16.gmra.mxu1 %v7015_v3  ;;  %5495 = vmatprep.subr.bf16.mxu0 %v6912_v0  ;;  %v7035_v52 = vpack.c.bf16 %v2572_v47, %v2571_v59 }
 0x25a   : > { %v1575_v15 = vpop.f32.mrf.mxu0  ;;  %5344 = vmatmul.mubr.bf16.gmra.mxu0 %v7017_v11  ;;  %5263 = vmatprep.mubr.msk.bf16.mxu1 %vm6130_vm0, %v6912_v0 }
 0x25b   : > { %v7025_v30 = vadd.f32 %v1575_v15, %v1358_v61  ;;  %v4965_v17 = vpop.f32.mrf.mxu1  ;;  %5347 = vmatprep.mubr.msk.bf16.mxu0 %vm6130_vm0, %v6912_v0  ;;  %5412 = vmatpush3.bf16.msra.mxu1 %v5912_v25  ;;  %v2574_v15 = vld [vmem:[#allocation2 + $0x71] sm:$0xff] }
 0x25c   : > { %v5049_v13 = vpop.f32.mrf.mxu0  ;;  %5413 = vmatprep.subr.bf16.mxu1 %v6912_v0  ;;  %5496 = vmatpush3.bf16.msra.mxu0 %v5920_v27  ;;  %v2255_v27 = vld [vmem:[#allocation2 + $0x70] sm:$0xff] }
 0x25d   : > { %v1361_v49 = vpop.f32.mrf.mxu1  ;;  %5497 = vmatprep.subr.bf16.mxu0 %v6912_v0 }
 0x25e   : > { %v1578_v1 = vpop.f32.mrf.mxu0 }
 0x25f   : > { %v7031_v39 = vadd.f32 %v1578_v1, %v1361_v49  ;;  %v4966_v14 = vpop.f32.mrf.mxu1  ;;  %5414 = vmatpush3.bf16.msra.mxu1 %v5917_v57  ;;  %v2254_v57 = vld [vmem:[#allocation2 + $0x68] sm:$0xff] }
 0x260   : > { %v5050_v12 = vpop.f32.mrf.mxu0  ;;  %5498 = vmatpush3.bf16.msra.mxu0 %v5921_v45  ;;  %5567 = vmatprep.subr.bf16.mxu1 %v6912_v0  ;;  %v7049_v45 = vpack.c.bf16 %v2255_v27, %v2254_v57  ;;  %v2573_v49 = vld [vmem:[#allocation2 + $0x69] sm:$0xff] }
 0x261   : > { %v1366_v26 = vpop.f32.mrf.mxu1  ;;  %5264 = vmatmul.mubr.bf16.gmra.mxu1 %v7033_v29  ;;  %5651 = vmatprep.subr.bf16.mxu0 %v6912_v0  ;;  %v7051_v1 = vpack.c.bf16 %v2574_v15, %v2573_v49 }
 0x262   : > { %v1583_v18 = vpop.f32.mrf.mxu0  ;;  %5348 = vmatmul.mubr.bf16.gmra.mxu0 %v7035_v52  ;;  %5267 = vmatprep.mubr.msk.bf16.mxu1 %vm6130_vm0, %v6912_v0 }
 0x263   : > { %v7043_v22 = vadd.f32 %v1583_v18, %v1366_v26  ;;  %v4969_v25 = vpop.f32.mrf.mxu1  ;;  %5351 = vmatprep.mubr.msk.bf16.mxu0 %vm6130_vm0, %v6912_v0  ;;  %v2257_v18 = vld [vmem:[#allocation2 + $0x80] sm:$0xff] }
 0x264   : > { %v5053_v10 = vpop.f32.mrf.mxu0 }
 0x265   : > { %v1369_v61 = vpop.f32.mrf.mxu1  ;;  %v2576_v10 = vld [vmem:[#allocation2 + $0x81] sm:$0xff] }
 0x266   : > { %v1586_v17 = vpop.f32.mrf.mxu0 }
 0x267   : > { %v7047_v13 = vadd.f32 %v1586_v17, %v1369_v61  ;;  %v4970_v36 = vpop.f32.mrf.mxu1  ;;  %v2256_v61 = vld [vmem:[#allocation2 + $0x78] sm:$0xff] }
 0x268   : > { %v5054_v47 = vpop.f32.mrf.mxu0  ;;  %v7063_v57 = vpack.c.bf16 %v2257_v18, %v2256_v61  ;;  %v2575_v36 = vld [vmem:[#allocation2 + $0x79] sm:$0xff] }
 0x269   : > { %v1374_v9 = vpop.f32.mrf.mxu1  ;;  %5268 = vmatmul.mubr.bf16.gmra.mxu1 %v7049_v45  ;;  %v7065_v47 = vpack.c.bf16 %v2576_v10, %v2575_v36  ;;  %v2578_v10 = vld [vmem:[#allocation2 + $0x91] sm:$0xff] }
 0x26a   : > { %v1591_v14 = vpop.f32.mrf.mxu0  ;;  %5352 = vmatmul.mubr.bf16.gmra.mxu0 %v7051_v1  ;;  %5271 = vmatprep.mubr.msk.bf16.mxu1 %vm6130_vm0, %v6912_v0  ;;  %7891 = vst [vmem:[#allocation15_spill] sm:$0xff] %v7063_v57 }
 0x26b   : > { %v7057_v59 = vadd.f32 %v1591_v14, %v1374_v9  ;;  %v4973_v12 = vpop.f32.mrf.mxu1  ;;  %5355 = vmatprep.mubr.msk.bf16.mxu0 %vm6130_vm0, %v6912_v0  ;;  %7892 = vst [vmem:[#allocation16_spill] sm:$0xff] %v7065_v47 }
 0x26c   : > { %v5057_v26 = vpop.f32.mrf.mxu0 }
 0x26d   : > { %7889 = vst [vmem:[#allocation13_spill] sm:$0xff] %v7057_v59  ;;  %v1377_v25 = vpop.f32.mrf.mxu1 }
 0x26e   : > { %v1594_v27 = vpop.f32.mrf.mxu0 }
 0x26f   : > { %v7061_v15 = vadd.f32 %v1594_v27, %v1377_v25  ;;  %v4974_v17 = vpop.f32.mrf.mxu1  ;;  %v2259_v25 = vld [vmem:[#allocation2 + $0x90] sm:$0xff] }
 0x270   : > { %v5058_v49 = vpop.f32.mrf.mxu0  ;;  %v2258_v17 = vld [vmem:[#allocation2 + $0x88] sm:$0xff] }
 0x271   : > { %7890 = vst [vmem:[#allocation14_spill] sm:$0xff] %v7061_v15  ;;  %v1382_v9 = vpop.f32.mrf.mxu1  ;;  %5272 = vmatmul.mubr.bf16.gmra.mxu1 %v7063_v57  ;;  %v7077_v15 = vpack.c.bf16 %v2259_v25, %v2258_v17 }
 0x272   : > { %v1599_v14 = vpop.f32.mrf.mxu0  ;;  %5356 = vmatmul.mubr.bf16.gmra.mxu0 %v7065_v47  ;;  %5275 = vmatprep.mubr.msk.bf16.mxu1 %vm6130_vm0, %v6912_v0  ;;  %v2577_v47 = vld [vmem:[#allocation2 + $0x89] sm:$0xff] }
 0x273   : > { %v7071_v12 = vadd.f32 %v1599_v14, %v1382_v9  ;;  %v4977_v26 = vpop.f32.mrf.mxu1  ;;  %5359 = vmatprep.mubr.msk.bf16.mxu0 %vm6130_vm0, %v6912_v0  ;;  %7895 = vst [vmem:[#allocation19_spill] sm:$0xff] %v7077_v15  ;;  %v7079_v57 = vpack.c.bf16 %v2578_v10, %v2577_v47  ;;  %v2261_v47 = vld [vmem:[#allocation2 + $0xa0] sm:$0xff] }
 0x274   : > { %v5061_v18 = vpop.f32.mrf.mxu0  ;;  %v2579_v10 = vld [vmem:[#allocation2 + $0x99] sm:$0xff] }
 0x275   : > { %7893 = vst [vmem:[#allocation17_spill] sm:$0xff] %v7071_v12  ;;  %v1385_v27 = vpop.f32.mrf.mxu1  ;;  %7896 = vst [vmem:[#allocation20_spill] sm:$0xff] %v7079_v57 }
 0x276   : > { %v1602_v61 = vpop.f32.mrf.mxu0 }
 0x277   : > { %v7075_v36 = vadd.f32 %v1602_v61, %v1385_v27  ;;  %v4978_v49 = vpop.f32.mrf.mxu1  ;;  %v2580_v61 = vld [vmem:[#allocation2 + $0xa1] sm:$0xff] }
 0x278   : > { %v5062_v59 = vpop.f32.mrf.mxu0  ;;  %v2260_v49 = vld [vmem:[#allocation2 + $0x98] sm:$0xff]  ;;  %v7095_v12 = vpack.c.bf16 %v2580_v61, %v2579_v10 }
 0x279   : > { %7894 = vst [vmem:[#allocation18_spill] sm:$0xff] %v7075_v36  ;;  %v1756_v9 = vpop.f32.mrf.mxu1  ;;  %5276 = vmatmul.mubr.bf16.gmra.mxu1 %v7077_v15  ;;  %v7091_v36 = vpack.c.bf16 %v2261_v47, %v2260_v49  ;;  %v2582_v10 = vld [vmem:[#allocation2 + $0xb1] sm:$0xff] }
 0x27a   : > { %v1891_v14 = vadd.f32 %v1756_v9, %v6711_v56  ;;  %v2075_v26 = vpop.f32.mrf.mxu0  ;;  %5360 = vmatmul.mubr.bf16.gmra.mxu0 %v7079_v57  ;;  %5279 = vmatprep.mubr.msk.bf16.mxu1 %vm6130_vm0, %v6912_v0 }
 0x27b   : > { %v5081_v18 = vpop.f32.mrf.mxu1  ;;  %5363 = vmatprep.mubr.msk.bf16.mxu0 %vm6130_vm0, %v6912_v0 }
 0x27c   : > { %v7088_v25 = vadd.f32 %v2075_v26, %v1891_v14  ;;  %v5165_v59 = vpop.f32.mrf.mxu0 }
 0x27d   : > { %v1759_v27 = vpop.f32.mrf.mxu1 }
 0x27e   : > { %v1892_v17 = vadd.f32 %v1759_v27, %v6721_v42  ;;  %v2078_v56 = vpop.f32.mrf.mxu0 }
 0x27f   : > { %v5082_v9 = vpop.f32.mrf.mxu1 }
 0x280   : > { %v7093_v57 = vadd.f32 %v2078_v56, %v1892_v17  ;;  %v5166_v18 = vpop.f32.mrf.mxu0 }
 0x281   : > { %v1764_v15 = vpop.f32.mrf.mxu1  ;;  %5280 = vmatmul.mubr.bf16.gmra.mxu1 %v7091_v36 }
 0x282   : > { %v1893_v14 = vadd.f32 %v1764_v15, %v6866_v54  ;;  %v2083_v26 = vpop.f32.mrf.mxu0  ;;  %5364 = vmatmul.mubr.bf16.gmra.mxu0 %v7095_v12  ;;  %5283 = vmatprep.mubr.msk.bf16.mxu1 %vm6130_vm0, %v6912_v0  ;;  %v2581_v54 = vld [vmem:[#allocation2 + $0xa9] sm:$0xff] }
 0x283   : > { %v5085_v42 = vpop.f32.mrf.mxu1  ;;  %5367 = vmatprep.mubr.msk.bf16.mxu0 %vm6130_vm0, %v6912_v0  ;;  %v7109_v9 = vpack.c.bf16 %v2582_v10, %v2581_v54  ;;  %v2584_v10 = vld [vmem:[#allocation2 + $0xc1] sm:$0xff] }
 0x284   : > { %v7104_v59 = vadd.f32 %v2083_v26, %v1893_v14  ;;  %v5169_v47 = vpop.f32.mrf.mxu0 }
 0x285   : > { %v1767_v27 = vpop.f32.mrf.mxu1 }
 0x286   : > { %v1894_v61 = vadd.f32 %v1767_v27, %v6870_v51  ;;  %v2086_v17 = vpop.f32.mrf.mxu0 }
 0x287   : > { %v5086_v56 = vpop.f32.mrf.mxu1 }
 0x288   : > { %v7107_v15 = vadd.f32 %v2086_v17, %v1894_v61  ;;  %v5170_v49 = vpop.f32.mrf.mxu0 }
 0x289   : > { %v1772_v18 = vpop.f32.mrf.mxu1  ;;  %5284 = vmatmul.mubr.bf16.gmra.mxu1 %v6884_v44 }
 0x28a   : > { %v1895_v42 = vadd.f32 %v1772_v18, %v6878_v58  ;;  %v2091_v14 = vpop.f32.mrf.mxu0  ;;  %5368 = vmatmul.mubr.bf16.gmra.mxu0 %v7109_v9  ;;  %5287 = vmatprep.mubr.msk.bf16.mxu1 %vm6130_vm0, %v6912_v0  ;;  %v2583_v58 = vld [vmem:[#allocation2 + $0xb9] sm:$0xff] }
 0x28b   : > { %v5089_v51 = vpop.f32.mrf.mxu1  ;;  %5371 = vmatprep.mubr.msk.bf16.mxu0 %vm6130_vm0, %v6912_v0  ;;  %v7123_v49 = vpack.c.bf16 %v2584_v10, %v2583_v58  ;;  %v2586_v10 = vld [vmem:[#allocation2 + $0xd1] sm:$0xff] }
 0x28c   : > { %v7118_v26 = vadd.f32 %v2091_v14, %v1895_v42  ;;  %v5173_v47 = vpop.f32.mrf.mxu0 }
 0x28d   : > { %v1775_v27 = vpop.f32.mrf.mxu1 }
 0x28e   : > { %v1896_v61 = vadd.f32 %v1775_v27, %v6882_v28  ;;  %v2094_v44 = vpop.f32.mrf.mxu0 }
 0x28f   : > { %v5090_v17 = vpop.f32.mrf.mxu1 }
 0x290   : > { %v7121_v56 = vadd.f32 %v2094_v44, %v1896_v61  ;;  %v5174_v54 = vpop.f32.mrf.mxu0 }
 0x291   : > { %v1780_v18 = vpop.f32.mrf.mxu1  ;;  %5288 = vmatmul.mubr.bf16.gmra.mxu1 %v6896_v38 }
 0x292   : > { %v1897_v51 = vadd.f32 %v1780_v18, %v6890_v32  ;;  %v2099_v42 = vpop.f32.mrf.mxu0  ;;  %5372 = vmatmul.mubr.bf16.gmra.mxu0 %v7123_v49  ;;  %5291 = vmatprep.mubr.msk.bf16.mxu1 %vm6130_vm0, %v6912_v0  ;;  %v2585_v32 = vld [vmem:[#allocation2 + $0xc9] sm:$0xff] }
 0x293   : > { %v5093_v28 = vpop.f32.mrf.mxu1  ;;  %5375 = vmatprep.mubr.msk.bf16.mxu0 %vm6130_vm0, %v6912_v0  ;;  %v7137_v54 = vpack.c.bf16 %v2586_v10, %v2585_v32  ;;  %v2588_v10 = vld [vmem:[#allocation2 + $0xe1] sm:$0xff] }
 0x294   : > { %v7132_v14 = vadd.f32 %v2099_v42, %v1897_v51  ;;  %v5177_v47 = vpop.f32.mrf.mxu0 }
 0x295   : > { %v1783_v27 = vpop.f32.mrf.mxu1 }
 0x296   : > { %v1898_v61 = vadd.f32 %v1783_v27, %v6894_v34  ;;  %v2102_v38 = vpop.f32.mrf.mxu0 }
 0x297   : > { %v5094_v44 = vpop.f32.mrf.mxu1 }
 0x298   : > { %v7135_v17 = vadd.f32 %v2102_v38, %v1898_v61  ;;  %v5178_v58 = vpop.f32.mrf.mxu0 }
 0x299   : > { %v1788_v18 = vpop.f32.mrf.mxu1  ;;  %5292 = vmatmul.mubr.bf16.gmra.mxu1 %v6908_v31 }
 0x29a   : > { %v1899_v28 = vadd.f32 %v1788_v18, %v6902_v2  ;;  %v2107_v51 = vpop.f32.mrf.mxu0  ;;  %5376 = vmatmul.mubr.bf16.gmra.mxu0 %v7137_v54  ;;  %5295 = vmatprep.mubr.msk.bf16.mxu1 %vm6130_vm0, %v6912_v0  ;;  %v2587_v2 = vld [vmem:[#allocation2 + $0xd9] sm:$0xff] }
 0x29b   : > { %v5097_v34 = vpop.f32.mrf.mxu1  ;;  %5379 = vmatprep.mubr.msk.bf16.mxu0 %vm6130_vm0, %v6912_v0  ;;  %v7151_v58 = vpack.c.bf16 %v2588_v10, %v2587_v2  ;;  %v2590_v10 = vld [vmem:[#allocation2 + $0xf1] sm:$0xff] }
 0x29c   : > { %v7146_v42 = vadd.f32 %v2107_v51, %v1899_v28  ;;  %v5181_v47 = vpop.f32.mrf.mxu0 }
 0x29d   : > { %v1791_v27 = vpop.f32.mrf.mxu1 }
 0x29e   : > { %v1900_v61 = vadd.f32 %v1791_v27, %v6906_v4  ;;  %v2110_v31 = vpop.f32.mrf.mxu0 }
 0x29f   : > { %v5098_v38 = vpop.f32.mrf.mxu1 }
 0x2a0   : > { %v7149_v44 = vadd.f32 %v2110_v31, %v1900_v61  ;;  %v5182_v32 = vpop.f32.mrf.mxu0 }
 0x2a1   : > { %v1796_v18 = vpop.f32.mrf.mxu1  ;;  %5296 = vmatmul.mubr.bf16.gmra.mxu1 %v6922_v6 }
 0x2a2   : > { %v1901_v34 = vadd.f32 %v1796_v18, %v6916_v23  ;;  %v2115_v28 = vpop.f32.mrf.mxu0  ;;  %5380 = vmatmul.mubr.bf16.gmra.mxu0 %v7151_v58  ;;  %5299 = vmatprep.mubr.msk.bf16.mxu1 %vm6130_vm0, %v6912_v0  ;;  %v2589_v23 = vld [vmem:[#allocation2 + $0xe9] sm:$0xff] }
 0x2a3   : > { %v5101_v4 = vpop.f32.mrf.mxu1  ;;  %5383 = vmatprep.mubr.msk.bf16.mxu0 %vm6130_vm0, %v6912_v0  ;;  %v7165_v32 = vpack.c.bf16 %v2590_v10, %v2589_v23  ;;  %v2592_v10 = vld [vmem:[#allocation2 + $0x101] sm:$0xff] }
 0x2a4   : > { %v7160_v51 = vadd.f32 %v2115_v28, %v1901_v34  ;;  %v5185_v47 = vpop.f32.mrf.mxu0 }
 0x2a5   : > { %v1799_v27 = vpop.f32.mrf.mxu1 }
 0x2a6   : > { %v1902_v61 = vadd.f32 %v1799_v27, %v6920_v19  ;;  %v2118_v6 = vpop.f32.mrf.mxu0 }
 0x2a7   : > { %v5102_v31 = vpop.f32.mrf.mxu1 }
 0x2a8   : > { %v7163_v38 = vadd.f32 %v2118_v6, %v1902_v61  ;;  %v5186_v2 = vpop.f32.mrf.mxu0 }
 0x2a9   : > { %v1804_v18 = vpop.f32.mrf.mxu1  ;;  %5300 = vmatmul.mubr.bf16.gmra.mxu1 %v6934_v53 }
 0x2aa   : > { %v1903_v4 = vadd.f32 %v1804_v18, %v6928_v5  ;;  %v2123_v34 = vpop.f32.mrf.mxu0  ;;  %5384 = vmatmul.mubr.bf16.gmra.mxu0 %v7165_v32  ;;  %5303 = vmatprep.mubr.msk.bf16.mxu1 %vm6130_vm0, %v6912_v0  ;;  %v2591_v5 = vld [vmem:[#allocation2 + $0xf9] sm:$0xff] }
 0x2ab   : > { %v5105_v19 = vpop.f32.mrf.mxu1  ;;  %5387 = vmatprep.mubr.msk.bf16.mxu0 %vm6130_vm0, %v6912_v0  ;;  %v7179_v2 = vpack.c.bf16 %v2592_v10, %v2591_v5  ;;  %v2594_v10 = vld [vmem:[#allocation2 + $0x111] sm:$0xff] }
 0x2ac   : > { %v7174_v28 = vadd.f32 %v2123_v34, %v1903_v4  ;;  %v5189_v47 = vpop.f32.mrf.mxu0 }
 0x2ad   : > { %v1807_v27 = vpop.f32.mrf.mxu1 }
 0x2ae   : > { %v1904_v61 = vadd.f32 %v1807_v27, %v6932_v48  ;;  %v2126_v53 = vpop.f32.mrf.mxu0 }
 0x2af   : > { %v5106_v6 = vpop.f32.mrf.mxu1 }
 0x2b0   : > { %v7177_v31 = vadd.f32 %v2126_v53, %v1904_v61  ;;  %v5190_v23 = vpop.f32.mrf.mxu0 }
 0x2b1   : > { %v1812_v18 = vpop.f32.mrf.mxu1  ;;  %5304 = vmatmul.mubr.bf16.gmra.mxu1 %v6946_v46 }
 0x2b2   : > { %v1905_v19 = vadd.f32 %v1812_v18, %v6940_v43  ;;  %v2131_v4 = vpop.f32.mrf.mxu0  ;;  %5388 = vmatmul.mubr.bf16.gmra.mxu0 %v7179_v2  ;;  %5307 = vmatprep.mubr.msk.bf16.mxu1 %vm6130_vm0, %v6912_v0  ;;  %v2593_v43 = vld [vmem:[#allocation2 + $0x109] sm:$0xff] }
 0x2b3   : > { %v5109_v48 = vpop.f32.mrf.mxu1  ;;  %5391 = vmatprep.mubr.msk.bf16.mxu0 %vm6130_vm0, %v6912_v0  ;;  %v7193_v23 = vpack.c.bf16 %v2594_v10, %v2593_v43 }
 0x2b4   : > { %v7188_v34 = vadd.f32 %v2131_v4, %v1905_v19  ;;  %v5193_v47 = vpop.f32.mrf.mxu0 }
 0x2b5   : > { %v1815_v27 = vpop.f32.mrf.mxu1  ;;  %7898 = vst [vmem:[#allocation22_spill] sm:$0xff] %v7193_v23 }
 0x2b6   : > { %v1906_v61 = vadd.f32 %v1815_v27, %v6944_v40  ;;  %v2134_v46 = vpop.f32.mrf.mxu0  ;;  %v2277_v27 = vld [vmem:[#allocation2 + $0x120] sm:$0xff] }
 0x2b7   : > { %v5110_v53 = vpop.f32.mrf.mxu1 }
 0x2b8   : > { %v7191_v6 = vadd.f32 %v2134_v46, %v1906_v61  ;;  %v5194_v5 = vpop.f32.mrf.mxu0  ;;  %v2595_v61 = vld [vmem:[#allocation2 + $0x119] sm:$0xff]  ;;  %v2596_v46 = vld [vmem:[#allocation2 + $0x121] sm:$0xff] }
 0x2b9   : > { %v1820_v18 = vpop.f32.mrf.mxu1  ;;  %5308 = vmatmul.mubr.bf16.gmra.mxu1 %v6958_v50  ;;  %v2276_v53 = vld [vmem:[#allocation2 + $0x118] sm:$0xff] }
 0x2ba   : > { %7897 = vst [vmem:[#allocation21_spill] sm:$0xff] %v7191_v6  ;;  %v1907_v48 = vadd.f32 %v1820_v18, %v6952_v35  ;;  %v2139_v19 = vpop.f32.mrf.mxu0  ;;  %5392 = vmatmul.mubr.bf16.gmra.mxu0 %v7193_v23  ;;  %5311 = vmatprep.mubr.msk.bf16.mxu1 %vm6130_vm0, %v6912_v0  ;;  %v7205_v5 = vpack.c.bf16 %v2277_v27, %v2276_v53 }
 0x2bb   : > { %v5113_v40 = vpop.f32.mrf.mxu1  ;;  %5395 = vmatprep.mubr.msk.bf16.mxu0 %vm6130_vm0, %v6912_v0  ;;  %v7209_v6 = vpack.c.bf16 %v2596_v46, %v2595_v61 }
 0x2bc   : > { %v7202_v4 = vadd.f32 %v2139_v19, %v1907_v48  ;;  %v5197_v47 = vpop.f32.mrf.mxu0 }
 0x2bd   : > { %v1823_v10 = vpop.f32.mrf.mxu1 }
 0x2be   : > { %v1908_v50 = vadd.f32 %v1823_v10, %v6956_v62  ;;  %v2142_v35 = vpop.f32.mrf.mxu0 }
 0x2bf   : > { %v5114_v43 = vpop.f32.mrf.mxu1 }
 0x2c0   : > { %v7207_v18 = vadd.f32 %v2142_v35, %v1908_v50  ;;  %v5198_v40 = vpop.f32.mrf.mxu0  ;;  %v5922_v50 = vld [vmem:[#allocation6 + $0x238] sm:$0xff]  }
 0x2c1   : > { %v1828_v23 = vpop.f32.mrf.mxu1  ;;  %5312 = vmatmul.mubr.bf16.gmra.mxu1 %v7205_v5 }
 0x2c2   : > { %v1909_v48 = vadd.f32 %v1828_v23, %v6963_v8  ;;  %v2147_v19 = vpop.f32.mrf.mxu0  ;;  %5396 = vmatmul.mubr.bf16.gmra.mxu0 %v7209_v6  ;;  %5415 = vmatprep.mubr.msk.bf16.mxu1 %vm6130_vm0, %v6912_v0 }
 0x2c3   : > { %v5117_v62 = vpop.f32.mrf.mxu1  ;;  %5499 = vmatprep.mubr.msk.bf16.mxu0 %vm6130_vm0, %v6912_v0 }
 0x2c4   : > { %v7218_v47 = vadd.f32 %v2147_v19, %v1909_v48  ;;  %v5201_v27 = vpop.f32.mrf.mxu0  ;;  %v5923_v48 = vld [vmem:[#allocation6 + $0x230] sm:$0xff]  }
 0x2c5   : > { %v1831_v10 = vpop.f32.mrf.mxu1 }
 0x2c6   : > { %v1910_v61 = vadd.f32 %v1831_v10, %v6967_v63  ;;  %v2150_v46 = vpop.f32.mrf.mxu0  ;;  %v5924_v10 = vld [vmem:[#allocation6 + $0x228] sm:$0xff]  }
 0x2c7   : > { %v5118_v35 = vpop.f32.mrf.mxu1 }
 0x2c8   : > { %v7221_v8 = vadd.f32 %v2150_v46, %v1910_v61  ;;  %v5202_v23 = vpop.f32.mrf.mxu0 }
 0x2c9   : > { %v1836_v53 = vpop.f32.mrf.mxu1  ;;  %5416 = vmatmul.mubr.bf16.vlgmr.msra.gmra.mxu1 %v6979_v21 }
 0x2ca   : > { %v1911_v43 = vadd.f32 %v1836_v53, %v6969_v41  ;;  %v2155_v40 = vpop.f32.mrf.mxu0  ;;  %5500 = vmatmul.mubr.bf16.vlgmr.msra.gmra.mxu0 %v6982_v24  ;;  %5568 = vmatpush3.bf16.msra.mxu1 %v5922_v50  ;;  %v5925_v53 = vld [vmem:[#allocation6 + $0x220] sm:$0xff]  }
 0x2cb   : > { %v5121_v19 = vpop.f32.mrf.mxu1  ;;  %5419 = vmatprep.mubr.msk.bf16.mxu1 %vm6130_vm0, %v6912_v0  ;;  %5503 = vmatprep.mubr.msk.bf16.mxu0 %vm6130_vm0, %v6912_v0 }
 0x2cc   : > { %v7230_v63 = vadd.f32 %v2155_v40, %v1911_v43  ;;  %v5205_v62 = vpop.f32.mrf.mxu0  ;;  %5569 = vmatprep.subr.bf16.mxu1 %v6912_v0 }
 0x2cd   : > { %v1839_v21 = vpop.f32.mrf.mxu1 }
 0x2ce   : > { %v1912_v41 = vadd.f32 %v1839_v21, %v6977_v16  ;;  %v2158_v27 = vpop.f32.mrf.mxu0  ;;  %5570 = vmatpush3.bf16.msra.mxu1 %v5923_v48 }
 0x2cf   : > { %v5122_v24 = vpop.f32.mrf.mxu1  ;;  %5571 = vmatprep.subr.bf16.mxu1 %v6912_v0 }
 0x2d0   : > { %v7235_v61 = vadd.f32 %v2158_v27, %v1912_v41  ;;  %v5206_v46 = vpop.f32.mrf.mxu0  ;;  %v7250_v41 = vld [vmem:[#allocation2] sm:$0xff] }
 0x2d1   : > { %v1844_v50 = vpop.f32.mrf.mxu1  ;;  %5420 = vmatmul.mubr.bf16.gmra.mxu1 %v6997_v20 }
 0x2d2   : > { %v1913_v35 = vadd.f32 %v1844_v50, %v6989_v55  ;;  %v2163_v23 = vpop.f32.mrf.mxu0  ;;  %5504 = vmatmul.mubr.bf16.gmra.mxu0 %v6999_v37  ;;  %5423 = vmatprep.mubr.msk.bf16.mxu1 %vm6130_vm0, %v6912_v0  ;;  %v5926_v37 = vld [vmem:[#allocation6 + $0x218] sm:$0xff]  }
 0x2d3   : > { %v5125_v16 = vpop.f32.mrf.mxu1  ;;  %5507 = vmatprep.mubr.msk.bf16.mxu0 %vm6130_vm0, %v6912_v0  ;;  %5572 = vmatpush3.bf16.msra.mxu1 %v5924_v10  ;;  %v5927_v10 = vld [vmem:[#allocation6 + $0x210] sm:$0xff]  }
 0x2d4   : > { %v7244_v43 = vadd.f32 %v2163_v23, %v1913_v35  ;;  %v5209_v40 = vpop.f32.mrf.mxu0  ;;  %5573 = vmatprep.subr.bf16.mxu1 %v6912_v0 }
 0x2d5   : > { %v1847_v20 = vpop.f32.mrf.mxu1 }
 0x2d6   : > { %v1914_v55 = vadd.f32 %v1847_v20, %v6995_v33  ;;  %v2166_v48 = vpop.f32.mrf.mxu0 }
 0x2d7   : > { %v5126_v19 = vpop.f32.mrf.mxu1  ;;  %5574 = vmatpush3.bf16.msra.mxu1 %v5925_v53 }
 0x2d8   : > { %v7248_v62 = vadd.f32 %v2166_v48, %v1914_v55  ;;  %v5210_v21 = vpop.f32.mrf.mxu0  ;;  %5575 = vmatprep.subr.bf16.mxu1 %v7250_v41  ;;  %v5929_v48 = vld [vmem:[#allocation6 + $0x200] sm:$0xff]  }
 0x2d9   : > { %v1852_v27 = vpop.f32.mrf.mxu1  ;;  %5424 = vmatmul.mubr.bf16.gmra.mxu1 %v7015_v3 }
 0x2da   : > { %v1915_v24 = vadd.f32 %v1852_v27, %v7007_v60  ;;  %v2171_v0 = vpop.f32.mrf.mxu0  ;;  %5508 = vmatmul.mubr.bf16.gmra.mxu0 %v7017_v11  ;;  %5427 = vmatprep.mubr.msk.bf16.mxu1 %vm6130_vm0, %v7250_v41  ;;  %v5928_v11 = vld [vmem:[#allocation6 + $0x208] sm:$0xff]  }
 0x2db   : > { %v5129_v33 = vpop.f32.mrf.mxu1  ;;  %5511 = vmatprep.mubr.msk.bf16.mxu0 %vm6130_vm0, %v7250_v41  ;;  %5576 = vmatpush3.bf16.msra.mxu1 %v5926_v37 }
 0x2dc   : > { %v7260_v46 = vadd.f32 %v2171_v0, %v1915_v24  ;;  %v5213_v50 = vpop.f32.mrf.mxu0  ;;  %5577 = vmatprep.subr.bf16.mxu1 %v7250_v41 }
 0x2dd   : > { %v1855_v3 = vpop.f32.mrf.mxu1 }
 0x2de   : > { %v1916_v60 = vadd.f32 %v1855_v3, %v7013_v7  ;;  %v2174_v35 = vpop.f32.mrf.mxu0 }
 0x2df   : > { %v5130_v23 = vpop.f32.mrf.mxu1  ;;  %5578 = vmatpush3.bf16.msra.mxu1 %v5927_v10 }
 0x2e0   : > { %v7264_v16 = vadd.f32 %v2174_v35, %v1916_v60  ;;  %v5214_v53 = vpop.f32.mrf.mxu0  ;;  %5579 = vmatprep.subr.bf16.mxu1 %v7250_v41 }
 0x2e1   : > { %v1860_v40 = vpop.f32.mrf.mxu1  ;;  %5428 = vmatmul.mubr.bf16.gmra.mxu1 %v7033_v29 }
 0x2e2   : > { %v1917_v20 = vadd.f32 %v1860_v40, %v7025_v30  ;;  %v2179_v55 = vpop.f32.mrf.mxu0  ;;  %5512 = vmatmul.mubr.bf16.gmra.mxu0 %v7035_v52  ;;  %5431 = vmatprep.mubr.msk.bf16.mxu1 %vm6130_vm0, %v7250_v41  ;;  %v7900_v40 = vld [vmem:[#allocation13_spill] sm:$0xff] }
 0x2e3   : > { %v5133_v7 = vpop.f32.mrf.mxu1  ;;  %5515 = vmatprep.mubr.msk.bf16.mxu0 %vm6130_vm0, %v7250_v41  ;;  %5580 = vmatpush3.bf16.msra.mxu1 %v5928_v11 }
 0x2e4   : > { %v7274_v19 = vadd.f32 %v2179_v55, %v1917_v20  ;;  %v5217_v37 = vpop.f32.mrf.mxu0  ;;  %5581 = vmatprep.subr.bf16.mxu1 %v7250_v41  ;;  %v7901_v7 = vld [vmem:[#allocation16_spill] sm:$0xff] }
 0x2e5   : > { %v1863_v29 = vpop.f32.mrf.mxu1 }
 0x2e6   : > { %v1918_v30 = vadd.f32 %v1863_v29, %v7031_v39  ;;  %v2182_v21 = vpop.f32.mrf.mxu0 }
 0x2e7   : > { %v5134_v27 = vpop.f32.mrf.mxu1  ;;  %5582 = vmatpush3.bf16.msra.mxu1 %v5929_v48 }
 0x2e8   : > { %v7278_v52 = vadd.f32 %v2182_v21, %v1918_v30  ;;  %v5218_v24 = vpop.f32.mrf.mxu0  ;;  %v7902_v30 = vld [vmem:[#allocation14_spill] sm:$0xff] }
 0x2e9   : > { %v1868_v0 = vpop.f32.mrf.mxu1  ;;  %5432 = vmatmul.mubr.bf16.gmra.mxu1 %v7049_v45 }
 0x2ea   : > { %v1919_v33 = vadd.f32 %v1868_v0, %v7043_v22  ;;  %v2187_v10 = vpop.f32.mrf.mxu0  ;;  %5516 = vmatmul.mubr.bf16.gmra.mxu0 %v7051_v1  ;;  %5435 = vmatprep.mubr.msk.bf16.mxu1 %vm6130_vm0, %v7250_v41  ;;  %v7899_v1 = vld [vmem:[#allocation15_spill] sm:$0xff] }
 0x2eb   : > { %v5137_v50 = vpop.f32.mrf.mxu1  ;;  %5519 = vmatprep.mubr.msk.bf16.mxu0 %vm6130_vm0, %v7250_v41 }
 0x2ec   : > { %v7287_v39 = vadd.f32 %v2187_v10, %v1919_v33  ;;  %v5221_v3 = vpop.f32.mrf.mxu0  ;;  %v7903_v50 = vld [vmem:[#allocation19_spill] sm:$0xff] }
 0x2ed   : > { %v1871_v60 = vpop.f32.mrf.mxu1  ;;  %v7904_v3 = vld [vmem:[#allocation17_spill] sm:$0xff] }
 0x2ee   : > { %v1920_v35 = vadd.f32 %v1871_v60, %v7047_v13  ;;  %v2190_v23 = vpop.f32.mrf.mxu0 }
 0x2ef   : > { %v5138_v45 = vpop.f32.mrf.mxu1 }
 0x2f0   : > { %v7290_v11 = vadd.f32 %v2190_v23, %v1920_v35  ;;  %v5222_v22 = vpop.f32.mrf.mxu0  ;;  %v7905_v23 = vld [vmem:[#allocation20_spill] sm:$0xff] }
 0x2f1   : > { %v1876_v53 = vpop.f32.mrf.mxu1  ;;  %5436 = vmatmul.mubr.bf16.gmra.mxu1 %v7899_v1 }
 0x2f2   : > { %v1921_v20 = vadd.f32 %v1876_v53, %v7900_v40  ;;  %v2195_v55 = vpop.f32.mrf.mxu0  ;;  %5520 = vmatmul.mubr.bf16.gmra.mxu0 %v7901_v7  ;;  %5439 = vmatprep.mubr.msk.bf16.mxu1 %vm6130_vm0, %v7250_v41  ;;  %v7906_v40 = vld [vmem:[#allocation18_spill] sm:$0xff] }
 0x2f3   : > { %v5141_v48 = vpop.f32.mrf.mxu1  ;;  %5523 = vmatprep.mubr.msk.bf16.mxu0 %vm6130_vm0, %v7250_v41 }
 0x2f4   : > { %v7299_v13 = vadd.f32 %v2195_v55, %v1921_v20  ;;  %v5225_v37 = vpop.f32.mrf.mxu0 }
 0x2f5   : > { %v1879_v29 = vpop.f32.mrf.mxu1 }
 0x2f6   : > { %v1922_v21 = vadd.f32 %v1879_v29, %v7902_v30  ;;  %v2198_v27 = vpop.f32.mrf.mxu0 }
 0x2f7   : > { %v5142_v24 = vpop.f32.mrf.mxu1 }
 0x2f8   : > { %v7302_v0 = vadd.f32 %v2198_v27, %v1922_v21  ;;  %v5226_v33 = vpop.f32.mrf.mxu0 }
 0x2f9   : > { %v1884_v10 = vpop.f32.mrf.mxu1  ;;  %5440 = vmatmul.mubr.bf16.gmra.mxu1 %v7903_v50 }
 0x2fa   : > { %v1923_v60 = vadd.f32 %v1884_v10, %v7904_v3  ;;  %v2203_v35 = vpop.f32.mrf.mxu0  ;;  %5524 = vmatmul.mubr.bf16.gmra.mxu0 %v7905_v23  ;;  %5443 = vmatprep.mubr.msk.bf16.mxu1 %vm6130_vm0, %v7250_v41  ;;  %v2899_v10 = vld [vmem:[#allocation2 + $0xb0] sm:$0xff] }
 0x2fb   : > { %v5145_v45 = vpop.f32.mrf.mxu1  ;;  %5527 = vmatprep.mubr.msk.bf16.mxu0 %vm6130_vm0, %v7250_v41 }
 0x2fc   : > { %v7311_v22 = vadd.f32 %v2203_v35, %v1923_v60  ;;  %v5229_v53 = vpop.f32.mrf.mxu0  ;;  %v2898_v60 = vld [vmem:[#allocation2 + $0xa8] sm:$0xff] }
 0x2fd   : > { %v1887_v1 = vpop.f32.mrf.mxu1  ;;  %v2924_v35 = vpack.c.bf16 %v2899_v10, %v2898_v60  ;;  %v2903_v60 = vld [vmem:[#allocation2 + $0xd0] sm:$0xff] }
 0x2fe   : > { %v1924_v20 = vadd.f32 %v1887_v1, %v7906_v40  ;;  %v2206_v55 = vpop.f32.mrf.mxu0 }
 0x2ff   : > { %v5146_v7 = vpop.f32.mrf.mxu1 }
 0x300   : > { %v7314_v48 = vadd.f32 %v2206_v55, %v1924_v20  ;;  %v5230_v37 = vpop.f32.mrf.mxu0  ;;  %v2901_v55 = vld [vmem:[#allocation2 + $0xc0] sm:$0xff] }
 0x301   : > { %v2394_v29 = vpop.f32.mrf.mxu1  ;;  %5444 = vmatmul.mubr.bf16.gmra.mxu1 %v7091_v36 }
 0x302   : > { %v2529_v30 = vadd.f32 %v2394_v29, %v7088_v25  ;;  %v2713_v21 = vpop.f32.mrf.mxu0  ;;  %5528 = vmatmul.mubr.bf16.gmra.mxu0 %v7095_v12  ;;  %5447 = vmatprep.mubr.msk.bf16.mxu1 %vm6130_vm0, %v7250_v41 }
 0x303   : > { %v5249_v27 = vpop.f32.mrf.mxu1  ;;  %5531 = vmatprep.mubr.msk.bf16.mxu0 %vm6130_vm0, %v7250_v41 }
 0x304   : > { %v7323_v24 = vadd.f32 %v2713_v21, %v2529_v30  ;;  %v5333_v33 = vpop.f32.mrf.mxu0  ;;  %v2900_v30 = vld [vmem:[#allocation2 + $0xb8] sm:$0xff] }
 0x305   : > { %v2397_v50 = vpop.f32.mrf.mxu1  ;;  %v2925_v21 = vpack.c.bf16 %v2901_v55, %v2900_v30  ;;  %v2905_v30 = vld [vmem:[#allocation2 + $0xe0] sm:$0xff] }
 0x306   : > { %v2530_v3 = vadd.f32 %v2397_v50, %v7093_v57  ;;  %v2716_v36 = vpop.f32.mrf.mxu0 }
 0x307   : > { %v5250_v25 = vpop.f32.mrf.mxu1 }
 0x308   : > { %v7326_v23 = vadd.f32 %v2716_v36, %v2530_v3  ;;  %v5334_v12 = vpop.f32.mrf.mxu0 }
 0x309   : > { %v2402_v45 = vpop.f32.mrf.mxu1  ;;  %5448 = vmatmul.mubr.bf16.gmra.mxu1 %v2924_v35 }
 0x30a   : > { %v2531_v53 = vadd.f32 %v2402_v45, %v7104_v59  ;;  %v2721_v1 = vpop.f32.mrf.mxu0  ;;  %5532 = vmatmul.mubr.bf16.gmra.mxu0 %v7109_v9  ;;  %5451 = vmatprep.mubr.msk.bf16.mxu1 %vm6130_vm0, %v7250_v41  ;;  %v2902_v45 = vld [vmem:[#allocation2 + $0xc8] sm:$0xff] }
 0x30b   : > { %v5253_v40 = vpop.f32.mrf.mxu1  ;;  %5535 = vmatprep.mubr.msk.bf16.mxu0 %vm6130_vm0, %v7250_v41 }
 0x30c   : > { %v7334_v57 = vadd.f32 %v2721_v1, %v2531_v53  ;;  %v5337_v20 = vpop.f32.mrf.mxu0  ;;  %v2926_v53 = vpack.c.bf16 %v2903_v60, %v2902_v45  ;;  %v5930_v40 = vld [vmem:[#allocation8 + $0x38] sm:$0xff]  }
 0x30d   : > { %v2405_v7 = vpop.f32.mrf.mxu1  ;;  %5652 = vmatpush3.bf16.msra.mxu0 %v5930_v40 }
 0x30e   : > { %v2532_v37 = vadd.f32 %v2405_v7, %v7107_v15  ;;  %v2724_v29 = vpop.f32.mrf.mxu0  ;;  %5653 = vmatprep.subr.bf16.mxu0 %v7250_v41 }
 0x30f   : > { %v5254_v59 = vpop.f32.mrf.mxu1 }
 0x310   : > { %v7337_v27 = vadd.f32 %v2724_v29, %v2532_v37  ;;  %v5338_v9 = vpop.f32.mrf.mxu0 }
 0x311   : > { %v2410_v33 = vpop.f32.mrf.mxu1  ;;  %5452 = vmatmul.mubr.bf16.gmra.mxu1 %v2925_v21  ;;  %v2904_v9 = vld [vmem:[#allocation2 + $0xd8] sm:$0xff] }
 0x312   : > { %v2533_v10 = vadd.f32 %v2410_v33, %v7118_v26  ;;  %v2729_v50 = vpop.f32.mrf.mxu0  ;;  %5536 = vmatmul.mubr.bf16.gmra.mxu0 %v7123_v49  ;;  %5455 = vmatprep.mubr.msk.bf16.mxu1 %vm6130_vm0, %v7250_v41  ;;  %v2927_v33 = vpack.c.bf16 %v2905_v30, %v2904_v9 }
 0x313   : > { %v5257_v3 = vpop.f32.mrf.mxu1  ;;  %5539 = vmatprep.mubr.msk.bf16.mxu0 %vm6130_vm0, %v7250_v41 }
 0x314   : > { %v7345_v15 = vadd.f32 %v2729_v50, %v2533_v10  ;;  %v5341_v36 = vpop.f32.mrf.mxu0 }
 0x315   : > { %v2413_v25 = vpop.f32.mrf.mxu1 }
 0x316   : > { %v2534_v35 = vadd.f32 %v2413_v25, %v7121_v56  ;;  %v2732_v12 = vpop.f32.mrf.mxu0 }
 0x317   : > { %v5258_v26 = vpop.f32.mrf.mxu1 }
 0x318   : > { %v7348_v1 = vadd.f32 %v2732_v12, %v2534_v35  ;;  %v5342_v49 = vpop.f32.mrf.mxu0  ;;  %v2907_v12 = vld [vmem:[#allocation2 + $0xf0] sm:$0xff] }
 0x319   : > { %v2418_v20 = vpop.f32.mrf.mxu1  ;;  %5456 = vmatmul.mubr.bf16.gmra.mxu1 %v2926_v53  ;;  %v2906_v49 = vld [vmem:[#allocation2 + $0xe8] sm:$0xff] }
 0x31a   : > { %v2535_v55 = vadd.f32 %v2418_v20, %v7132_v14  ;;  %v2737_v7 = vpop.f32.mrf.mxu0  ;;  %5540 = vmatmul.mubr.bf16.gmra.mxu0 %v7137_v54  ;;  %5459 = vmatprep.mubr.msk.bf16.mxu1 %vm6130_vm0, %v7250_v41  ;;  %v2928_v40 = vpack.c.bf16 %v2907_v12, %v2906_v49 }
 0x31b   : > { %v5261_v37 = vpop.f32.mrf.mxu1  ;;  %5543 = vmatprep.mubr.msk.bf16.mxu0 %vm6130_vm0, %v7250_v41 }
 0x31c   : > { %v7356_v56 = vadd.f32 %v2737_v7, %v2535_v55  ;;  %v5345_v29 = vpop.f32.mrf.mxu0  ;;  %v5931_v55 = vld [vmem:[#allocation8 + $0x30] sm:$0xff]  }
 0x31d   : > { %v2421_v59 = vpop.f32.mrf.mxu1  ;;  %5654 = vmatpush3.bf16.msra.mxu0 %v5931_v55  ;;  %v5932_v55 = vld [vmem:[#allocation8 + $0x28] sm:$0xff]  }
 0x31e   : > { %v2536_v14 = vadd.f32 %v2421_v59, %v7135_v17  ;;  %v2740_v21 = vpop.f32.mrf.mxu0  ;;  %5655 = vmatprep.subr.bf16.mxu0 %v7250_v41 }
 0x31f   : > { %v5262_v54 = vpop.f32.mrf.mxu1 }
 0x320   : > { %v7360_v10 = vadd.f32 %v2740_v21, %v2536_v14  ;;  %v5346_v50 = vpop.f32.mrf.mxu0  ;;  %v2909_v14 = vld [vmem:[#allocation2 + $0x100] sm:$0xff]  ;;  %v2908_v54 = vld [vmem:[#allocation2 + $0xf8] sm:$0xff] }
 0x321   : > { %v2426_v3 = vpop.f32.mrf.mxu1  ;;  %5460 = vmatmul.mubr.bf16.gmra.mxu1 %v2927_v33  ;;  %v2929_v33 = vpack.c.bf16 %v2909_v14, %v2908_v54  ;;  %5656 = vmatpush3.bf16.msra.mxu0 %v5932_v55 }
 0x322   : > { %v2537_v36 = vadd.f32 %v2426_v3, %v7146_v42  ;;  %v2745_v60 = vpop.f32.mrf.mxu0  ;;  %5544 = vmatmul.mubr.bf16.gmra.mxu0 %v7151_v58  ;;  %5463 = vmatprep.mubr.msk.bf16.mxu1 %vm6130_vm0, %v7250_v41 }
 0x323   : > { %v5265_v25 = vpop.f32.mrf.mxu1  ;;  %5547 = vmatprep.mubr.msk.bf16.mxu0 %vm6130_vm0, %v7250_v41  ;;  %5657 = vmatprep.subr.bf16.mxu0 %v7250_v41 }
 0x324   : > { %v7368_v17 = vadd.f32 %v2745_v60, %v2537_v36  ;;  %v5349_v35 = vpop.f32.mrf.mxu0 }
 0x325   : > { %v2429_v45 = vpop.f32.mrf.mxu1 }
 0x326   : > { %v2538_v26 = vadd.f32 %v2429_v45, %v7149_v44  ;;  %v2748_v53 = vpop.f32.mrf.mxu0  ;;  %v2911_v45 = vld [vmem:[#allocation2 + $0x110] sm:$0xff] }
 0x327   : > { %v5266_v42 = vpop.f32.mrf.mxu1 }
 0x328   : > { %v7371_v20 = vadd.f32 %v2748_v53, %v2538_v26  ;;  %v5350_v58 = vpop.f32.mrf.mxu0  ;;  %v2910_v42 = vld [vmem:[#allocation2 + $0x108] sm:$0xff] }
 0x329   : > { %v2434_v7 = vpop.f32.mrf.mxu1  ;;  %5464 = vmatmul.mubr.bf16.gmra.mxu1 %v2928_v40  ;;  %v2930_v40 = vpack.c.bf16 %v2911_v45, %v2910_v42 }
 0x32a   : > { %v2539_v37 = vadd.f32 %v2434_v7, %v7160_v51  ;;  %v2753_v29 = vpop.f32.mrf.mxu0  ;;  %5548 = vmatmul.mubr.bf16.gmra.mxu0 %v7165_v32  ;;  %5467 = vmatprep.mubr.msk.bf16.mxu1 %vm6130_vm0, %v7250_v41 }
 0x32b   : > { %v5269_v30 = vpop.f32.mrf.mxu1  ;;  %5551 = vmatprep.mubr.msk.bf16.mxu0 %vm6130_vm0, %v7250_v41 }
 0x32c   : > { %v7379_v44 = vadd.f32 %v2753_v29, %v2539_v37  ;;  %v5353_v59 = vpop.f32.mrf.mxu0  ;;  %v7907_v30 = vld [vmem:[#allocation22_spill] sm:$0xff] }
 0x32d   : > { %v2437_v21 = vpop.f32.mrf.mxu1 }
 0x32e   : > { %v2540_v51 = vadd.f32 %v2437_v21, %v7163_v38  ;;  %v2756_v9 = vpop.f32.mrf.mxu0 }
 0x32f   : > { %v5270_v32 = vpop.f32.mrf.mxu1 }
 0x330   : > { %v7383_v50 = vadd.f32 %v2756_v9, %v2540_v51  ;;  %v5354_v3 = vpop.f32.mrf.mxu0  ;;  %v7908_v51 = vld [vmem:[#allocation21_spill] sm:$0xff] }
 0x331   : > { %v2442_v36 = vpop.f32.mrf.mxu1  ;;  %5468 = vmatmul.mubr.bf16.gmra.mxu1 %v2929_v33 }
 0x332   : > { %v2541_v60 = vadd.f32 %v2442_v36, %v7174_v28  ;;  %v2761_v25 = vpop.f32.mrf.mxu0  ;;  %5552 = vmatmul.mubr.bf16.gmra.mxu0 %v7179_v2  ;;  %5471 = vmatprep.mubr.msk.bf16.mxu1 %vm6130_vm0, %v7250_v41 }
 0x333   : > { %v5273_v35 = vpop.f32.mrf.mxu1  ;;  %5555 = vmatprep.mubr.msk.bf16.mxu0 %vm6130_vm0, %v7250_v41 }
 0x334   : > { %v7391_v38 = vadd.f32 %v2761_v25, %v2541_v60  ;;  %v5357_v12 = vpop.f32.mrf.mxu0  ;;  %v3233_v35 = vld [vmem:[#allocation2 + $0x129] sm:$0xff] }
 0x335   : > { %v2445_v26 = vpop.f32.mrf.mxu1  ;;  %v3234_v12 = vld [vmem:[#allocation2 + $0x131] sm:$0xff] }
 0x336   : > { %v2542_v53 = vadd.f32 %v2445_v26, %v7177_v31  ;;  %v2764_v49 = vpop.f32.mrf.mxu0 }
 0x337   : > { %v5274_v28 = vpop.f32.mrf.mxu1 }
 0x338   : > { %v7394_v58 = vadd.f32 %v2764_v49, %v2542_v53  ;;  %v5358_v2 = vpop.f32.mrf.mxu0 }
 0x339   : > { %v2450_v7 = vpop.f32.mrf.mxu1  ;;  %5472 = vmatmul.mubr.bf16.gmra.mxu1 %v2930_v40 }
 0x33a   : > { %v2543_v37 = vadd.f32 %v2450_v7, %v7188_v34  ;;  %v2769_v29 = vpop.f32.mrf.mxu0  ;;  %5556 = vmatmul.mubr.bf16.gmra.mxu0 %v7907_v30  ;;  %5475 = vmatprep.mubr.msk.bf16.mxu1 %vm6130_vm0, %v7250_v41  ;;  %v3521_v30 = vld [vmem:[#allocation2 + $0x32] sm:$0xff] }
 0x33b   : > { %v5277_v59 = vpop.f32.mrf.mxu1  ;;  %5559 = vmatprep.mubr.msk.bf16.mxu0 %vm6130_vm0, %v7250_v41 }
 0x33c   : > { %v7402_v31 = vadd.f32 %v2769_v29, %v2543_v37  ;;  %v5361_v14 = vpop.f32.mrf.mxu0  ;;  %v5933_v59 = vld [vmem:[#allocation8 + $0x20] sm:$0xff]  }
 0x33d   : > { %v2453_v21 = vpop.f32.mrf.mxu1  ;;  %5658 = vmatpush3.bf16.msra.mxu0 %v5933_v59 }
 0x33e   : > { %v2544_v9 = vadd.f32 %v2453_v21, %v7908_v51  ;;  %v2772_v34 = vpop.f32.mrf.mxu0  ;;  %5659 = vmatprep.subr.bf16.mxu0 %v7250_v41 }
 0x33f   : > { %v5278_v54 = vpop.f32.mrf.mxu1 }
 0x340   : > { %v7406_v32 = vadd.f32 %v2772_v34, %v2544_v9  ;;  %v5362_v33 = vpop.f32.mrf.mxu0  ;;  %v3520_v9 = vld [vmem:[#allocation2 + $0x2a] sm:$0xff] }
 0x341   : > { %v2458_v3 = vpop.f32.mrf.mxu1  ;;  %5476 = vmatmul.mubr.bf16.gmra.mxu1 %v7205_v5  ;;  %v2932_v5 = vpack.c.bf16 %v7250_v41, %v7250_v41  ;;  %v3554_v34 = vpack.c.bf16 %v3521_v30, %v3520_v9  ;;  %v5934_v30 = vld [vmem:[#allocation8 + $0x18] sm:$0xff]  }
 0x342   : > { %v2545_v36 = vadd.f32 %v2458_v3, %v7202_v4  ;;  %v2777_v60 = vpop.f32.mrf.mxu0  ;;  %5560 = vmatmul.mubr.bf16.gmra.mxu0 %v7209_v6  ;;  %5479 = vmatprep.mubr.msk.bf16.mxu1 %vm6130_vm0, %v7250_v41  ;;  %v3251_v6 = vpack.c.bf16 %v3234_v12, %v3233_v35  ;;  %v3523_v12 = vld [vmem:[#allocation2 + $0x42] sm:$0xff] }
 0x343   : > { %v5281_v25 = vpop.f32.mrf.mxu1  ;;  %5563 = vmatprep.mubr.msk.bf16.mxu0 %vm6130_vm0, %v7250_v41  ;;  %5660 = vmatpush3.bf16.msra.mxu0 %v5934_v30 }
 0x344   : > { %v7415_v45 = vadd.f32 %v2777_v60, %v2545_v36  ;;  %v5365_v26 = vpop.f32.mrf.mxu0  ;;  %5661 = vmatprep.subr.bf16.mxu0 %v7250_v41 }
 0x345   : > { %v2461_v53 = vpop.f32.mrf.mxu1 }
 0x346   : > { %v2546_v4 = vadd.f32 %v2461_v53, %v7207_v18  ;;  %v2780_v49 = vpop.f32.mrf.mxu0 }
 0x347   : > { %v5282_v42 = vpop.f32.mrf.mxu1 }
 0x348   : > { %v7420_v28 = vadd.f32 %v2780_v49, %v2546_v4  ;;  %v5366_v40 = vpop.f32.mrf.mxu0  ;;  %v3522_v4 = vld [vmem:[#allocation2 + $0x3a] sm:$0xff] }
 0x349   : > { %v2466_v2 = vpop.f32.mrf.mxu1  ;;  %5480 = vmatmul.mubr.bf16.gmra.mxu1 %v2932_v5 }
 0x34a   : > { %v2547_v55 = vadd.f32 %v2466_v2, %v7218_v47  ;;  %v2785_v7 = vpop.f32.mrf.mxu0  ;;  %5564 = vmatmul.mubr.bf16.gmra.mxu0 %v3251_v6  ;;  %5583 = vmatprep.mubr.msk.bf16.mxu1 %vm6130_vm0, %v7250_v41  ;;  %v3555_v6 = vpack.c.bf16 %v3523_v12, %v3522_v4 }
 0x34b   : > { %v5285_v37 = vpop.f32.mrf.mxu1  ;;  %5667 = vmatprep.mubr.msk.bf16.mxu0 %vm6130_vm0, %v7250_v41 }
 0x34c   : > { %v7427_v18 = vadd.f32 %v2785_v7, %v2547_v55  ;;  %v5369_v29 = vpop.f32.mrf.mxu0 }
 0x34d   : > { %v2469_v14 = vpop.f32.mrf.mxu1 }
 0x34e   : > { %v2548_v21 = vadd.f32 %v2469_v14, %v7221_v8  ;;  %v2788_v51 = vpop.f32.mrf.mxu0 }
 0x34f   : > { %v5286_v47 = vpop.f32.mrf.mxu1 }
 0x350   : > { %v7431_v54 = vadd.f32 %v2788_v51, %v2548_v21  ;;  %v5370_v33 = vpop.f32.mrf.mxu0  ;;  %v3524_v51 = vld [vmem:[#allocation2 + $0x4a] sm:$0xff] }
 0x351   : > { %v2474_v3 = vpop.f32.mrf.mxu1  ;;  %5584 = vmatmul.mubr.bf16.vlgmr.msra.gmra.mxu1 %v3554_v34 }
 0x352   : > { %v2549_v36 = vadd.f32 %v2474_v3, %v7230_v63  ;;  %v2793_v60 = vpop.f32.mrf.mxu0  ;;  %5587 = vmatprep.mubr.msk.bf16.mxu1 %vm6130_vm0, %v7250_v41 }
 0x353   : > { %v5289_v25 = vpop.f32.mrf.mxu1 }
 0x354   : > { %v7436_v8 = vadd.f32 %v2793_v60, %v2549_v36  ;;  %v5373_v35 = vpop.f32.mrf.mxu0 }
 0x355   : > { %v2477_v26 = vpop.f32.mrf.mxu1  ;;  %v3527_v35 = vld [vmem:[#allocation2 + $0x62] sm:$0xff] }
 0x356   : > { %v2550_v53 = vadd.f32 %v2477_v26, %v7235_v61  ;;  %v2796_v5 = vpop.f32.mrf.mxu0  ;;  %v3525_v61 = vld [vmem:[#allocation2 + $0x52] sm:$0xff] }
 0x357   : > { %v5290_v49 = vpop.f32.mrf.mxu1  ;;  %v3556_v47 = vpack.c.bf16 %v3525_v61, %v3524_v51  ;;  %v5935_v61 = vld [vmem:[#allocation8 + $0x10] sm:$0xff]  }
 0x358   : > { %v7439_v42 = vadd.f32 %v2796_v5, %v2550_v53  ;;  %v5374_v40 = vpop.f32.mrf.mxu0  ;;  %v3526_v5 = vld [vmem:[#allocation2 + $0x5a] sm:$0xff]  ;;  %5662 = vmatpush3.bf16.msra.mxu0 %v5935_v61 }
 0x359   : > { %v2482_v63 = vpop.f32.mrf.mxu1  ;;  %5588 = vmatmul.mubr.bf16.gmra.mxu1 %v3555_v6  ;;  %v3557_v49 = vpack.c.bf16 %v3527_v35, %v3526_v5  ;;  %5663 = vmatprep.subr.bf16.mxu0 %v7250_v41 }
 0x35a   : > { %v2551_v2 = vadd.f32 %v2482_v63, %v7244_v43  ;;  %v2801_v55 = vpop.f32.mrf.mxu0  ;;  %5591 = vmatprep.mubr.msk.bf16.mxu1 %vm6130_vm0, %v7250_v41 }
 0x35b   : > { %v5293_v7 = vpop.f32.mrf.mxu1 }
 0x35c   : > { %v7444_v37 = vadd.f32 %v2801_v55, %v2551_v2  ;;  %v5377_v29 = vpop.f32.mrf.mxu0 }
 0x35d   : > { %v2485_v59 = vpop.f32.mrf.mxu1 }
 0x35e   : > { %v2552_v14 = vadd.f32 %v2485_v59, %v7248_v62  ;;  %v2804_v21 = vpop.f32.mrf.mxu0 }
 0x35f   : > { %v5294_v9 = vpop.f32.mrf.mxu1 }
 0x360   : > { %v7448_v43 = vadd.f32 %v2804_v21, %v2552_v14  ;;  %v5378_v34 = vpop.f32.mrf.mxu0  ;;  %v3528_v21 = vld [vmem:[#allocation2 + $0x6a] sm:$0xff] }
 0x361   : > { %v2490_v33 = vpop.f32.mrf.mxu1  ;;  %5592 = vmatmul.mubr.bf16.gmra.mxu1 %v3556_v47 }
 0x362   : > { %v2553_v3 = vadd.f32 %v2490_v33, %v7260_v46  ;;  %v2809_v36 = vpop.f32.mrf.mxu0  ;;  %5595 = vmatprep.mubr.msk.bf16.mxu1 %vm6130_vm0, %v7250_v41 }
 0x363   : > { %v5297_v60 = vpop.f32.mrf.mxu1 }
 0x364   : > { %v7453_v62 = vadd.f32 %v2809_v36, %v2553_v3  ;;  %v5381_v25 = vpop.f32.mrf.mxu0 }
 0x365   : > { %v2493_v12 = vpop.f32.mrf.mxu1  ;;  %v3531_v25 = vld [vmem:[#allocation2 + $0x82] sm:$0xff] }
 0x366   : > { %v2554_v26 = vadd.f32 %v2493_v12, %v7264_v16  ;;  %v2812_v53 = vpop.f32.mrf.mxu0  ;;  %v3529_v16 = vld [vmem:[#allocation2 + $0x72] sm:$0xff] }
 0x367   : > { %v5298_v4 = vpop.f32.mrf.mxu1  ;;  %v3558_v9 = vpack.c.bf16 %v3529_v16, %v3528_v21  ;;  %v5936_v16 = vld [vmem:[#allocation8 + $0x8] sm:$0xff]  }
 0x368   : > { %v7456_v6 = vadd.f32 %v2812_v53, %v2554_v26  ;;  %v5382_v40 = vpop.f32.mrf.mxu0  ;;  %v3530_v53 = vld [vmem:[#allocation2 + $0x7a] sm:$0xff]  ;;  %5664 = vmatpush3.bf16.msra.mxu0 %v5936_v16 }
 0x369   : > { %v2498_v46 = vpop.f32.mrf.mxu1  ;;  %5596 = vmatmul.mubr.bf16.gmra.mxu1 %v3557_v49  ;;  %v3559_v4 = vpack.c.bf16 %v3531_v25, %v3530_v53  ;;  %5665 = vmatprep.subr.bf16.mxu0 %v7250_v41  ;;  %v3535_v25 = vld [vmem:[#allocation2 + $0xa2] sm:$0xff] }
 0x36a   : > { %v2555_v63 = vadd.f32 %v2498_v46, %v7274_v19  ;;  %v2817_v2 = vpop.f32.mrf.mxu0  ;;  %5599 = vmatprep.mubr.msk.bf16.mxu1 %vm6130_vm0, %v7250_v41 }
 0x36b   : > { %v5301_v55 = vpop.f32.mrf.mxu1 }
 0x36c   : > { %v7461_v7 = vadd.f32 %v2817_v2, %v2555_v63  ;;  %v5385_v29 = vpop.f32.mrf.mxu0 }
 0x36d   : > { %v2501_v30 = vpop.f32.mrf.mxu1 }
 0x36e   : > { %v2556_v59 = vadd.f32 %v2501_v30, %v7278_v52  ;;  %v2820_v14 = vpop.f32.mrf.mxu0 }
 0x36f   : > { %v5302_v51 = vpop.f32.mrf.mxu1 }
 0x370   : > { %v7465_v19 = vadd.f32 %v2820_v14, %v2556_v59  ;;  %v5386_v47 = vpop.f32.mrf.mxu0  ;;  %v3532_v14 = vld [vmem:[#allocation2 + $0x8a] sm:$0xff] }
 0x371   : > { %v2506_v34 = vpop.f32.mrf.mxu1  ;;  %5600 = vmatmul.mubr.bf16.gmra.mxu1 %v3558_v9 }
 0x372   : > { %v2557_v33 = vadd.f32 %v2506_v34, %v7287_v39  ;;  %v2825_v3 = vpop.f32.mrf.mxu0  ;;  %5603 = vmatprep.mubr.msk.bf16.mxu1 %vm6130_vm0, %v7250_v41 }
 0x373   : > { %v5305_v36 = vpop.f32.mrf.mxu1 }
 0x374   : > { %v7470_v52 = vadd.f32 %v2825_v3, %v2557_v33  ;;  %v5389_v60 = vpop.f32.mrf.mxu0 }
 0x375   : > { %v2509_v35 = vpop.f32.mrf.mxu1  ;;  %v3534_v60 = vld [vmem:[#allocation2 + $0x9a] sm:$0xff] }
 0x376   : > { %v2558_v12 = vadd.f32 %v2509_v35, %v7290_v11  ;;  %v2828_v26 = vpop.f32.mrf.mxu0  ;;  %v3533_v11 = vld [vmem:[#allocation2 + $0x92] sm:$0xff] }
 0x377   : > { %v5306_v5 = vpop.f32.mrf.mxu1  ;;  %v3560_v51 = vpack.c.bf16 %v3533_v11, %v3532_v14  ;;  %v3537_v11 = vld [vmem:[#allocation2 + $0xb2] sm:$0xff] }
 0x378   : > { %v7473_v49 = vadd.f32 %v2828_v26, %v2558_v12  ;;  %v5390_v40 = vpop.f32.mrf.mxu0  ;;  %v3561_v5 = vpack.c.bf16 %v3535_v25, %v3534_v60 }
 0x379   : > { %v2514_v39 = vpop.f32.mrf.mxu1  ;;  %5604 = vmatmul.mubr.bf16.gmra.mxu1 %v3559_v4 }
 0x37a   : > { %v2559_v46 = vadd.f32 %v2514_v39, %v7299_v13  ;;  %v2833_v63 = vpop.f32.mrf.mxu0  ;;  %5607 = vmatprep.mubr.msk.bf16.mxu1 %vm6130_vm0, %v7250_v41 }
 0x37b   : > { %v5309_v2 = vpop.f32.mrf.mxu1 }
 0x37c   : > { %v7478_v55 = vadd.f32 %v2833_v63, %v2559_v46  ;;  %v5393_v29 = vpop.f32.mrf.mxu0 }
 0x37d   : > { %v2517_v61 = vpop.f32.mrf.mxu1 }
 0x37e   : > { %v2560_v30 = vadd.f32 %v2517_v61, %v7302_v0  ;;  %v2836_v59 = vpop.f32.mrf.mxu0 }
 0x37f   : > { %v5310_v21 = vpop.f32.mrf.mxu1 }
 0x380   : > { %v7482_v13 = vadd.f32 %v2836_v59, %v2560_v30  ;;  %v5394_v9 = vpop.f32.mrf.mxu0  ;;  %v3536_v30 = vld [vmem:[#allocation2 + $0xaa] sm:$0xff]  ;;  %v5937_v59 = vld [vmem:[#allocation8] sm:$0xff]  }
 0x381   : > { %v2522_v47 = vpop.f32.mrf.mxu1  ;;  %5608 = vmatmul.mubr.bf16.gmra.mxu1 %v3560_v51  ;;  %v3562_v21 = vpack.c.bf16 %v3537_v11, %v3536_v30  ;;  %5666 = vmatpush3.bf16.msra.mxu0 %v5937_v59 }
 0x382   : > { %v2561_v34 = vadd.f32 %v2522_v47, %v7311_v22  ;;  %v2841_v33 = vpop.f32.mrf.mxu0  ;;  %5611 = vmatprep.mubr.msk.bf16.mxu1 %vm6130_vm0, %v7250_v41 }
 0x383   : > { %v5313_v3 = vpop.f32.mrf.mxu1 }
 0x384   : > { %v7487_v0 = vadd.f32 %v2841_v33, %v2561_v34  ;;  %v5397_v36 = vpop.f32.mrf.mxu0 }
 0x385   : > { %v2525_v35 = vpop.f32.mrf.mxu1  ;;  %v3539_v36 = vld [vmem:[#allocation2 + $0xc2] sm:$0xff] }
 0x386   : > { %v2562_v12 = vadd.f32 %v2525_v35, %v7314_v48  ;;  %v2844_v26 = vpop.f32.mrf.mxu0 }
 0x387   : > { %v5314_v53 = vpop.f32.mrf.mxu1 }
 0x388   : > { %v7490_v4 = vadd.f32 %v2844_v26, %v2562_v12  ;;  %v5398_v40 = vpop.f32.mrf.mxu0  ;;  %v3538_v12 = vld [vmem:[#allocation2 + $0xba] sm:$0xff] }
 0x389   : > { %v3032_v22 = vpop.f32.mrf.mxu1  ;;  %5612 = vmatmul.mubr.bf16.gmra.mxu1 %v3561_v5  ;;  %v3563_v53 = vpack.c.bf16 %v3539_v36, %v3538_v12 }
 0x38a   : > { %v3167_v39 = vadd.f32 %v3032_v22, %v7323_v24  ;;  %v3351_v46 = vpop.f32.mrf.mxu0  ;;  %5615 = vmatprep.mubr.msk.bf16.mxu1 %vm6130_vm0, %v7250_v41 }
 0x38b   : > { %v5417_v63 = vpop.f32.mrf.mxu1 }
 0x38c   : > { %v7495_v2 = vadd.f32 %v3351_v46, %v3167_v39  ;;  %v5501_v29 = vpop.f32.mrf.mxu0 }
 0x38d   : > { %v3035_v48 = vpop.f32.mrf.mxu1 }
 0x38e   : > { %v3168_v16 = vadd.f32 %v3035_v48, %v7326_v23  ;;  %v3354_v61 = vpop.f32.mrf.mxu0 }
 0x38f   : > { %v5418_v14 = vpop.f32.mrf.mxu1 }
 0x390   : > { %v7498_v51 = vadd.f32 %v3354_v61, %v3168_v16  ;;  %v5502_v24 = vpop.f32.mrf.mxu0  ;;  %v3540_v61 = vld [vmem:[#allocation2 + $0xca] sm:$0xff] }
 0x391   : > { %v3040_v9 = vpop.f32.mrf.mxu1  ;;  %5616 = vmatmul.mubr.bf16.gmra.mxu1 %v3562_v21 }
 0x392   : > { %v3169_v47 = vadd.f32 %v3040_v9, %v7334_v57  ;;  %v3359_v34 = vpop.f32.mrf.mxu0  ;;  %5619 = vmatprep.mubr.msk.bf16.mxu1 %vm6130_vm0, %v7250_v41 }
 0x393   : > { %v5421_v33 = vpop.f32.mrf.mxu1 }
 0x394   : > { %v7503_v3 = vadd.f32 %v3359_v34, %v3169_v47  ;;  %v5505_v23 = vpop.f32.mrf.mxu0 }
 0x395   : > { %v3043_v60 = vpop.f32.mrf.mxu1 }
 0x396   : > { %v3170_v25 = vadd.f32 %v3043_v60, %v7337_v27  ;;  %v3362_v35 = vpop.f32.mrf.mxu0  ;;  %v3541_v27 = vld [vmem:[#allocation2 + $0xd2] sm:$0xff] }
 0x397   : > { %v5422_v26 = vpop.f32.mrf.mxu1  ;;  %v3564_v59 = vpack.c.bf16 %v3541_v27, %v3540_v61 }
 0x398   : > { %v7506_v5 = vadd.f32 %v3362_v35, %v3170_v25  ;;  %v5506_v40 = vpop.f32.mrf.mxu0  ;;  %v3542_v25 = vld [vmem:[#allocation2 + $0xda] sm:$0xff] }
 0x399   : > { %v3048_v57 = vpop.f32.mrf.mxu1  ;;  %5620 = vmatmul.mubr.bf16.gmra.mxu1 %v3563_v53 }
 0x39a   : > { %v3171_v22 = vadd.f32 %v3048_v57, %v7345_v15  ;;  %v3367_v39 = vpop.f32.mrf.mxu0  ;;  %5623 = vmatprep.mubr.msk.bf16.mxu1 %vm6130_vm0, %v7250_v41 }
 0x39b   : > { %v5425_v46 = vpop.f32.mrf.mxu1 }
 0x39c   : > { %v7511_v63 = vadd.f32 %v3367_v39, %v3171_v22  ;;  %v5509_v29 = vpop.f32.mrf.mxu0 }
 0x39d   : > { %v3051_v11 = vpop.f32.mrf.mxu1 }
 0x39e   : > { %v3172_v48 = vadd.f32 %v3051_v11, %v7348_v1  ;;  %v3370_v16 = vpop.f32.mrf.mxu0  ;;  %v3543_v1 = vld [vmem:[#allocation2 + $0xe2] sm:$0xff] }
 0x39f   : > { %v5426_v30 = vpop.f32.mrf.mxu1  ;;  %v3565_v12 = vpack.c.bf16 %v3543_v1, %v3542_v25 }
 0x3a0   : > { %v7514_v14 = vadd.f32 %v3370_v16, %v3172_v48  ;;  %v5510_v21 = vpop.f32.mrf.mxu0  ;;  %v3544_v48 = vld [vmem:[#allocation2 + $0xea] sm:$0xff] }
 0x3a1   : > { %v3056_v15 = vpop.f32.mrf.mxu1  ;;  %5624 = vmatmul.mubr.bf16.gmra.mxu1 %v3564_v59 }
 0x3a2   : > { %v3173_v24 = vadd.f32 %v3056_v15, %v7356_v56  ;;  %v3375_v9 = vpop.f32.mrf.mxu0  ;;  %5627 = vmatprep.mubr.msk.bf16.mxu1 %vm6130_vm0, %v7250_v41 }
 0x3a3   : > { %v5429_v47 = vpop.f32.mrf.mxu1 }
 0x3a4   : > { %v7519_v34 = vadd.f32 %v3375_v9, %v3173_v24  ;;  %v5513_v33 = vpop.f32.mrf.mxu0 }
 0x3a5   : > { %v3059_v23 = vpop.f32.mrf.mxu1 }
 0x3a6   : > { %v3174_v36 = vadd.f32 %v3059_v23, %v7360_v10  ;;  %v3378_v60 = vpop.f32.mrf.mxu0  ;;  %v3545_v10 = vld [vmem:[#allocation2 + $0xf2] sm:$0xff] }
 0x3a7   : > { %v5430_v35 = vpop.f32.mrf.mxu1  ;;  %v3566_v61 = vpack.c.bf16 %v3545_v10, %v3544_v48 }
 0x3a8   : > { %v7522_v26 = vadd.f32 %v3378_v60, %v3174_v36  ;;  %v5514_v53 = vpop.f32.mrf.mxu0  ;;  %v3546_v36 = vld [vmem:[#allocation2 + $0xfa] sm:$0xff] }
 0x3a9   : > { %v3064_v56 = vpop.f32.mrf.mxu1  ;;  %5628 = vmatmul.mubr.bf16.gmra.mxu1 %v3565_v12 }
 0x3aa   : > { %v3175_v40 = vadd.f32 %v3064_v56, %v7368_v17  ;;  %v3383_v57 = vpop.f32.mrf.mxu0  ;;  %5631 = vmatprep.mubr.msk.bf16.mxu1 %vm6130_vm0, %v7250_v41  ;;  %v7541_v56 = vld [vmem:[#allocation2] sm:$0xff] }
 0x3ab   : > { %v5433_v22 = vpop.f32.mrf.mxu1 }
 0x3ac   : > { %v7527_v39 = vadd.f32 %v3383_v57, %v3175_v40  ;;  %v5517_v46 = vpop.f32.mrf.mxu0  ;;  %v3549_v22 = vld [vmem:[#allocation2 + $0x112] sm:$0xff] }
 0x3ad   : > { %v3067_v29 = vpop.f32.mrf.mxu1 }
 0x3ae   : > { %v3176_v27 = vadd.f32 %v3067_v29, %v7371_v20  ;;  %v3386_v11 = vpop.f32.mrf.mxu0  ;;  %v3547_v20 = vld [vmem:[#allocation2 + $0x102] sm:$0xff] }
 0x3af   : > { %v5434_v16 = vpop.f32.mrf.mxu1  ;;  %v3567_v25 = vpack.c.bf16 %v3547_v20, %v3546_v36 }
 0x3b0   : > { %v7530_v30 = vadd.f32 %v3386_v11, %v3176_v27  ;;  %v5518_v59 = vpop.f32.mrf.mxu0  ;;  %v3548_v27 = vld [vmem:[#allocation2 + $0x10a] sm:$0xff] }
 0x3b1   : > { %v3072_v17 = vpop.f32.mrf.mxu1  ;;  %5632 = vmatmul.mubr.bf16.gmra.mxu1 %v3566_v61  ;;  %v3568_v48 = vpack.c.bf16 %v3549_v22, %v3548_v27 }
 0x3b2   : > { %v3177_v21 = vadd.f32 %v3072_v17, %v7379_v44  ;;  %v3391_v15 = vpop.f32.mrf.mxu0  ;;  %5635 = vmatprep.mubr.msk.bf16.mxu1 %vm6130_vm0, %v7250_v41 }
 0x3b3   : > { %v5437_v24 = vpop.f32.mrf.mxu1 }
 0x3b4   : > { %v7535_v9 = vadd.f32 %v3391_v15, %v3177_v21  ;;  %v5521_v47 = vpop.f32.mrf.mxu0 }
 0x3b5   : > { %v3075_v33 = vpop.f32.mrf.mxu1  ;;  %v3551_v47 = vld [vmem:[#allocation2 + $0x122] sm:$0xff] }
 0x3b6   : > { %v3178_v1 = vadd.f32 %v3075_v33, %v7383_v50  ;;  %v3394_v23 = vpop.f32.mrf.mxu0 }
 0x3b7   : > { %v5438_v60 = vpop.f32.mrf.mxu1 }
 0x3b8   : > { %v7538_v35 = vadd.f32 %v3394_v23, %v3178_v1  ;;  %v5522_v12 = vpop.f32.mrf.mxu0 }
 0x3b9   : > { %v3080_v44 = vpop.f32.mrf.mxu1  ;;  %5636 = vmatmul.mubr.bf16.gmra.mxu1 %v3567_v25 }
 0x3ba   : > { %v3179_v53 = vadd.f32 %v3080_v44, %v7391_v38  ;;  %v3399_v41 = vpop.f32.mrf.mxu0  ;;  %5639 = vmatprep.mubr.msk.bf16.mxu1 %vm6130_vm0, %v7541_v56 }
 0x3bb   : > { %v5441_v40 = vpop.f32.mrf.mxu1 }
 0x3bc   : > { %v7545_v57 = vadd.f32 %v3399_v41, %v3179_v53  ;;  %v5525_v50 = vpop.f32.mrf.mxu0  ;;  %v3552_v53 = vld [vmem:[#allocation2 + $0x12a] sm:$0xff]  ;;  %v3553_v41 = vld [vmem:[#allocation2 + $0x132] sm:$0xff] }
 0x3bd   : > { %v3083_v46 = vpop.f32.mrf.mxu1 }
 0x3be   : > { %v3180_v10 = vadd.f32 %v3083_v46, %v7394_v58  ;;  %v3402_v29 = vpop.f32.mrf.mxu0  ;;  %v3550_v58 = vld [vmem:[#allocation2 + $0x11a] sm:$0xff]  ;;  %v3570_v46 = vpack.c.bf16 %v3553_v41, %v3552_v53 }
 0x3bf   : > { %v5442_v11 = vpop.f32.mrf.mxu1  ;;  %v3569_v36 = vpack.c.bf16 %v3551_v47, %v3550_v58 }
 0x3c0   : > { %v7548_v16 = vadd.f32 %v3402_v29, %v3180_v10  ;;  %v5526_v38 = vpop.f32.mrf.mxu0 }
 0x3c1   : > { %v3088_v61 = vpop.f32.mrf.mxu1  ;;  %5640 = vmatmul.mubr.bf16.gmra.mxu1 %v3568_v48 }
 0x3c2   : > { %v3181_v59 = vadd.f32 %v3088_v61, %v7402_v31  ;;  %v3407_v17 = vpop.f32.mrf.mxu0  ;;  %5643 = vmatprep.mubr.msk.bf16.mxu1 %vm6130_vm0, %v7541_v56 }
 0x3c3   : > { %v5445_v21 = vpop.f32.mrf.mxu1 }
 0x3c4   : > { %v7553_v15 = vadd.f32 %v3407_v17, %v3181_v59  ;;  %v5529_v24 = vpop.f32.mrf.mxu0 }
 0x3c5   : > { %v3091_v20 = vpop.f32.mrf.mxu1 }
 0x3c6   : > { %v3182_v33 = vadd.f32 %v3091_v20, %v7406_v32  ;;  %v3410_v1 = vpop.f32.mrf.mxu0 }
 0x3c7   : > { %v5446_v23 = vpop.f32.mrf.mxu1 }
 0x3c8   : > { %v7556_v60 = vadd.f32 %v3410_v1, %v3182_v33  ;;  %v5530_v25 = vpop.f32.mrf.mxu0 }
 0x3c9   : > { %v3096_v31 = vpop.f32.mrf.mxu1  ;;  %5644 = vmatmul.mubr.bf16.gmra.mxu1 %v3569_v36 }
 0x3ca   : > { %v3183_v12 = vadd.f32 %v3096_v31, %v7415_v45  ;;  %v3415_v44 = vpop.f32.mrf.mxu0  ;;  %5647 = vmatprep.mubr.msk.bf16.mxu1 %vm6130_vm0, %v7541_v56 }
 0x3cb   : > { %v5449_v40 = vpop.f32.mrf.mxu1 }
 0x3cc   : > { %v7561_v50 = vadd.f32 %v3415_v44, %v3183_v12  ;;  %v5533_v32 = vpop.f32.mrf.mxu0 }
 0x3cd   : > { %v3099_v22 = vpop.f32.mrf.mxu1 }
 0x3ce   : > { %v3184_v10 = vadd.f32 %v3099_v22, %v7420_v28  ;;  %v3418_v29 = vpop.f32.mrf.mxu0 }
 0x3cf   : > { %v5450_v27 = vpop.f32.mrf.mxu1 }
 0x3d0   : > { %v7564_v11 = vadd.f32 %v3418_v29, %v3184_v10  ;;  %v5534_v48 = vpop.f32.mrf.mxu0 }
 0x3d1   : > { %v3104_v45 = vpop.f32.mrf.mxu1  ;;  %5648 = vmatmul.mubr.bf16.gmra.mxu1 %v3570_v46 }
 0x3d2   : > { %v3185_v38 = vadd.f32 %v3104_v45, %v7427_v18  ;;  %v3423_v61 = vpop.f32.mrf.mxu0 }
 0x3d3   : > { %v5453_v59 = vpop.f32.mrf.mxu1 }
 0x3d4   : > { %v7567_v17 = vadd.f32 %v3423_v61, %v3185_v38  ;;  %v5537_v21 = vpop.f32.mrf.mxu0 }
 0x3d5   : > { %v3107_v24 = vpop.f32.mrf.mxu1 }
 0x3d6   : > { %v3186_v58 = vadd.f32 %v3107_v24, %v7431_v54  ;;  %v3426_v47 = vpop.f32.mrf.mxu0 }
 0x3d7   : > { %v5454_v20 = vpop.f32.mrf.mxu1 }
 0x3d8   : > { %v7570_v28 = vadd.f32 %v3426_v47, %v3186_v58  ;;  %v5538_v33 = vpop.f32.mrf.mxu0 }
 0x3d9   : > { %v3112_v1 = vpop.f32.mrf.mxu1 }
 0x3da   : > { %v3187_v23 = vadd.f32 %v3112_v1, %v7436_v8  ;;  %v3431_v36 = vpop.f32.mrf.mxu0 }
 0x3db   : > { %v5457_v25 = vpop.f32.mrf.mxu1 }
 0x3dc   : > { %v7573_v31 = vadd.f32 %v3431_v36, %v3187_v23  ;;  %v5541_v18 = vpop.f32.mrf.mxu0 }
 0x3dd   : > { %v3115_v12 = vpop.f32.mrf.mxu1 }
 0x3de   : > { %v3188_v44 = vadd.f32 %v3115_v12, %v7439_v42  ;;  %v3434_v53 = vpop.f32.mrf.mxu0 }
 0x3df   : > { %v5458_v41 = vpop.f32.mrf.mxu1 }
 0x3e0   : > { %v7576_v40 = vadd.f32 %v3434_v53, %v3188_v44  ;;  %v5542_v54 = vpop.f32.mrf.mxu0 }
 0x3e1   : > { %v3120_v32 = vpop.f32.mrf.mxu1 }
 0x3e2   : > { %v3189_v22 = vadd.f32 %v3120_v32, %v7444_v37  ;;  %v3439_v46 = vpop.f32.mrf.mxu0 }
 0x3e3   : > { %v5461_v10 = vpop.f32.mrf.mxu1 }
 0x3e4   : > { %v7579_v29 = vadd.f32 %v3439_v46, %v3189_v22  ;;  %v5545_v8 = vpop.f32.mrf.mxu0 }
 0x3e5   : > { %v3123_v27 = vpop.f32.mrf.mxu1 }
 0x3e6   : > { %v3190_v48 = vadd.f32 %v3123_v27, %v7448_v43  ;;  %v3442_v45 = vpop.f32.mrf.mxu0 }
 0x3e7   : > { %v5462_v38 = vpop.f32.mrf.mxu1 }
 0x3e8   : > { %v7582_v61 = vadd.f32 %v3442_v45, %v3190_v48  ;;  %v5546_v42 = vpop.f32.mrf.mxu0 }
 0x3e9   : > { %v3128_v59 = vpop.f32.mrf.mxu1 }
 0x3ea   : > { %v3191_v21 = vadd.f32 %v3128_v59, %v7453_v62  ;;  %v3447_v24 = vpop.f32.mrf.mxu0 }
 0x3eb   : > { %v5465_v58 = vpop.f32.mrf.mxu1 }
 0x3ec   : > { %v7585_v47 = vadd.f32 %v3447_v24, %v3191_v21  ;;  %v5549_v37 = vpop.f32.mrf.mxu0 }
 0x3ed   : > { %v3131_v20 = vpop.f32.mrf.mxu1 }
 0x3ee   : > { %v3192_v33 = vadd.f32 %v3131_v20, %v7456_v6  ;;  %v3450_v1 = vpop.f32.mrf.mxu0 }
 0x3ef   : > { %v5466_v23 = vpop.f32.mrf.mxu1 }
 0x3f0   : > { %v7588_v36 = vadd.f32 %v3450_v1, %v3192_v33  ;;  %v5550_v43 = vpop.f32.mrf.mxu0 }
 0x3f1   : > { %v3136_v25 = vpop.f32.mrf.mxu1 }
 0x3f2   : > { %v3193_v18 = vadd.f32 %v3136_v25, %v7461_v7  ;;  %v3455_v12 = vpop.f32.mrf.mxu0 }
 0x3f3   : > { %v5469_v44 = vpop.f32.mrf.mxu1 }
 0x3f4   : > { %v7591_v53 = vadd.f32 %v3455_v12, %v3193_v18  ;;  %v5553_v62 = vpop.f32.mrf.mxu0 }
 0x3f5   : > { %v3139_v41 = vpop.f32.mrf.mxu1 }
 0x3f6   : > { %v3194_v54 = vadd.f32 %v3139_v41, %v7465_v19  ;;  %v3458_v32 = vpop.f32.mrf.mxu0 }
 0x3f7   : > { %v5470_v22 = vpop.f32.mrf.mxu1 }
 0x3f8   : > { %v7594_v46 = vadd.f32 %v3458_v32, %v3194_v54  ;;  %v5554_v6 = vpop.f32.mrf.mxu0 }
 0x3f9   : > { %v3144_v10 = vpop.f32.mrf.mxu1 }
 0x3fa   : > { %v3195_v8 = vadd.f32 %v3144_v10, %v7470_v52  ;;  %v3463_v27 = vpop.f32.mrf.mxu0 }
 0x3fb   : > { %v5473_v48 = vpop.f32.mrf.mxu1 }
 0x3fc   : > { %v7597_v45 = vadd.f32 %v3463_v27, %v3195_v8  ;;  %v5557_v7 = vpop.f32.mrf.mxu0 }
 0x3fd   : > { %v3147_v38 = vpop.f32.mrf.mxu1 }
 0x3fe   : > { %v3196_v42 = vadd.f32 %v3147_v38, %v7473_v49  ;;  %v3466_v59 = vpop.f32.mrf.mxu0 }
 0x3ff   : > { %v5474_v21 = vpop.f32.mrf.mxu1 }
 0x400   : > { %v7600_v24 = vadd.f32 %v3466_v59, %v3196_v42  ;;  %v5558_v19 = vpop.f32.mrf.mxu0 }
 0x401   : > { %v3152_v58 = vpop.f32.mrf.mxu1 }
 0x402   : > { %v3197_v37 = vadd.f32 %v3152_v58, %v7478_v55  ;;  %v3471_v20 = vpop.f32.mrf.mxu0 }
 0x403   : > { %v5477_v33 = vpop.f32.mrf.mxu1 }
 0x404   : > { %v7603_v1 = vadd.f32 %v3471_v20, %v3197_v37  ;;  %v5561_v52 = vpop.f32.mrf.mxu0 }
 0x405   : > { %v3155_v23 = vpop.f32.mrf.mxu1 }
 0x406   : > { %v3198_v43 = vadd.f32 %v3155_v23, %v7482_v13  ;;  %v3474_v25 = vpop.f32.mrf.mxu0 }
 0x407   : > { %v5478_v18 = vpop.f32.mrf.mxu1 }
 0x408   : > { %v7606_v12 = vadd.f32 %v3474_v25, %v3198_v43  ;;  %v5562_v49 = vpop.f32.mrf.mxu0 }
 0x409   : > { %v3160_v44 = vpop.f32.mrf.mxu1 }
 0x40a   : > { %v3199_v62 = vadd.f32 %v3160_v44, %v7487_v0  ;;  %v3479_v41 = vpop.f32.mrf.mxu0  ;;  %v7618_v0 = vld [vmem:[%s7870_s5] ss:$0 sm:$0xff] }
 0x40b   : > { %v5481_v54 = vpop.f32.mrf.mxu1 }
 0x40c   : > { %v7609_v32 = vadd.f32 %v3479_v41, %v3199_v62  ;;  %v5565_v55 = vpop.f32.mrf.mxu0 }
 0x40d   : > { %v3163_v22 = vpop.f32.mrf.mxu1 }
 0x40e   : > { %v3200_v6 = vadd.f32 %v3163_v22, %v7490_v4  ;;  %v3482_v10 = vpop.f32.mrf.mxu0 }
 0x40f   : > { %v5482_v8 = vpop.f32.mrf.mxu1 }
 0x410   : > { %v7612_v27 = vadd.f32 %v3482_v10, %v3200_v6  ;;  %v5566_v13 = vpop.f32.mrf.mxu0 }
 0x411   : > { %v3670_v48 = vpop.f32.mrf.mxu1 }
 0x412   : > { %v3805_v7 = vadd.f32 %v3670_v48, %v7495_v2 }
 0x413   : > { %v5585_v38 = vpop.f32.mrf.mxu1 }
 0x414   : > { %v3846_v59 = vadd.f32 %v7618_v0, %v3805_v7 }
 0x415   : > { %v3673_v42 = vpop.f32.mrf.mxu1 }
 0x416   : > { %v3806_v21 = vadd.f32 %v3673_v42, %v7498_v51  ;;  %v3880_v37 = vmax.f32 %v3846_v59, 0.0 }
 0x417   : > { %v5586_v4 = vpop.f32.mrf.mxu1 }
 0x418   : > { %v3847_v19 = vadd.f32 %v7618_v0, %v3806_v21 }
 0x419   : > { %v3678_v58 = vpop.f32.mrf.mxu1 }
 0x41a   : > { %v3881_v20 = vmax.f32 %v3847_v19, 0.0  ;;  %v3807_v33 = vadd.f32 %v3678_v58, %v7503_v3 }
 0x41b   : > { %v5589_v2 = vpop.f32.mrf.mxu1 }
 0x41c   : > { %v3914_v52 = vpack.c.bf16 %v3881_v20, %v3880_v37  ;;  %v3848_v43 = vadd.f32 %v7618_v0, %v3807_v33 }
 0x41d   : > { %v3681_v23 = vpop.f32.mrf.mxu1 }
 0x41e   : > { %v3808_v25 = vadd.f32 %v3681_v23, %v7506_v5  ;;  %5668 = vmatmul.mubr.bf16.vlgmr.msra.gmra.mxu0 %v3914_v52  ;;  %v3882_v44 = vmax.f32 %v3848_v43, 0.0 }
 0x41f   : > { %v5590_v18 = vpop.f32.mrf.mxu1  ;;  %5671 = vmatprep.mubr.msk.bf16.mxu0 %vm6130_vm0, %v7541_v56 }
 0x420   : > { %v3849_v51 = vadd.f32 %v7618_v0, %v3808_v25 }
 0x421   : > { %v3686_v49 = vpop.f32.mrf.mxu1 }
 0x422   : > { %v3883_v62 = vmax.f32 %v3849_v51, 0.0  ;;  %v3809_v41 = vadd.f32 %v3686_v49, %v7511_v63 }
 0x423   : > { %v5593_v3 = vpop.f32.mrf.mxu1 }
 0x424   : > { %v3915_v54 = vpack.c.bf16 %v3883_v62, %v3882_v44  ;;  %v3850_v22 = vadd.f32 %v7618_v0, %v3809_v41 }
 0x425   : > { %v3689_v55 = vpop.f32.mrf.mxu1 }
 0x426   : > { %v3810_v6 = vadd.f32 %v3689_v55, %v7514_v14  ;;  %5672 = vmatmul.mubr.bf16.gmra.mxu0 %v3915_v54  ;;  %v3884_v13 = vmax.f32 %v3850_v22, 0.0 }
 0x427   : > { %v5594_v5 = vpop.f32.mrf.mxu1  ;;  %5675 = vmatprep.mubr.msk.bf16.mxu0 %vm6130_vm0, %v7541_v56 }
 0x428   : > { %v3851_v10 = vadd.f32 %v7618_v0, %v3810_v6 }
 0x429   : > { %v3694_v8 = vpop.f32.mrf.mxu1 }
 0x42a   : > { %v3885_v48 = vmax.f32 %v3851_v10, 0.0  ;;  %v3811_v7 = vadd.f32 %v3694_v8, %v7519_v34 }
 0x42b   : > { %v5597_v63 = vpop.f32.mrf.mxu1 }
 0x42c   : > { %v3916_v38 = vpack.c.bf16 %v3885_v48, %v3884_v13  ;;  %v3852_v59 = vadd.f32 %v7618_v0, %v3811_v7 }
 0x42d   : > { %v3697_v42 = vpop.f32.mrf.mxu1 }
 0x42e   : > { %v3812_v21 = vadd.f32 %v3697_v42, %v7522_v26  ;;  %5676 = vmatmul.mubr.bf16.gmra.mxu0 %v3916_v38  ;;  %v3886_v58 = vmax.f32 %v3852_v59, 0.0 }
 0x42f   : > { %v5598_v14 = vpop.f32.mrf.mxu1  ;;  %5679 = vmatprep.mubr.msk.bf16.mxu0 %vm6130_vm0, %v7541_v56 }
 0x430   : > { %v3853_v4 = vadd.f32 %v7618_v0, %v3812_v21 }
 0x431   : > { %v3702_v19 = vpop.f32.mrf.mxu1 }
 0x432   : > { %v3887_v37 = vmax.f32 %v3853_v4, 0.0  ;;  %v3813_v20 = vadd.f32 %v3702_v19, %v7527_v39 }
 0x433   : > { %v5601_v34 = vpop.f32.mrf.mxu1 }
 0x434   : > { %v3917_v33 = vpack.c.bf16 %v3887_v37, %v3886_v58  ;;  %v3854_v52 = vadd.f32 %v7618_v0, %v3813_v20 }
 0x435   : > { %v3705_v2 = vpop.f32.mrf.mxu1 }
 0x436   : > { %v3814_v23 = vadd.f32 %v3705_v2, %v7530_v30  ;;  %5680 = vmatmul.mubr.bf16.gmra.mxu0 %v3917_v33  ;;  %v3888_v18 = vmax.f32 %v3854_v52, 0.0 }
 0x437   : > { %v5602_v26 = vpop.f32.mrf.mxu1  ;;  %5683 = vmatprep.mubr.msk.bf16.mxu0 %vm6130_vm0, %v7541_v56 }
 0x438   : > { %v3855_v43 = vadd.f32 %v7618_v0, %v3814_v23 }
 0x439   : > { %v3710_v25 = vpop.f32.mrf.mxu1 }
 0x43a   : > { %v3889_v51 = vmax.f32 %v3855_v43, 0.0  ;;  %v3815_v49 = vadd.f32 %v3710_v25, %v7535_v9 }
 0x43b   : > { %v5605_v39 = vpop.f32.mrf.mxu1 }
 0x43c   : > { %v3918_v44 = vpack.c.bf16 %v3889_v51, %v3888_v18  ;;  %v3856_v41 = vadd.f32 %v7618_v0, %v3815_v49 }
 0x43d   : > { %v3713_v62 = vpop.f32.mrf.mxu1 }
 0x43e   : > { %v3816_v3 = vadd.f32 %v3713_v62, %v7538_v35  ;;  %5684 = vmatmul.mubr.bf16.gmra.mxu0 %v3918_v44  ;;  %v3890_v22 = vmax.f32 %v3856_v41, 0.0 }
 0x43f   : > { %v5606_v30 = vpop.f32.mrf.mxu1  ;;  %5687 = vmatprep.mubr.msk.bf16.mxu0 %vm6130_vm0, %v7541_v56 }
 0x440   : > { %v3857_v54 = vadd.f32 %v7618_v0, %v3816_v3 }
 0x441   : > { %v3718_v55 = vpop.f32.mrf.mxu1 }
 0x442   : > { %v3891_v6 = vmax.f32 %v3857_v54, 0.0  ;;  %v3817_v5 = vadd.f32 %v3718_v55, %v7545_v57 }
 0x443   : > { %v5609_v9 = vpop.f32.mrf.mxu1 }
 0x444   : > { %v3919_v10 = vpack.c.bf16 %v3891_v6, %v3890_v22  ;;  %v3858_v13 = vadd.f32 %v7618_v0, %v3817_v5 }
 0x445   : > { %v3721_v8 = vpop.f32.mrf.mxu1 }
 0x446   : > { %v3818_v48 = vadd.f32 %v3721_v8, %v7548_v16  ;;  %5688 = vmatmul.mubr.bf16.gmra.mxu0 %v3919_v10  ;;  %v3892_v38 = vmax.f32 %v3858_v13, 0.0 }
 0x447   : > { %v5610_v35 = vpop.f32.mrf.mxu1  ;;  %5691 = vmatprep.mubr.msk.bf16.mxu0 %vm6130_vm0, %v7541_v56 }
 0x448   : > { %v3859_v7 = vadd.f32 %v7618_v0, %v3818_v48 }
 0x449   : > { %v3726_v63 = vpop.f32.mrf.mxu1 }
 0x44a   : > { %v3893_v42 = vmax.f32 %v3859_v7, 0.0  ;;  %v3819_v59 = vadd.f32 %v3726_v63, %v7553_v15 }
 0x44b   : > { %v5613_v57 = vpop.f32.mrf.mxu1 }
 0x44c   : > { %v3920_v21 = vpack.c.bf16 %v3893_v42, %v3892_v38  ;;  %v3860_v4 = vadd.f32 %v7618_v0, %v3819_v59 }
 0x44d   : > { %v3729_v14 = vpop.f32.mrf.mxu1 }
 0x44e   : > { %v3820_v19 = vadd.f32 %v3729_v14, %v7556_v60  ;;  %5692 = vmatmul.mubr.bf16.gmra.mxu0 %v3920_v21  ;;  %v3894_v20 = vmax.f32 %v3860_v4, 0.0 }
 0x44f   : > { %v5614_v16 = vpop.f32.mrf.mxu1  ;;  %5695 = vmatprep.mubr.msk.bf16.mxu0 %vm6130_vm0, %v7541_v56 }
 0x450   : > { %v3861_v58 = vadd.f32 %v7618_v0, %v3820_v19 }
 0x451   : > { %v3734_v37 = vpop.f32.mrf.mxu1 }
 0x452   : > { %v3895_v34 = vmax.f32 %v3861_v58, 0.0  ;;  %v3821_v33 = vadd.f32 %v3734_v37, %v7561_v50 }
 0x453   : > { %v5617_v15 = vpop.f32.mrf.mxu1 }
 0x454   : > { %v3921_v2 = vpack.c.bf16 %v3895_v34, %v3894_v20  ;;  %v3862_v23 = vadd.f32 %v7618_v0, %v3821_v33 }
 0x455   : > { %v3737_v52 = vpop.f32.mrf.mxu1 }
 0x456   : > { %v3822_v26 = vadd.f32 %v3737_v52, %v7564_v11  ;;  %5696 = vmatmul.mubr.bf16.gmra.mxu0 %v3921_v2  ;;  %v3896_v18 = vmax.f32 %v3862_v23, 0.0 }
 0x457   : > { %v5618_v60 = vpop.f32.mrf.mxu1  ;;  %5699 = vmatprep.mubr.msk.bf16.mxu0 %vm6130_vm0, %v7541_v56 }
 0x458   : > { %v3863_v43 = vadd.f32 %v7618_v0, %v3822_v26 }
 0x459   : > { %v3742_v25 = vpop.f32.mrf.mxu1 }
 0x45a   : > { %v3897_v51 = vmax.f32 %v3863_v43, 0.0  ;;  %v3823_v49 = vadd.f32 %v3742_v25, %v7567_v17 }
 0x45b   : > { %v5621_v50 = vpop.f32.mrf.mxu1 }
 0x45c   : > { %v3922_v39 = vpack.c.bf16 %v3897_v51, %v3896_v18  ;;  %v3864_v62 = vadd.f32 %v7618_v0, %v3823_v49 }
 0x45d   : > { %v3745_v44 = vpop.f32.mrf.mxu1 }
 0x45e   : > { %v3824_v41 = vadd.f32 %v3745_v44, %v7570_v28  ;;  %5700 = vmatmul.mubr.bf16.gmra.mxu0 %v3922_v39  ;;  %v3898_v54 = vmax.f32 %v3864_v62, 0.0 }
 0x45f   : > { %v5622_v11 = vpop.f32.mrf.mxu1  ;;  %5703 = vmatprep.mubr.msk.bf16.mxu0 %vm6130_vm0, %v7541_v56 }
 0x460   : > { %v3865_v3 = vadd.f32 %v7618_v0, %v3824_v41 }
 0x461   : > { %v3750_v30 = vpop.f32.mrf.mxu1 }
 0x462   : > { %v3899_v55 = vmax.f32 %v3865_v3, 0.0  ;;  %v3825_v22 = vadd.f32 %v3750_v30, %v7573_v31 }
 0x463   : > { %v5625_v17 = vpop.f32.mrf.mxu1 }
 0x464   : > { %v3923_v6 = vpack.c.bf16 %v3899_v55, %v3898_v54  ;;  %v3866_v9 = vadd.f32 %v7618_v0, %v3825_v22 }
 0x465   : > { %v3753_v5 = vpop.f32.mrf.mxu1 }
 0x466   : > { %v3826_v10 = vadd.f32 %v3753_v5, %v7576_v40  ;;  %5704 = vmatmul.mubr.bf16.gmra.mxu0 %v3923_v6  ;;  %v3900_v48 = vmax.f32 %v3866_v9, 0.0 }
 0x467   : > { %v5626_v28 = vpop.f32.mrf.mxu1  ;;  %5707 = vmatprep.mubr.msk.bf16.mxu0 %vm6130_vm0, %v7541_v56 }
 0x468   : > { %v3867_v8 = vadd.f32 %v7618_v0, %v3826_v10 }
 0x469   : > { %v3758_v13 = vpop.f32.mrf.mxu1 }
 0x46a   : > { %v3901_v35 = vmax.f32 %v3867_v8, 0.0  ;;  %v3827_v7 = vadd.f32 %v3758_v13, %v7579_v29 }
 0x46b   : > { %v5629_v31 = vpop.f32.mrf.mxu1 }
 0x46c   : > { %v3924_v63 = vpack.c.bf16 %v3901_v35, %v3900_v48  ;;  %v3868_v42 = vadd.f32 %v7618_v0, %v3827_v7 }
 0x46d   : > { %v3761_v38 = vpop.f32.mrf.mxu1 }
 0x46e   : > { %v3828_v59 = vadd.f32 %v3761_v38, %v7582_v61  ;;  %5708 = vmatmul.mubr.bf16.gmra.mxu0 %v3924_v63  ;;  %v3902_v14 = vmax.f32 %v3868_v42, 0.0 }
 0x46f   : > { %v5630_v40 = vpop.f32.mrf.mxu1  ;;  %5711 = vmatprep.mubr.msk.bf16.mxu0 %vm6130_vm0, %v7541_v56 }
 0x470   : > { %v3869_v57 = vadd.f32 %v7618_v0, %v3828_v59  ;;  %v5959_v40 = vld [vmem:[%s6322_s24] sm:$0xff]  }
 0x471   : > { %v3766_v21 = vpop.f32.mrf.mxu1 }
 0x472   : > { %v3903_v4 = vmax.f32 %v3869_v57, 0.0  ;;  %v3829_v19 = vadd.f32 %v3766_v21, %v7585_v47 }
 0x473   : > { %v5633_v29 = vpop.f32.mrf.mxu1 }
 0x474   : > { %v3925_v16 = vpack.c.bf16 %v3903_v4, %v3902_v14  ;;  %v3870_v37 = vadd.f32 %v7618_v0, %v3829_v19  ;;  %v4172_v14 = vunpack.c.h.bf16 %v5959_v40 }
 0x475   : > { %v3769_v58 = vpop.f32.mrf.mxu1 }
 0x476   : > { %v3830_v20 = vadd.f32 %v3769_v58, %v7588_v36  ;;  %5712 = vmatmul.mubr.bf16.gmra.mxu0 %v3925_v16  ;;  %v3904_v15 = vmax.f32 %v3870_v37, 0.0  ;;  %v5960_v37 = vld [vmem:[%s6322_s24 + $0x8] sm:$0xff]  }
 0x477   : > { %v5634_v61 = vpop.f32.mrf.mxu1  ;;  %5715 = vmatprep.mubr.msk.bf16.mxu0 %vm6130_vm0, %v7541_v56 }
 0x478   : > { %v3871_v34 = vadd.f32 %v7618_v0, %v3830_v20  ;;  %v4173_v20 = vunpack.c.l.bf16 %v5960_v37 }
 0x479   : > { %v3774_v33 = vpop.f32.mrf.mxu1 }
 0x47a   : > { %v3905_v2 = vmax.f32 %v3871_v34, 0.0  ;;  %v3831_v52 = vadd.f32 %v3774_v33, %v7591_v53 }
 0x47b   : > { %v5637_v47 = vpop.f32.mrf.mxu1 }
 0x47c   : > { %v3926_v23 = vpack.c.bf16 %v3905_v2, %v3904_v15  ;;  %v3872_v60 = vadd.f32 %v7618_v0, %v3831_v52  ;;  %v4174_v52 = vunpack.c.h.bf16 %v5960_v37 }
 0x47d   : > { %v3777_v26 = vpop.f32.mrf.mxu1 }
 0x47e   : > { %v3832_v43 = vadd.f32 %v3777_v26, %v7594_v46  ;;  %5716 = vmatmul.mubr.bf16.gmra.mxu0 %v3926_v23  ;;  %v3906_v51 = vmax.f32 %v3872_v60, 0.0 }
 0x47f   : > { %v5638_v36 = vpop.f32.mrf.mxu1  ;;  %5719 = vmatprep.mubr.msk.bf16.mxu0 %vm6130_vm0, %v7541_v56 }
 0x480   : > { %v3873_v25 = vadd.f32 %v7618_v0, %v3832_v43  ;;  %v5961_v36 = vld [vmem:[%s6322_s24 + $0x10] sm:$0xff]  }
 0x481   : > { %v3782_v18 = vpop.f32.mrf.mxu1 }
 0x482   : > { %v3907_v49 = vmax.f32 %v3873_v25, 0.0  ;;  %v3833_v50 = vadd.f32 %v3782_v18, %v7597_v45  ;;  %v4175_v25 = vunpack.c.l.bf16 %v5961_v36 }
 0x483   : > { %v5641_v53 = vpop.f32.mrf.mxu1 }
 0x484   : > { %v3927_v39 = vpack.c.bf16 %v3907_v49, %v3906_v51  ;;  %v3874_v62 = vadd.f32 %v7618_v0, %v3833_v50 }
 0x485   : > { %v3785_v44 = vpop.f32.mrf.mxu1 }
 0x486   : > { %v3834_v41 = vadd.f32 %v3785_v44, %v7600_v24  ;;  %5720 = vmatmul.mubr.bf16.gmra.mxu0 %v3927_v39  ;;  %v3908_v30 = vmax.f32 %v3874_v62, 0.0  ;;  %v4176_v39 = vunpack.c.h.bf16 %v5961_v36 }
 0x487   : > { %v5642_v46 = vpop.f32.mrf.mxu1  ;;  %5723 = vmatprep.mubr.msk.bf16.mxu0 %vm6130_vm0, %v7541_v56 }
 0x488   : > { %v3875_v11 = vadd.f32 %v7618_v0, %v3834_v41 }
 0x489   : > { %v3790_v3 = vpop.f32.mrf.mxu1 }
 0x48a   : > { %v3909_v54 = vmax.f32 %v3875_v11, 0.0  ;;  %v3835_v55 = vadd.f32 %v3790_v3, %v7603_v1  ;;  %v5962_v3 = vld [vmem:[%s6322_s24 + $0x18] sm:$0xff]  }
 0x48b   : > { %v5645_v45 = vpop.f32.mrf.mxu1 }
 0x48c   : > { %v3928_v22 = vpack.c.bf16 %v3909_v54, %v3908_v30  ;;  %v3876_v6 = vadd.f32 %v7618_v0, %v3835_v55  ;;  %v4177_v30 = vunpack.c.l.bf16 %v5962_v3 }
 0x48d   : > { %v3793_v17 = vpop.f32.mrf.mxu1 }
 0x48e   : > { %v3836_v5 = vadd.f32 %v3793_v17, %v7606_v12  ;;  %5724 = vmatmul.mubr.bf16.gmra.mxu0 %v3928_v22  ;;  %v3910_v28 = vmax.f32 %v3876_v6, 0.0  ;;  %v4178_v6 = vunpack.c.h.bf16 %v5962_v3 }
 0x48f   : > { %v5646_v24 = vpop.f32.mrf.mxu1  ;;  %5727 = vmatprep.mubr.msk.bf16.mxu0 %vm6130_vm0, %v7541_v56 }
 0x490   : > { %v3877_v9 = vadd.f32 %v7618_v0, %v3836_v5 }
 0x491   : > { %v3798_v10 = vpop.f32.mrf.mxu1 }
 0x492   : > { %v3911_v8 = vmax.f32 %v3877_v9, 0.0  ;;  %v3837_v1 = vadd.f32 %v3798_v10, %v7609_v32  ;;  %v7723_v32 = vld [vmem:[%s7872_s7] ss:$0 sm:$0xff] }
 0x493   : > { %v5649_v13 = vpop.f32.mrf.mxu1 }
 0x494   : > { %v3929_v48 = vpack.c.bf16 %v3911_v8, %v3910_v28  ;;  %v3878_v12 = vadd.f32 %v7618_v0, %v3837_v1  ;;  %v5963_v8 = vld [vmem:[%s6322_s24 + $0x20] sm:$0xff]  }
 0x495   : > { %v3801_v35 = vpop.f32.mrf.mxu1  ;;  %v4179_v1 = vunpack.c.l.bf16 %v5963_v8 }
 0x496   : > { %v3838_v7 = vadd.f32 %v3801_v35, %v7612_v27  ;;  %5728 = vmatmul.mubr.bf16.gmra.mxu0 %v3929_v48  ;;  %v3912_v38 = vmax.f32 %v3878_v12, 0.0  ;;  %v4171_v27 = vunpack.c.l.bf16 %v5959_v40 }
 0x497   : > { %v5650_v31 = vpop.f32.mrf.mxu1  ;;  %5731 = vmatprep.mubr.msk.bf16.mxu0 %vm6130_vm0, %v7541_v56 }
 0x498   : > { %v3879_v63 = vadd.f32 %v7618_v0, %v3838_v7  ;;  %v4180_v31 = vunpack.c.h.bf16 %v5963_v8 }
 0x49a   : > { %v3913_v42 = vmax.f32 %v3879_v63, 0.0 }
 0x49c   : > { %v3930_v59 = vpack.c.bf16 %v3913_v42, %v3912_v38 }
 0x49e   : > { %5732 = vmatmul.mubr.bf16.gmra.mxu0 %v3930_v59 }
 0x4de   : > { %v4036_v57 = vpop.f32.mrf.mxu0 }
 0x4df   : > { %v4037_v56 = vadd.f32 %v7723_v32, %v4036_v57 }
 0x4e0   : > { %v5669_v21 = vpop.f32.mrf.mxu0 }
 0x4e1   : > { %v4205_v0 = vadd.f32 %v4171_v27, %v4037_v56  ;;  %v5964_v27 = vld [vmem:[%s6322_s24 + $0x28] sm:$0xff]  }
 0x4e2   : > { %v4039_v4 = vpop.f32.mrf.mxu0  ;;  %v4181_v57 = vunpack.c.l.bf16 %v5964_v27 }
 0x4e3   : > { %v4239_v19 = vmax.f32 %v4205_v0, 0.0  ;;  %v4040_v29 = vadd.f32 %v7723_v32, %v4039_v4 }
 0x4e4   : > { %v5670_v16 = vpop.f32.mrf.mxu0 }
 0x4e5   : > { %4273 = vst [vmem:[%s7730_s21] sm:$0xff] %v4239_v19  ;;  %v4206_v58 = vadd.f32 %v4172_v14, %v4040_v29  ;;  %v4182_v19 = vunpack.c.h.bf16 %v5964_v27 }
 0x4e6   : > { %v4044_v61 = vpop.f32.mrf.mxu0 }
 0x4e7   : > { %v4240_v34 = vmax.f32 %v4206_v58, 0.0  ;;  %v4045_v33 = vadd.f32 %v7723_v32, %v4044_v61  ;;  %v5965_v61 = vld [vmem:[%s6322_s24 + $0x30] sm:$0xff]  }
 0x4e8   : > { %v5673_v15 = vpop.f32.mrf.mxu0 }
 0x4e9   : > { %4274 = vst [vmem:[%s7730_s21 + $0x8] sm:$0xff] %v4240_v34  ;;  %v4207_v2 = vadd.f32 %v4173_v20, %v4045_v33  ;;  %v4183_v34 = vunpack.c.l.bf16 %v5965_v61 }
 0x4ea   : > { %v4047_v47 = vpop.f32.mrf.mxu0 }
 0x4eb   : > { %v4241_v23 = vmax.f32 %v4207_v2, 0.0  ;;  %v4048_v26 = vadd.f32 %v7723_v32, %v4047_v47 }
 0x4ec   : > { %v5674_v60 = vpop.f32.mrf.mxu0 }
 0x4ed   : > { %4275 = vst [vmem:[%s7730_s21 + $0x10] sm:$0xff] %v4241_v23  ;;  %v4208_v43 = vadd.f32 %v4174_v52, %v4048_v26  ;;  %v4184_v23 = vunpack.c.h.bf16 %v5965_v61 }
 0x4ee   : > { %v4052_v18 = vpop.f32.mrf.mxu0 }
 0x4ef   : > { %v4242_v51 = vmax.f32 %v4208_v43, 0.0  ;;  %v4053_v49 = vadd.f32 %v7723_v32, %v4052_v18  ;;  %v5966_v18 = vld [vmem:[%s6322_s24 + $0x38] sm:$0xff]  }
 0x4f0   : > { %v5677_v50 = vpop.f32.mrf.mxu0 }
 0x4f1   : > { %4276 = vst [vmem:[%s7730_s21 + $0x18] sm:$0xff] %v4242_v51  ;;  %v4209_v53 = vadd.f32 %v4175_v25, %v4053_v49  ;;  %v4185_v51 = vunpack.c.l.bf16 %v5966_v18 }
 0x4f2   : > { %v4055_v44 = vpop.f32.mrf.mxu0 }
 0x4f3   : > { %v4243_v62 = vmax.f32 %v4209_v53, 0.0  ;;  %v4056_v41 = vadd.f32 %v7723_v32, %v4055_v44 }
 0x4f4   : > { %v5678_v46 = vpop.f32.mrf.mxu0 }
 0x4f5   : > { %4277 = vst [vmem:[%s7730_s21 + $0x20] sm:$0xff] %v4243_v62  ;;  %v4210_v11 = vadd.f32 %v4176_v39, %v4056_v41  ;;  %v4186_v62 = vunpack.c.h.bf16 %v5966_v18 }
 0x4f6   : > { %v4060_v54 = vpop.f32.mrf.mxu0 }
 0x4f7   : > { %v4244_v55 = vmax.f32 %v4210_v11, 0.0  ;;  %v4061_v45 = vadd.f32 %v7723_v32, %v4060_v54  ;;  %v5967_v54 = vld [vmem:[%s6322_s24 + $0x40] sm:$0xff]  }
 0x4f8   : > { %v5681_v22 = vpop.f32.mrf.mxu0 }
 0x4f9   : > { %4278 = vst [vmem:[%s7730_s21 + $0x28] sm:$0xff] %v4244_v55  ;;  %v4211_v17 = vadd.f32 %v4177_v30, %v4061_v45  ;;  %v4187_v55 = vunpack.c.l.bf16 %v5967_v54 }
 0x4fa   : > { %v4063_v5 = vpop.f32.mrf.mxu0 }
 0x4fb   : > { %v4245_v24 = vmax.f32 %v4211_v17, 0.0  ;;  %v4064_v9 = vadd.f32 %v7723_v32, %v4063_v5 }
 0x4fc   : > { %v5682_v10 = vpop.f32.mrf.mxu0 }
 0x4fd   : > { %4279 = vst [vmem:[%s7730_s21 + $0x30] sm:$0xff] %v4245_v24  ;;  %v4212_v28 = vadd.f32 %v4178_v6, %v4064_v9  ;;  %v4188_v24 = vunpack.c.h.bf16 %v5967_v54 }
 0x4fe   : > { %v4068_v13 = vpop.f32.mrf.mxu0 }
 0x4ff   : > { %v4246_v48 = vmax.f32 %v4212_v28, 0.0  ;;  %v4069_v35 = vadd.f32 %v7723_v32, %v4068_v13  ;;  %v5968_v13 = vld [vmem:[%s6322_s24 + $0x48] sm:$0xff]  }
 0x500   : > { %v5685_v12 = vpop.f32.mrf.mxu0 }
 0x501   : > { %4280 = vst [vmem:[%s7730_s21 + $0x38] sm:$0xff] %v4246_v48  ;;  %v4213_v7 = vadd.f32 %v4179_v1, %v4069_v35  ;;  %v4189_v48 = vunpack.c.l.bf16 %v5968_v13 }
 0x502   : > { %v4071_v63 = vpop.f32.mrf.mxu0 }
 0x503   : > { %v4247_v38 = vmax.f32 %v4213_v7, 0.0  ;;  %v4072_v42 = vadd.f32 %v7723_v32, %v4071_v63 }
 0x504   : > { %v5686_v59 = vpop.f32.mrf.mxu0 }
 0x505   : > { %4281 = vst [vmem:[%s7730_s21 + $0x40] sm:$0xff] %v4247_v38  ;;  %v4214_v40 = vadd.f32 %v4180_v31, %v4072_v42  ;;  %v4190_v38 = vunpack.c.h.bf16 %v5968_v13 }
 0x506   : > { %v4076_v56 = vpop.f32.mrf.mxu0 }
 0x507   : > { %v4248_v21 = vmax.f32 %v4214_v40, 0.0  ;;  %v4077_v0 = vadd.f32 %v7723_v32, %v4076_v56  ;;  %v5969_v56 = vld [vmem:[%s6322_s24 + $0x50] sm:$0xff]  }
 0x508   : > { %v5689_v14 = vpop.f32.mrf.mxu0 }
 0x509   : > { %4282 = vst [vmem:[%s7730_s21 + $0x48] sm:$0xff] %v4248_v21  ;;  %v4215_v4 = vadd.f32 %v4181_v57, %v4077_v0  ;;  %v4191_v21 = vunpack.c.l.bf16 %v5969_v56 }
 0x50a   : > { %v4079_v29 = vpop.f32.mrf.mxu0 }
 0x50b   : > { %v4249_v16 = vmax.f32 %v4215_v4, 0.0  ;;  %v4080_v58 = vadd.f32 %v7723_v32, %v4079_v29 }
 0x50c   : > { %v5690_v37 = vpop.f32.mrf.mxu0 }
 0x50d   : > { %4283 = vst [vmem:[%s7730_s21 + $0x50] sm:$0xff] %v4249_v16  ;;  %v4216_v20 = vadd.f32 %v4182_v19, %v4080_v58  ;;  %v4192_v16 = vunpack.c.h.bf16 %v5969_v56 }
 0x50e   : > { %v4084_v33 = vpop.f32.mrf.mxu0 }
 0x50f   : > { %v4250_v15 = vmax.f32 %v4216_v20, 0.0  ;;  %v4085_v2 = vadd.f32 %v7723_v32, %v4084_v33  ;;  %v5970_v33 = vld [vmem:[%s6322_s24 + $0x58] sm:$0xff]  }
 0x510   : > { %v5693_v52 = vpop.f32.mrf.mxu0 }
 0x511   : > { %4284 = vst [vmem:[%s7730_s21 + $0x58] sm:$0xff] %v4250_v15  ;;  %v4217_v47 = vadd.f32 %v4183_v34, %v4085_v2  ;;  %v4193_v15 = vunpack.c.l.bf16 %v5970_v33 }
 0x512   : > { %v4087_v26 = vpop.f32.mrf.mxu0 }
 0x513   : > { %v4251_v60 = vmax.f32 %v4217_v47, 0.0  ;;  %v4088_v43 = vadd.f32 %v7723_v32, %v4087_v26 }
 0x514   : > { %v5694_v36 = vpop.f32.mrf.mxu0 }
 0x515   : > { %4285 = vst [vmem:[%s7730_s21 + $0x60] sm:$0xff] %v4251_v60  ;;  %v4218_v25 = vadd.f32 %v4184_v23, %v4088_v43  ;;  %v4194_v60 = vunpack.c.h.bf16 %v5970_v33 }
 0x516   : > { %v4092_v49 = vpop.f32.mrf.mxu0 }
 0x517   : > { %v4252_v50 = vmax.f32 %v4218_v25, 0.0  ;;  %v4093_v53 = vadd.f32 %v7723_v32, %v4092_v49  ;;  %v5971_v49 = vld [vmem:[%s6322_s24 + $0x60] sm:$0xff]  }
 0x518   : > { %v5697_v39 = vpop.f32.mrf.mxu0 }
 0x519   : > { %4286 = vst [vmem:[%s7730_s21 + $0x68] sm:$0xff] %v4252_v50  ;;  %v4219_v44 = vadd.f32 %v4185_v51, %v4093_v53  ;;  %v4195_v50 = vunpack.c.l.bf16 %v5971_v49 }
 0x51a   : > { %v4095_v41 = vpop.f32.mrf.mxu0 }
 0x51b   : > { %v4253_v46 = vmax.f32 %v4219_v44, 0.0  ;;  %v4096_v11 = vadd.f32 %v7723_v32, %v4095_v41 }
 0x51c   : > { %v5698_v3 = vpop.f32.mrf.mxu0 }
 0x51d   : > { %4287 = vst [vmem:[%s7730_s21 + $0x70] sm:$0xff] %v4253_v46  ;;  %v4220_v30 = vadd.f32 %v4186_v62, %v4096_v11  ;;  %v4196_v46 = vunpack.c.h.bf16 %v5971_v49 }
 0x51e   : > { %v4100_v45 = vpop.f32.mrf.mxu0 }
 0x51f   : > { %v4254_v22 = vmax.f32 %v4220_v30, 0.0  ;;  %v4101_v17 = vadd.f32 %v7723_v32, %v4100_v45  ;;  %v5972_v45 = vld [vmem:[%s6322_s24 + $0x68] sm:$0xff]  }
 0x520   : > { %v5701_v6 = vpop.f32.mrf.mxu0 }
 0x521   : > { %4288 = vst [vmem:[%s7730_s21 + $0x78] sm:$0xff] %v4254_v22  ;;  %v4221_v5 = vadd.f32 %v4187_v55, %v4101_v17  ;;  %v4197_v22 = vunpack.c.l.bf16 %v5972_v45 }
 0x522   : > { %v4103_v9 = vpop.f32.mrf.mxu0 }
 0x523   : > { %v4255_v10 = vmax.f32 %v4221_v5, 0.0  ;;  %v4104_v28 = vadd.f32 %v7723_v32, %v4103_v9 }
 0x524   : > { %v5702_v8 = vpop.f32.mrf.mxu0 }
 0x525   : > { %4289 = vst [vmem:[%s7730_s21 + $0x80] sm:$0xff] %v4255_v10  ;;  %v4222_v1 = vadd.f32 %v4188_v24, %v4104_v28  ;;  %v4198_v10 = vunpack.c.h.bf16 %v5972_v45 }
 0x526   : > { %v4108_v35 = vpop.f32.mrf.mxu0 }
 0x527   : > { %v4256_v12 = vmax.f32 %v4222_v1, 0.0  ;;  %v4109_v7 = vadd.f32 %v7723_v32, %v4108_v35  ;;  %v5973_v35 = vld [vmem:[%s6322_s24 + $0x70] sm:$0xff]  }
 0x528   : > { %v5705_v31 = vpop.f32.mrf.mxu0 }
 0x529   : > { %4290 = vst [vmem:[%s7730_s21 + $0x88] sm:$0xff] %v4256_v12  ;;  %v4223_v63 = vadd.f32 %v4189_v48, %v4109_v7  ;;  %v4199_v12 = vunpack.c.l.bf16 %v5973_v35 }
 0x52a   : > { %v4111_v42 = vpop.f32.mrf.mxu0 }
 0x52b   : > { %v4257_v59 = vmax.f32 %v4223_v63, 0.0  ;;  %v4112_v40 = vadd.f32 %v7723_v32, %v4111_v42 }
 0x52c   : > { %v5706_v27 = vpop.f32.mrf.mxu0 }
 0x52d   : > { %4291 = vst [vmem:[%s7730_s21 + $0x90] sm:$0xff] %v4257_v59  ;;  %v4224_v57 = vadd.f32 %v4190_v38, %v4112_v40  ;;  %v4200_v59 = vunpack.c.h.bf16 %v5973_v35 }
 0x52e   : > { %v4116_v0 = vpop.f32.mrf.mxu0 }
 0x52f   : > { %v4258_v14 = vmax.f32 %v4224_v57, 0.0  ;;  %v4117_v4 = vadd.f32 %v7723_v32, %v4116_v0  ;;  %v5974_v0 = vld [vmem:[%s6322_s24 + $0x78] sm:$0xff]  }
 0x530   : > { %v5709_v19 = vpop.f32.mrf.mxu0 }
 0x531   : > { %4292 = vst [vmem:[%s7730_s21 + $0x98] sm:$0xff] %v4258_v14  ;;  %v4225_v29 = vadd.f32 %v4191_v21, %v4117_v4  ;;  %v4201_v14 = vunpack.c.l.bf16 %v5974_v0 }
 0x532   : > { %v4119_v58 = vpop.f32.mrf.mxu0 }
 0x533   : > { %v4259_v37 = vmax.f32 %v4225_v29, 0.0  ;;  %v4120_v20 = vadd.f32 %v7723_v32, %v4119_v58 }
 0x534   : > { %v5710_v61 = vpop.f32.mrf.mxu0 }
 0x535   : > { %4293 = vst [vmem:[%s7730_s21 + $0xa0] sm:$0xff] %v4259_v37  ;;  %v4226_v34 = vadd.f32 %v4192_v16, %v4120_v20  ;;  %v4202_v37 = vunpack.c.h.bf16 %v5974_v0 }
 0x536   : > { %v4124_v2 = vpop.f32.mrf.mxu0 }
 0x537   : > { %v4260_v52 = vmax.f32 %v4226_v34, 0.0  ;;  %v4125_v47 = vadd.f32 %v7723_v32, %v4124_v2  ;;  %v5975_v2 = vld [vmem:[%s6322_s24 + $0x80] sm:$0xff]  }
 0x538   : > { %v5713_v23 = vpop.f32.mrf.mxu0 }
 0x539   : > { %4294 = vst [vmem:[%s7730_s21 + $0xa8] sm:$0xff] %v4260_v52  ;;  %v4227_v26 = vadd.f32 %v4193_v15, %v4125_v47  ;;  %v4203_v52 = vunpack.c.l.bf16 %v5975_v2 }
 0x53a   : > { %v4127_v43 = vpop.f32.mrf.mxu0 }
 0x53b   : > { %v4261_v36 = vmax.f32 %v4227_v26, 0.0  ;;  %v4128_v25 = vadd.f32 %v7723_v32, %v4127_v43 }
 0x53c   : > { %v5714_v18 = vpop.f32.mrf.mxu0 }
 0x53d   : > { %4295 = vst [vmem:[%s7730_s21 + $0xb0] sm:$0xff] %v4261_v36  ;;  %v4228_v51 = vadd.f32 %v4194_v60, %v4128_v25  ;;  %v4204_v36 = vunpack.c.h.bf16 %v5975_v2 }
 0x53e   : > { %v4132_v53 = vpop.f32.mrf.mxu0 }
 0x53f   : > { %v4262_v39 = vmax.f32 %v4228_v51, 0.0  ;;  %v4133_v44 = vadd.f32 %v7723_v32, %v4132_v53 }
 0x540   : > { %v5717_v62 = vpop.f32.mrf.mxu0 }
 0x541   : > { %4296 = vst [vmem:[%s7730_s21 + $0xb8] sm:$0xff] %v4262_v39  ;;  %v4229_v41 = vadd.f32 %v4195_v50, %v4133_v44 }
 0x542   : > { %v4135_v11 = vpop.f32.mrf.mxu0 }
 0x543   : > { %v4263_v3 = vmax.f32 %v4229_v41, 0.0  ;;  %v4136_v30 = vadd.f32 %v7723_v32, %v4135_v11 }
 0x544   : > { %v5718_v54 = vpop.f32.mrf.mxu0 }
 0x545   : > { %4297 = vst [vmem:[%s7730_s21 + $0xc0] sm:$0xff] %v4263_v3  ;;  %v4230_v55 = vadd.f32 %v4196_v46, %v4136_v30 }
 0x546   : > { %v4140_v17 = vpop.f32.mrf.mxu0 }
 0x547   : > { %v4264_v6 = vmax.f32 %v4230_v55, 0.0  ;;  %v4141_v5 = vadd.f32 %v7723_v32, %v4140_v17 }
 0x548   : > { %v5721_v24 = vpop.f32.mrf.mxu0 }
 0x549   : > { %4298 = vst [vmem:[%s7730_s21 + $0xc8] sm:$0xff] %v4264_v6  ;;  %v4231_v9 = vadd.f32 %v4197_v22, %v4141_v5 }
 0x54a   : > { %v4143_v28 = vpop.f32.mrf.mxu0 }
 0x54b   : > { %v4265_v8 = vmax.f32 %v4231_v9, 0.0  ;;  %v4144_v1 = vadd.f32 %v7723_v32, %v4143_v28 }
 0x54c   : > { %v5722_v13 = vpop.f32.mrf.mxu0 }
 0x54d   : > { %4299 = vst [vmem:[%s7730_s21 + $0xd0] sm:$0xff] %v4265_v8  ;;  %v4232_v48 = vadd.f32 %v4198_v10, %v4144_v1 }
 0x54e   : > { %v4148_v7 = vpop.f32.mrf.mxu0 }
 0x54f   : > { %v4266_v31 = vmax.f32 %v4232_v48, 0.0  ;;  %v4149_v63 = vadd.f32 %v7723_v32, %v4148_v7 }
 0x550   : > { %v5725_v38 = vpop.f32.mrf.mxu0 }
 0x551   : > { %4300 = vst [vmem:[%s7730_s21 + $0xd8] sm:$0xff] %v4266_v31  ;;  %v4233_v42 = vadd.f32 %v4199_v12, %v4149_v63 }
 0x552   : > { %v4151_v40 = vpop.f32.mrf.mxu0 }
 0x553   : > { %v4267_v27 = vmax.f32 %v4233_v42, 0.0  ;;  %v4152_v57 = vadd.f32 %v7723_v32, %v4151_v40 }
 0x554   : > { %v5726_v56 = vpop.f32.mrf.mxu0 }
 0x555   : > { %4301 = vst [vmem:[%s7730_s21 + $0xe0] sm:$0xff] %v4267_v27  ;;  %v4234_v21 = vadd.f32 %v4200_v59, %v4152_v57 }
 0x556   : > { %v4156_v4 = vpop.f32.mrf.mxu0 }
 0x557   : > { %v4268_v19 = vmax.f32 %v4234_v21, 0.0  ;;  %v4157_v29 = vadd.f32 %v7723_v32, %v4156_v4 }
 0x558   : > { %v5729_v16 = vpop.f32.mrf.mxu0 }
 0x559   : > { %4302 = vst [vmem:[%s7730_s21 + $0xe8] sm:$0xff] %v4268_v19  ;;  %v4235_v58 = vadd.f32 %v4201_v14, %v4157_v29 }
 0x55a   : > { %v4159_v20 = vpop.f32.mrf.mxu0 }
 0x55b   : > { %v4269_v61 = vmax.f32 %v4235_v58, 0.0  ;;  %v4160_v34 = vadd.f32 %v7723_v32, %v4159_v20 }
 0x55c   : > { %v5730_v33 = vpop.f32.mrf.mxu0 }
 0x55d   : > { %4303 = vst [vmem:[%s7730_s21 + $0xf0] sm:$0xff] %v4269_v61  ;;  %v4236_v15 = vadd.f32 %v4202_v37, %v4160_v34 }
 0x55e   : > { %v4164_v47 = vpop.f32.mrf.mxu0 }
 0x55f   : > { %v4270_v23 = vmax.f32 %v4236_v15, 0.0  ;;  %v4165_v26 = vadd.f32 %v7723_v32, %v4164_v47 }
 0x560   : > { %v5733_v60 = vpop.f32.mrf.mxu0 }
 0x561   : > { %4304 = vst [vmem:[%s7730_s21 + $0xf8] sm:$0xff] %v4270_v23  ;;  %v4237_v43 = vadd.f32 %v4203_v52, %v4165_v26 }
 0x562   : > { %v4167_v25 = vpop.f32.mrf.mxu0 }
 0x563   : > { %v4271_v18 = vmax.f32 %v4237_v43, 0.0  ;;  %v4168_v51 = vadd.f32 %v7723_v32, %v4167_v25 }
 0x564   : > { %v5734_v49 = vpop.f32.mrf.mxu0 }
 0x565   : > { %4305 = vst [vmem:[%s7730_s21 + $0x100] sm:$0xff] %v4271_v18  ;;  %v4238_v50 = vadd.f32 %v4204_v36, %v4168_v51 }
 0x567   : > { %v4272_v53 = vmax.f32 %v4238_v50, 0.0 }
 0x569   : > { %4306 = vst [vmem:[%s7730_s21 + $0x108] sm:$0xff] %v4272_v53 }
 0x56a   : > { %6067 = shalt.err (!%p6064_p0)
}
 0x56b   : > { %s6068_s26 = scalar_lea.hbm %s7818_s12, 4352  ;;  %s6072_s21 = scalar_lea.hbm %s7873_s8, 8704 }
 0x56c   : > { %p6069_p6 = scmp.ne.s32.totalorder %s7818_s12, %s6068_s26  ;;  %p6073_p1 = scmp.lt.s32.totalorder %s7818_s12, %s7873_s8 }
 0x56d   : > { %p6074_p5 = scmp.lt.s32.totalorder %s6072_s21, %s6068_s26 }
 0x56e   : > { %p6070_p9 = pnand %p6069_p6, %p7909_p3 }
 0x56f   : > { %p6075_p10 = por %p6074_p5, %p6073_p1 }
 0x570   : > { %p6071_p13 = pneg %p6070_p9 }
 0x572   : > { %p6076_p12 = pnand %p6075_p10, %p6071_p13 }
 0x574   : > { %6079 = shalt.err (!%p6076_p12)
}
 0x575   : > { %s6133_s25 = smov 128   ;;  %s6134_s17 = smov 8  }
 0x576   : > { %5766 = dma.vmem_to_hbm [thread:$0]  (%p7909_p3), %s7820_s19, 4352, %s7818_s12, %s7825_s9, %s6133_s25, %s6133_s25, %s6134_s17  }
 0x577 PF: > { %p5788_p2 = scmp.ge.s32.totalorder %s6122_s30, 2  ;;  %s4336_s20 = sand.u32 1, %s6110_s27  }
 0x578   : > { %p7910_p4 = scmp.ne.s32.totalorder %s7882_s16, 0  ;;  %s4337_s22 = scalar_lea.sflag [#allocation5], %s4336_s20 }
 0x57a   : > { %p5779_p7 = pnand %p5788_p2, %p7910_p4 }
 0x57c   : > { %p5780_p8 = pneg %p5779_p7 }
 0x57e   : > { %6105 = dma.done.wait (%p5780_p8), %s4337_s22, 4352  }
 0x57f   : > { %6107 = vsyncadd (%p5780_p8), %s4337_s22, 4294962944  ;;  %p20_p11 = scmp.ge.s32.totalorder %s6205_s11, 4   ;;  %s7911_s27 = smov %s6114_s28 }
 0x580   : > { %s7912_s28 = smov %s6118_s29  ;;  %s7913_s29 = smov %s6216_s14 }
 0x581   : > { %s7914_s30 = smov %s6205_s11  ;;  %22 = sbr.rel (!%p20_p11) target bundleno = 5 (0x5), region = 108 }
 0x586   :  { %4342 = vsyncpa [#allocation4], 1 }
 0x587   :  { %4344 = vsyncpa [#allocation4 + $0x1], 1 }
 0x588   :  { %4345 = vsyncpa [#allocation7], 1 }
 0x589   :  { %4346 = vsyncpa [#allocation5], 1 }
 0x58a   :  { %4348 = vsyncpa [#allocation5 + $0x1], 1 }

</bundles_post_ra>
